<compile_context>
chip_gen: v7x
topology: tpu7x:2x2x1
jax: 0.10.0
libtpu: 0.0.40
codegen_flags: <defaults>
</compile_context>

<pallas_src>
import functools

import jax
import jax.numpy as jnp
from jax.experimental import pallas as pl
from jax.experimental.pallas import tpu as pltpu


# ----------------------------------------------------------------------------
# Fused bidirectional LSTM stack kernel.
#   x_ref   : (T*B, In)  time-major flattened input (row = t*B + b)
#   weights : per layer, stacked fwd/rev along a leading axis
#               w_ih (2, In_l, 4H), w_hh (2, H, 4H), b (2, 1, 4H)  [b = b_ih+b_hh]
#   out_ref : (B, T, 2H) final-layer hidden states (fwd | rev), lane-dense
#   hbuf    : VMEM scratch (T*B, 2H) reused as each layer's time-major output
# PyTorch gate order: i, f, g, o ; gates = x @ W_ih^T + h @ W_hh^T + b_ih + b_hh
# ----------------------------------------------------------------------------
def _lstm_cell(gates, c_prev, H):
    i_g = jax.nn.sigmoid(gates[:, 0:H])
    f_g = jax.nn.sigmoid(gates[:, H:2 * H])
    g_g = jnp.tanh(gates[:, 2 * H:3 * H])
    o_g = jax.nn.sigmoid(gates[:, 3 * H:4 * H])
    c_new = f_g * c_prev + i_g * g_g
    h_new = o_g * jnp.tanh(c_new)
    return h_new, c_new


def bilstm_stack_kernel(x_ref, *refs, T, B, H, num_layers):
    out_ref = refs[-2]        # (B, T, 2H)
    hbuf = refs[-1]           # VMEM scratch (T*B, 2H)
    wrefs = refs[:-2]         # num_layers groups of (w_ih, w_hh, b)

    x2d = x_ref[...]          # (T*B, In0)

    for layer in range(num_layers):
        w_ih_ref, w_hh_ref, b_ref = wrefs[3 * layer: 3 * layer + 3]

        # Hoisted input projection: one matmul over all timesteps per direction.
        xp_f = jnp.dot(x2d, w_ih_ref[0], preferred_element_type=jnp.float32) + b_ref[0]
        xp_r = jnp.dot(x2d, w_ih_ref[1], preferred_element_type=jnp.float32) + b_ref[1]
        w_hh_f = w_hh_ref[0]
        w_hh_r = w_hh_ref[1]

        h_f = jnp.zeros((B, H), jnp.float32)
        c_f = jnp.zeros((B, H), jnp.float32)
        h_r = jnp.zeros((B, H), jnp.float32)
        c_r = jnp.zeros((B, H), jnp.float32)

        # Statically unrolled recurrence; fwd and rev advance in the same loop.
        for s in range(T):
            tf = s
            tr = T - 1 - s

            g_f = xp_f[tf * B:(tf + 1) * B, :] + jnp.dot(
                h_f, w_hh_f, preferred_element_type=jnp.float32)
            h_f, c_f = _lstm_cell(g_f, c_f, H)
            hbuf[tf * B:(tf + 1) * B, 0:H] = h_f

            g_r = xp_r[tr * B:(tr + 1) * B, :] + jnp.dot(
                h_r, w_hh_r, preferred_element_type=jnp.float32)
            h_r, c_r = _lstm_cell(g_r, c_r, H)
            hbuf[tr * B:(tr + 1) * B, H:2 * H] = h_r

        # TODO(synk): LSTM inter-layer dropout (p=0.2) omitted (inference semantics).
        x2d = hbuf[...]        # (T*B, 2H) becomes the next layer's input

    # Final layer output -> batch-major (B, T, 2H) for the attention kernel.
    for t in range(T):
        out_ref[:, t:t + 1, :] = x2d[t * B:(t + 1) * B, :][:, None, :]


def run_bilstm_stack(x_btf, lstm_params, *, hidden_size):
    """x_btf: (B, T, In) -> (B, T, 2H). lstm_params: list of dicts w_ih/w_hh/b."""
    B, T, In = x_btf.shape
    H = hidden_size
    num_layers = len(lstm_params)
    # Time-major flattened input (row = t*B + b); tiny, done once in the wrapper.
    x2d = jnp.transpose(x_btf, (1, 0, 2)).reshape(T * B, In)

    args = [x2d]
    for lp in lstm_params:
        args.extend([lp["w_ih"], lp["w_hh"], lp["b"]])

    kernel = functools.partial(bilstm_stack_kernel, T=T, B=B, H=H, num_layers=num_layers)
    return pl.pallas_call(
        kernel,
        out_shape=jax.ShapeDtypeStruct((B, T, 2 * H), jnp.float32),
        scratch_shapes=[pltpu.VMEM((T * B, 2 * H), jnp.float32)],
    )(*args)


# ----------------------------------------------------------------------------
# SparseAttention (heads=1): qkv projection, scaled dot-product, per-row top-k
# sparsification (keep dots >= k-th largest), relu(v), softmax, out projection.
# Whole batch handled in a single invocation (static loop over B inside).
# ----------------------------------------------------------------------------
def attn_kernel(x_ref, wqkv_ref, wout_ref, bout_ref, o_ref, *, scale, k_top, inner):
    B, N, D = x_ref.shape
    wqkv = wqkv_ref[...]
    wout = wout_ref[...]
    bout = bout_ref[...]
    mask_value = -1e30  # finite, still underflows to exactly 0 after softmax

    for b in range(B):  # B is small and static
        x = x_ref[b]                                                   # (N, D)
        qkv = jnp.dot(x, wqkv, preferred_element_type=jnp.float32)     # (N, 3*inner)
        q = qkv[:, 0:inner]
        k = qkv[:, inner:2 * inner]
        v = qkv[:, 2 * inner:3 * inner]

        dots = jnp.dot(q, k.T, preferred_element_type=jnp.float32) * scale  # (N, N)

        # k-th largest per row counting duplicates (== torch.topk(...).values[..., -1]).
        # Iterative positional removal: O(k_top * N^2) work, O(N^2) memory.
        work = dots
        kth = jnp.max(work, axis=-1, keepdims=True)
        if k_top > 1:
            iota = jax.lax.broadcasted_iota(jnp.int32, (N, N), 1)
            for _ in range(k_top - 1):
                is_max = work == kth
                first = jnp.min(jnp.where(is_max, iota, N), axis=-1, keepdims=True)
                work = jnp.where(iota == first, -jnp.inf, work)
                kth = jnp.max(work, axis=-1, keepdims=True)

        dots = jnp.where(dots >= kth, dots, mask_value)

        v = jnp.maximum(v, 0.0)                                        # relu(v)
        attn = jax.nn.softmax(dots, axis=-1)
        out = jnp.dot(attn, v, preferred_element_type=jnp.float32)     # (N, inner)

        # TODO(synk): nn.Dropout in to_out omitted (inference semantics).
        proj = jnp.dot(out, wout, preferred_element_type=jnp.float32) + bout
        o_ref[b] = proj.astype(o_ref.dtype)


def sparse_attention(x, w_qkv_t, w_out_t, b_out, *, scale, sparsity):
    B, N, D = x.shape
    inner = w_qkv_t.shape[1] // 3
    k_top = max(1, int(sparsity * N))
    kernel = functools.partial(attn_kernel, scale=scale, k_top=k_top, inner=inner)
    return pl.pallas_call(
        kernel,
        out_shape=jax.ShapeDtypeStruct((B, N, D), jnp.float32),
    )(x, w_qkv_t, w_out_t, b_out)


# ----------------------------------------------------------------------------
# Parameter init (deterministic, PyTorch-style uniform ranges) and full forward
# ----------------------------------------------------------------------------
def init_params(key, *, input_size=40, hidden_size=64, num_layers=2,
                embed_dim=128, num_heads=1):
    dim = 2 * hidden_size
    inner = embed_dim * num_heads

    def uni(k, shape, bound):
        return jax.random.uniform(k, shape, jnp.float32, minval=-bound, maxval=bound)

    bound_lstm = 1.0 / (hidden_size ** 0.5)
    lstm = []
    for layer in range(num_layers):
        in_f = input_size if layer == 0 else 2 * hidden_size
        key, k1, k2, k3, k4 = jax.random.split(key, 5)
        lstm.append({
            # stacked (fwd, rev), pre-transposed: W_ih^T, W_hh^T, b = b_ih + b_hh
            "w_ih": uni(k1, (2, in_f, 4 * hidden_size), bound_lstm),
            "w_hh": uni(k2, (2, hidden_size, 4 * hidden_size), bound_lstm),
            "b": (uni(k3, (2, 1, 4 * hidden_size), bound_lstm)
                  + uni(k4, (2, 1, 4 * hidden_size), bound_lstm)),
        })

    key, kq, kw, kb = jax.random.split(key, 4)
    bound_qkv = 1.0 / (dim ** 0.5)
    bound_out = 1.0 / (inner ** 0.5)
    return {
        "lstm": lstm,
        "hidden_size": hidden_size,
        "w_qkv_t": uni(kq, (dim, 3 * inner), bound_qkv),   # to_qkv.weight^T (no bias)
        "w_out_t": uni(kw, (inner, dim), bound_out),       # to_out[0].weight^T
        "b_out": uni(kb, (1, dim), bound_out),             # to_out[0].bias
        "scale": dim ** (-0.5),
    }


def bi_lstm_sparse_attention(x, params, *, sparsity=0.1):
    r_out = run_bilstm_stack(x, params["lstm"], hidden_size=params["hidden_size"])
    return sparse_attention(
        r_out, params["w_qkv_t"], params["w_out_t"], params["b_out"],
        scale=params["scale"], sparsity=sparsity,
    )


if __name__ == "__main__":
    key = jax.random.PRNGKey(0)
    k_x, k_p = jax.random.split(key)

    B, T, F = 2, 8, 40
    x = jax.random.normal(k_x, (B, T, F), jnp.float32)
    params = init_params(k_p, input_size=F, hidden_size=64, num_layers=2,
                         embed_dim=128, num_heads=1)

    out = bi_lstm_sparse_attention(x, params, sparsity=0.1)
    out = jax.block_until_ready(out)
    assert out.shape == (B, T, 128), out.shape
    assert bool(jnp.all(jnp.isfinite(out)))
    print("KERNEL_OK")
</pallas_src>

<mosaic_0001>
module attributes {stable_mosaic.version = 11 : i64} {
  func.func @bilstm_stack_kernel(%arg0: memref<16x40xf32, #tpu.memory_space<vmem>>, %arg1: memref<2x40x256xf32, #tpu.memory_space<vmem>>, %arg2: memref<2x64x256xf32, #tpu.memory_space<vmem>>, %arg3: memref<2x1x256xf32, #tpu.memory_space<vmem>>, %arg4: memref<2x128x256xf32, #tpu.memory_space<vmem>>, %arg5: memref<2x64x256xf32, #tpu.memory_space<vmem>>, %arg6: memref<2x1x256xf32, #tpu.memory_space<vmem>>, %arg7: memref<2x8x128xf32, #tpu.memory_space<vmem>>, %arg8: memref<16x128xf32, #tpu.memory_space<vmem>>) attributes {dimension_semantics = [], scalar_prefetch = 0 : i64, scratch_operands = 1 : i64, tpu.core_type = #tpu.core_type<tc>} {
    %c0 = arith.constant 0 : index
    %c0_0 = arith.constant 0 : index
    %0 = vector.load %arg0[%c0, %c0_0] : memref<16x40xf32, #tpu.memory_space<vmem>>, vector<16x40xf32>
    %c0_1 = arith.constant 0 : index
    %c0_2 = arith.constant 0 : index
    %c0_3 = arith.constant 0 : index
    %1 = vector.load %arg1[%c0_1, %c0_2, %c0_3] : memref<2x40x256xf32, #tpu.memory_space<vmem>>, vector<1x40x256xf32>
    %2 = vector.shape_cast %1 : vector<1x40x256xf32> to vector<40x256xf32>
    %cst = arith.constant dense<0.000000e+00> : vector<16x256xf32>
    %3 = tpu.matmul %0, %2, %cst {dimension_numbers = #tpu.dot_dimension_numbers<[1], [0], [0], [1], [0, 0, 1, 1], [], []>} : vector<16x40xf32>, vector<40x256xf32>, vector<16x256xf32> -> vector<16x256xf32>
    %c0_4 = arith.constant 0 : index
    %c0_5 = arith.constant 0 : index
    %c0_6 = arith.constant 0 : index
    %4 = vector.load %arg3[%c0_4, %c0_5, %c0_6] : memref<2x1x256xf32, #tpu.memory_space<vmem>>, vector<1x1x256xf32>
    %5 = vector.shape_cast %4 : vector<1x1x256xf32> to vector<1x256xf32>
    %6 = vector.broadcast %5 : vector<1x256xf32> to vector<16x256xf32>
    %7 = arith.addf %3, %6 : vector<16x256xf32>
    %c1 = arith.constant 1 : index
    %c0_7 = arith.constant 0 : index
    %c0_8 = arith.constant 0 : index
    %8 = vector.load %arg1[%c1, %c0_7, %c0_8] : memref<2x40x256xf32, #tpu.memory_space<vmem>>, vector<1x40x256xf32>
    %9 = vector.shape_cast %8 : vector<1x40x256xf32> to vector<40x256xf32>
    %cst_9 = arith.constant dense<0.000000e+00> : vector<16x256xf32>
    %10 = tpu.matmul %0, %9, %cst_9 {dimension_numbers = #tpu.dot_dimension_numbers<[1], [0], [0], [1], [0, 0, 1, 1], [], []>} : vector<16x40xf32>, vector<40x256xf32>, vector<16x256xf32> -> vector<16x256xf32>
    %c1_10 = arith.constant 1 : index
    %c0_11 = arith.constant 0 : index
    %c0_12 = arith.constant 0 : index
    %11 = vector.load %arg3[%c1_10, %c0_11, %c0_12] : memref<2x1x256xf32, #tpu.memory_space<vmem>>, vector<1x1x256xf32>
    %12 = vector.shape_cast %11 : vector<1x1x256xf32> to vector<1x256xf32>
    %13 = vector.broadcast %12 : vector<1x256xf32> to vector<16x256xf32>
    %14 = arith.addf %10, %13 : vector<16x256xf32>
    %c0_13 = arith.constant 0 : index
    %c0_14 = arith.constant 0 : index
    %c0_15 = arith.constant 0 : index
    %15 = vector.load %arg2[%c0_13, %c0_14, %c0_15] : memref<2x64x256xf32, #tpu.memory_space<vmem>>, vector<1x64x256xf32>
    %16 = vector.shape_cast %15 : vector<1x64x256xf32> to vector<64x256xf32>
    %c1_16 = arith.constant 1 : index
    %c0_17 = arith.constant 0 : index
    %c0_18 = arith.constant 0 : index
    %17 = vector.load %arg2[%c1_16, %c0_17, %c0_18] : memref<2x64x256xf32, #tpu.memory_space<vmem>>, vector<1x64x256xf32>
    %18 = vector.shape_cast %17 : vector<1x64x256xf32> to vector<64x256xf32>
    %cst_19 = arith.constant 0.000000e+00 : f32
    %19 = vector.broadcast %cst_19 : f32 to vector<2x64xf32>
    %cst_20 = arith.constant 0.000000e+00 : f32
    %20 = vector.broadcast %cst_20 : f32 to vector<2x64xf32>
    %cst_21 = arith.constant 0.000000e+00 : f32
    %21 = vector.broadcast %cst_21 : f32 to vector<2x64xf32>
    %cst_22 = arith.constant 0.000000e+00 : f32
    %22 = vector.broadcast %cst_22 : f32 to vector<2x64xf32>
    %23 = vector.extract_strided_slice %7 {offsets = [0, 0], sizes = [2, 256], strides = [1, 1]} : vector<16x256xf32> to vector<2x256xf32>
    %cst_23 = arith.constant dense<0.000000e+00> : vector<2x256xf32>
    %24 = tpu.matmul %19, %16, %cst_23 {dimension_numbers = #tpu.dot_dimension_numbers<[1], [0], [0], [1], [0, 0, 1, 1], [], []>} : vector<2x64xf32>, vector<64x256xf32>, vector<2x256xf32> -> vector<2x256xf32>
    %25 = arith.addf %23, %24 : vector<2x256xf32>
    %26 = vector.extract_strided_slice %25 {offsets = [0, 0], sizes = [2, 64], strides = [1, 1]} : vector<2x256xf32> to vector<2x64xf32>
    %27 = arith.negf %26 : vector<2x64xf32>
    %28 = math.exp %27 : vector<2x64xf32>
    %cst_24 = arith.constant 1.000000e+00 : f32
    %29 = vector.broadcast %cst_24 : f32 to vector<2x64xf32>
    %30 = arith.addf %29, %28 : vector<2x64xf32>
    %31 = arith.divf %29, %30 : vector<2x64xf32>
    %32 = vector.extract_strided_slice %25 {offsets = [0, 64], sizes = [2, 64], strides = [1, 1]} : vector<2x256xf32> to vector<2x64xf32>
    %33 = arith.negf %32 : vector<2x64xf32>
    %34 = math.exp %33 : vector<2x64xf32>
    %cst_25 = arith.constant 1.000000e+00 : f32
    %35 = vector.broadcast %cst_25 : f32 to vector<2x64xf32>
    %36 = arith.addf %35, %34 : vector<2x64xf32>
    %37 = arith.divf %35, %36 : vector<2x64xf32>
    %38 = vector.extract_strided_slice %25 {offsets = [0, 128], sizes = [2, 64], strides = [1, 1]} : vector<2x256xf32> to vector<2x64xf32>
    %39 = math.tanh %38 : vector<2x64xf32>
    %40 = vector.extract_strided_slice %25 {offsets = [0, 192], sizes = [2, 64], strides = [1, 1]} : vector<2x256xf32> to vector<2x64xf32>
    %41 = arith.negf %40 : vector<2x64xf32>
    %42 = math.exp %41 : vector<2x64xf32>
    %cst_26 = arith.constant 1.000000e+00 : f32
    %43 = vector.broadcast %cst_26 : f32 to vector<2x64xf32>
    %44 = arith.addf %43, %42 : vector<2x64xf32>
    %45 = arith.divf %43, %44 : vector<2x64xf32>
    %46 = arith.mulf %37, %20 : vector<2x64xf32>
    %47 = arith.mulf %31, %39 : vector<2x64xf32>
    %48 = arith.addf %46, %47 : vector<2x64xf32>
    %49 = math.tanh %48 : vector<2x64xf32>
    %50 = arith.mulf %45, %49 : vector<2x64xf32>
    %c0_27 = arith.constant 0 : index
    %c0_28 = arith.constant 0 : index
    %51 = vector.load %arg8[%c0_27, %c0_28] : memref<16x128xf32, #tpu.memory_space<vmem>>, vector<2x64xf32>
    tpu.vector_store %arg8[%c0_27, %c0_28], %50 {strides = array<i32>} : memref<16x128xf32, #tpu.memory_space<vmem>>, vector<2x64xf32>,
    %52 = vector.extract_strided_slice %14 {offsets = [14, 0], sizes = [2, 256], strides = [1, 1]} : vector<16x256xf32> to vector<2x256xf32>
    %cst_29 = arith.constant dense<0.000000e+00> : vector<2x256xf32>
    %53 = tpu.matmul %21, %18, %cst_29 {dimension_numbers = #tpu.dot_dimension_numbers<[1], [0], [0], [1], [0, 0, 1, 1], [], []>} : vector<2x64xf32>, vector<64x256xf32>, vector<2x256xf32> -> vector<2x256xf32>
    %54 = arith.addf %52, %53 : vector<2x256xf32>
    %55 = vector.extract_strided_slice %54 {offsets = [0, 0], sizes = [2, 64], strides = [1, 1]} : vector<2x256xf32> to vector<2x64xf32>
    %56 = arith.negf %55 : vector<2x64xf32>
    %57 = math.exp %56 : vector<2x64xf32>
    %cst_30 = arith.constant 1.000000e+00 : f32
    %58 = vector.broadcast %cst_30 : f32 to vector<2x64xf32>
    %59 = arith.addf %58, %57 : vector<2x64xf32>
    %60 = arith.divf %58, %59 : vector<2x64xf32>
    %61 = vector.extract_strided_slice %54 {offsets = [0, 64], sizes = [2, 64], strides = [1, 1]} : vector<2x256xf32> to vector<2x64xf32>
    %62 = arith.negf %61 : vector<2x64xf32>
    %63 = math.exp %62 : vector<2x64xf32>
    %cst_31 = arith.constant 1.000000e+00 : f32
    %64 = vector.broadcast %cst_31 : f32 to vector<2x64xf32>
    %65 = arith.addf %64, %63 : vector<2x64xf32>
    %66 = arith.divf %64, %65 : vector<2x64xf32>
    %67 = vector.extract_strided_slice %54 {offsets = [0, 128], sizes = [2, 64], strides = [1, 1]} : vector<2x256xf32> to vector<2x64xf32>
    %68 = math.tanh %67 : vector<2x64xf32>
    %69 = vector.extract_strided_slice %54 {offsets = [0, 192], sizes = [2, 64], strides = [1, 1]} : vector<2x256xf32> to vector<2x64xf32>
    %70 = arith.negf %69 : vector<2x64xf32>
    %71 = math.exp %70 : vector<2x64xf32>
    %cst_32 = arith.constant 1.000000e+00 : f32
    %72 = vector.broadcast %cst_32 : f32 to vector<2x64xf32>
    %73 = arith.addf %72, %71 : vector<2x64xf32>
    %74 = arith.divf %72, %73 : vector<2x64xf32>
    %75 = arith.mulf %66, %22 : vector<2x64xf32>
    %76 = arith.mulf %60, %68 : vector<2x64xf32>
    %77 = arith.addf %75, %76 : vector<2x64xf32>
    %78 = math.tanh %77 : vector<2x64xf32>
    %79 = arith.mulf %74, %78 : vector<2x64xf32>
    %c14 = arith.constant 14 : index
    %c64 = arith.constant 64 : index
    %80 = vector.load %arg8[%c14, %c64] : memref<16x128xf32, #tpu.memory_space<vmem>>, vector<2x64xf32>
    tpu.vector_store %arg8[%c14, %c64], %79 {strides = array<i32>} : memref<16x128xf32, #tpu.memory_space<vmem>>, vector<2x64xf32>,
    %81 = vector.extract_strided_slice %7 {offsets = [2, 0], sizes = [2, 256], strides = [1, 1]} : vector<16x256xf32> to vector<2x256xf32>
    %cst_33 = arith.constant dense<0.000000e+00> : vector<2x256xf32>
    %82 = tpu.matmul %50, %16, %cst_33 {dimension_numbers = #tpu.dot_dimension_numbers<[1], [0], [0], [1], [0, 0, 1, 1], [], []>} : vector<2x64xf32>, vector<64x256xf32>, vector<2x256xf32> -> vector<2x256xf32>
    %83 = arith.addf %81, %82 : vector<2x256xf32>
    %84 = vector.extract_strided_slice %83 {offsets = [0, 0], sizes = [2, 64], strides = [1, 1]} : vector<2x256xf32> to vector<2x64xf32>
    %85 = arith.negf %84 : vector<2x64xf32>
    %86 = math.exp %85 : vector<2x64xf32>
    %cst_34 = arith.constant 1.000000e+00 : f32
    %87 = vector.broadcast %cst_34 : f32 to vector<2x64xf32>
    %88 = arith.addf %87, %86 : vector<2x64xf32>
    %89 = arith.divf %87, %88 : vector<2x64xf32>
    %90 = vector.extract_strided_slice %83 {offsets = [0, 64], sizes = [2, 64], strides = [1, 1]} : vector<2x256xf32> to vector<2x64xf32>
    %91 = arith.negf %90 : vector<2x64xf32>
    %92 = math.exp %91 : vector<2x64xf32>
    %cst_35 = arith.constant 1.000000e+00 : f32
    %93 = vector.broadcast %cst_35 : f32 to vector<2x64xf32>
    %94 = arith.addf %93, %92 : vector<2x64xf32>
    %95 = arith.divf %93, %94 : vector<2x64xf32>
    %96 = vector.extract_strided_slice %83 {offsets = [0, 128], sizes = [2, 64], strides = [1, 1]} : vector<2x256xf32> to vector<2x64xf32>
    %97 = math.tanh %96 : vector<2x64xf32>
    %98 = vector.extract_strided_slice %83 {offsets = [0, 192], sizes = [2, 64], strides = [1, 1]} : vector<2x256xf32> to vector<2x64xf32>
    %99 = arith.negf %98 : vector<2x64xf32>
    %100 = math.exp %99 : vector<2x64xf32>
    %cst_36 = arith.constant 1.000000e+00 : f32
    %101 = vector.broadcast %cst_36 : f32 to vector<2x64xf32>
    %102 = arith.addf %101, %100 : vector<2x64xf32>
    %103 = arith.divf %101, %102 : vector<2x64xf32>
    %104 = arith.mulf %95, %48 : vector<2x64xf32>
    %105 = arith.mulf %89, %97 : vector<2x64xf32>
    %106 = arith.addf %104, %105 : vector<2x64xf32>
    %107 = math.tanh %106 : vector<2x64xf32>
    %108 = arith.mulf %103, %107 : vector<2x64xf32>
    %c2 = arith.constant 2 : index
    %c0_37 = arith.constant 0 : index
    %109 = vector.load %arg8[%c2, %c0_37] : memref<16x128xf32, #tpu.memory_space<vmem>>, vector<2x64xf32>
    tpu.vector_store %arg8[%c2, %c0_37], %108 {strides = array<i32>} : memref<16x128xf32, #tpu.memory_space<vmem>>, vector<2x64xf32>,
    %110 = vector.extract_strided_slice %14 {offsets = [12, 0], sizes = [2, 256], strides = [1, 1]} : vector<16x256xf32> to vector<2x256xf32>
    %cst_38 = arith.constant dense<0.000000e+00> : vector<2x256xf32>
    %111 = tpu.matmul %79, %18, %cst_38 {dimension_numbers = #tpu.dot_dimension_numbers<[1], [0], [0], [1], [0, 0, 1, 1], [], []>} : vector<2x64xf32>, vector<64x256xf32>, vector<2x256xf32> -> vector<2x256xf32>
    %112 = arith.addf %110, %111 : vector<2x256xf32>
    %113 = vector.extract_strided_slice %112 {offsets = [0, 0], sizes = [2, 64], strides = [1, 1]} : vector<2x256xf32> to vector<2x64xf32>
    %114 = arith.negf %113 : vector<2x64xf32>
    %115 = math.exp %114 : vector<2x64xf32>
    %cst_39 = arith.constant 1.000000e+00 : f32
    %116 = vector.broadcast %cst_39 : f32 to vector<2x64xf32>
    %117 = arith.addf %116, %115 : vector<2x64xf32>
    %118 = arith.divf %116, %117 : vector<2x64xf32>
    %119 = vector.extract_strided_slice %112 {offsets = [0, 64], sizes = [2, 64], strides = [1, 1]} : vector<2x256xf32> to vector<2x64xf32>
    %120 = arith.negf %119 : vector<2x64xf32>
    %121 = math.exp %120 : vector<2x64xf32>
    %cst_40 = arith.constant 1.000000e+00 : f32
    %122 = vector.broadcast %cst_40 : f32 to vector<2x64xf32>
    %123 = arith.addf %122, %121 : vector<2x64xf32>
    %124 = arith.divf %122, %123 : vector<2x64xf32>
    %125 = vector.extract_strided_slice %112 {offsets = [0, 128], sizes = [2, 64], strides = [1, 1]} : vector<2x256xf32> to vector<2x64xf32>
    %126 = math.tanh %125 : vector<2x64xf32>
    %127 = vector.extract_strided_slice %112 {offsets = [0, 192], sizes = [2, 64], strides = [1, 1]} : vector<2x256xf32> to vector<2x64xf32>
    %128 = arith.negf %127 : vector<2x64xf32>
    %129 = math.exp %128 : vector<2x64xf32>
    %cst_41 = arith.constant 1.000000e+00 : f32
    %130 = vector.broadcast %cst_41 : f32 to vector<2x64xf32>
    %131 = arith.addf %130, %129 : vector<2x64xf32>
    %132 = arith.divf %130, %131 : vector<2x64xf32>
    %133 = arith.mulf %124, %77 : vector<2x64xf32>
    %134 = arith.mulf %118, %126 : vector<2x64xf32>
    %135 = arith.addf %133, %134 : vector<2x64xf32>
    %136 = math.tanh %135 : vector<2x64xf32>
    %137 = arith.mulf %132, %136 : vector<2x64xf32>
    %c12 = arith.constant 12 : index
    %c64_42 = arith.constant 64 : index
    %138 = vector.load %arg8[%c12, %c64_42] : memref<16x128xf32, #tpu.memory_space<vmem>>, vector<2x64xf32>
    tpu.vector_store %arg8[%c12, %c64_42], %137 {strides = array<i32>} : memref<16x128xf32, #tpu.memory_space<vmem>>, vector<2x64xf32>,
    %139 = vector.extract_strided_slice %7 {offsets = [4, 0], sizes = [2, 256], strides = [1, 1]} : vector<16x256xf32> to vector<2x256xf32>
    %cst_43 = arith.constant dense<0.000000e+00> : vector<2x256xf32>
    %140 = tpu.matmul %108, %16, %cst_43 {dimension_numbers = #tpu.dot_dimension_numbers<[1], [0], [0], [1], [0, 0, 1, 1], [], []>} : vector<2x64xf32>, vector<64x256xf32>, vector<2x256xf32> -> vector<2x256xf32>
    %141 = arith.addf %139, %140 : vector<2x256xf32>
    %142 = vector.extract_strided_slice %141 {offsets = [0, 0], sizes = [2, 64], strides = [1, 1]} : vector<2x256xf32> to vector<2x64xf32>
    %143 = arith.negf %142 : vector<2x64xf32>
    %144 = math.exp %143 : vector<2x64xf32>
    %cst_44 = arith.constant 1.000000e+00 : f32
    %145 = vector.broadcast %cst_44 : f32 to vector<2x64xf32>
    %146 = arith.addf %145, %144 : vector<2x64xf32>
    %147 = arith.divf %145, %146 : vector<2x64xf32>
    %148 = vector.extract_strided_slice %141 {offsets = [0, 64], sizes = [2, 64], strides = [1, 1]} : vector<2x256xf32> to vector<2x64xf32>
    %149 = arith.negf %148 : vector<2x64xf32>
    %150 = math.exp %149 : vector<2x64xf32>
    %cst_45 = arith.constant 1.000000e+00 : f32
    %151 = vector.broadcast %cst_45 : f32 to vector<2x64xf32>
    %152 = arith.addf %151, %150 : vector<2x64xf32>
    %153 = arith.divf %151, %152 : vector<2x64xf32>
    %154 = vector.extract_strided_slice %141 {offsets = [0, 128], sizes = [2, 64], strides = [1, 1]} : vector<2x256xf32> to vector<2x64xf32>
    %155 = math.tanh %154 : vector<2x64xf32>
    %156 = vector.extract_strided_slice %141 {offsets = [0, 192], sizes = [2, 64], strides = [1, 1]} : vector<2x256xf32> to vector<2x64xf32>
    %157 = arith.negf %156 : vector<2x64xf32>
    %158 = math.exp %157 : vector<2x64xf32>
    %cst_46 = arith.constant 1.000000e+00 : f32
    %159 = vector.broadcast %cst_46 : f32 to vector<2x64xf32>
    %160 = arith.addf %159, %158 : vector<2x64xf32>
    %161 = arith.divf %159, %160 : vector<2x64xf32>
    %162 = arith.mulf %153, %106 : vector<2x64xf32>
    %163 = arith.mulf %147, %155 : vector<2x64xf32>
    %164 = arith.addf %162, %163 : vector<2x64xf32>
    %165 = math.tanh %164 : vector<2x64xf32>
    %166 = arith.mulf %161, %165 : vector<2x64xf32>
    %c4 = arith.constant 4 : index
    %c0_47 = arith.constant 0 : index
    %167 = vector.load %arg8[%c4, %c0_47] : memref<16x128xf32, #tpu.memory_space<vmem>>, vector<2x64xf32>
    tpu.vector_store %arg8[%c4, %c0_47], %166 {strides = array<i32>} : memref<16x128xf32, #tpu.memory_space<vmem>>, vector<2x64xf32>,
    %168 = vector.extract_strided_slice %14 {offsets = [10, 0], sizes = [2, 256], strides = [1, 1]} : vector<16x256xf32> to vector<2x256xf32>
    %cst_48 = arith.constant dense<0.000000e+00> : vector<2x256xf32>
    %169 = tpu.matmul %137, %18, %cst_48 {dimension_numbers = #tpu.dot_dimension_numbers<[1], [0], [0], [1], [0, 0, 1, 1], [], []>} : vector<2x64xf32>, vector<64x256xf32>, vector<2x256xf32> -> vector<2x256xf32>
    %170 = arith.addf %168, %169 : vector<2x256xf32>
    %171 = vector.extract_strided_slice %170 {offsets = [0, 0], sizes = [2, 64], strides = [1, 1]} : vector<2x256xf32> to vector<2x64xf32>
    %172 = arith.negf %171 : vector<2x64xf32>
    %173 = math.exp %172 : vector<2x64xf32>
    %cst_49 = arith.constant 1.000000e+00 : f32
    %174 = vector.broadcast %cst_49 : f32 to vector<2x64xf32>
    %175 = arith.addf %174, %173 : vector<2x64xf32>
    %176 = arith.divf %174, %175 : vector<2x64xf32>
    %177 = vector.extract_strided_slice %170 {offsets = [0, 64], sizes = [2, 64], strides = [1, 1]} : vector<2x256xf32> to vector<2x64xf32>
    %178 = arith.negf %177 : vector<2x64xf32>
    %179 = math.exp %178 : vector<2x64xf32>
    %cst_50 = arith.constant 1.000000e+00 : f32
    %180 = vector.broadcast %cst_50 : f32 to vector<2x64xf32>
    %181 = arith.addf %180, %179 : vector<2x64xf32>
    %182 = arith.divf %180, %181 : vector<2x64xf32>
    %183 = vector.extract_strided_slice %170 {offsets = [0, 128], sizes = [2, 64], strides = [1, 1]} : vector<2x256xf32> to vector<2x64xf32>
    %184 = math.tanh %183 : vector<2x64xf32>
    %185 = vector.extract_strided_slice %170 {offsets = [0, 192], sizes = [2, 64], strides = [1, 1]} : vector<2x256xf32> to vector<2x64xf32>
    %186 = arith.negf %185 : vector<2x64xf32>
    %187 = math.exp %186 : vector<2x64xf32>
    %cst_51 = arith.constant 1.000000e+00 : f32
    %188 = vector.broadcast %cst_51 : f32 to vector<2x64xf32>
    %189 = arith.addf %188, %187 : vector<2x64xf32>
    %190 = arith.divf %188, %189 : vector<2x64xf32>
    %191 = arith.mulf %182, %135 : vector<2x64xf32>
    %192 = arith.mulf %176, %184 : vector<2x64xf32>
    %193 = arith.addf %191, %192 : vector<2x64xf32>
    %194 = math.tanh %193 : vector<2x64xf32>
    %195 = arith.mulf %190, %194 : vector<2x64xf32>
    %c10 = arith.constant 10 : index
    %c64_52 = arith.constant 64 : index
    %196 = vector.load %arg8[%c10, %c64_52] : memref<16x128xf32, #tpu.memory_space<vmem>>, vector<2x64xf32>
    tpu.vector_store %arg8[%c10, %c64_52], %195 {strides = array<i32>} : memref<16x128xf32, #tpu.memory_space<vmem>>, vector<2x64xf32>,
    %197 = vector.extract_strided_slice %7 {offsets = [6, 0], sizes = [2, 256], strides = [1, 1]} : vector<16x256xf32> to vector<2x256xf32>
    %cst_53 = arith.constant dense<0.000000e+00> : vector<2x256xf32>
    %198 = tpu.matmul %166, %16, %cst_53 {dimension_numbers = #tpu.dot_dimension_numbers<[1], [0], [0], [1], [0, 0, 1, 1], [], []>} : vector<2x64xf32>, vector<64x256xf32>, vector<2x256xf32> -> vector<2x256xf32>
    %199 = arith.addf %197, %198 : vector<2x256xf32>
    %200 = vector.extract_strided_slice %199 {offsets = [0, 0], sizes = [2, 64], strides = [1, 1]} : vector<2x256xf32> to vector<2x64xf32>
    %201 = arith.negf %200 : vector<2x64xf32>
    %202 = math.exp %201 : vector<2x64xf32>
    %cst_54 = arith.constant 1.000000e+00 : f32
    %203 = vector.broadcast %cst_54 : f32 to vector<2x64xf32>
    %204 = arith.addf %203, %202 : vector<2x64xf32>
    %205 = arith.divf %203, %204 : vector<2x64xf32>
    %206 = vector.extract_strided_slice %199 {offsets = [0, 64], sizes = [2, 64], strides = [1, 1]} : vector<2x256xf32> to vector<2x64xf32>
    %207 = arith.negf %206 : vector<2x64xf32>
    %208 = math.exp %207 : vector<2x64xf32>
    %cst_55 = arith.constant 1.000000e+00 : f32
    %209 = vector.broadcast %cst_55 : f32 to vector<2x64xf32>
    %210 = arith.addf %209, %208 : vector<2x64xf32>
    %211 = arith.divf %209, %210 : vector<2x64xf32>
    %212 = vector.extract_strided_slice %199 {offsets = [0, 128], sizes = [2, 64], strides = [1, 1]} : vector<2x256xf32> to vector<2x64xf32>
    %213 = math.tanh %212 : vector<2x64xf32>
    %214 = vector.extract_strided_slice %199 {offsets = [0, 192], sizes = [2, 64], strides = [1, 1]} : vector<2x256xf32> to vector<2x64xf32>
    %215 = arith.negf %214 : vector<2x64xf32>
    %216 = math.exp %215 : vector<2x64xf32>
    %cst_56 = arith.constant 1.000000e+00 : f32
    %217 = vector.broadcast %cst_56 : f32 to vector<2x64xf32>
    %218 = arith.addf %217, %216 : vector<2x64xf32>
    %219 = arith.divf %217, %218 : vector<2x64xf32>
    %220 = arith.mulf %211, %164 : vector<2x64xf32>
    %221 = arith.mulf %205, %213 : vector<2x64xf32>
    %222 = arith.addf %220, %221 : vector<2x64xf32>
    %223 = math.tanh %222 : vector<2x64xf32>
    %224 = arith.mulf %219, %223 : vector<2x64xf32>
    %c6 = arith.constant 6 : index
    %c0_57 = arith.constant 0 : index
    %225 = vector.load %arg8[%c6, %c0_57] : memref<16x128xf32, #tpu.memory_space<vmem>>, vector<2x64xf32>
    tpu.vector_store %arg8[%c6, %c0_57], %224 {strides = array<i32>} : memref<16x128xf32, #tpu.memory_space<vmem>>, vector<2x64xf32>,
    %226 = vector.extract_strided_slice %14 {offsets = [8, 0], sizes = [2, 256], strides = [1, 1]} : vector<16x256xf32> to vector<2x256xf32>
    %cst_58 = arith.constant dense<0.000000e+00> : vector<2x256xf32>
    %227 = tpu.matmul %195, %18, %cst_58 {dimension_numbers = #tpu.dot_dimension_numbers<[1], [0], [0], [1], [0, 0, 1, 1], [], []>} : vector<2x64xf32>, vector<64x256xf32>, vector<2x256xf32> -> vector<2x256xf32>
    %228 = arith.addf %226, %227 : vector<2x256xf32>
    %229 = vector.extract_strided_slice %228 {offsets = [0, 0], sizes = [2, 64], strides = [1, 1]} : vector<2x256xf32> to vector<2x64xf32>
    %230 = arith.negf %229 : vector<2x64xf32>
    %231 = math.exp %230 : vector<2x64xf32>
    %cst_59 = arith.constant 1.000000e+00 : f32
    %232 = vector.broadcast %cst_59 : f32 to vector<2x64xf32>
    %233 = arith.addf %232, %231 : vector<2x64xf32>
    %234 = arith.divf %232, %233 : vector<2x64xf32>
    %235 = vector.extract_strided_slice %228 {offsets = [0, 64], sizes = [2, 64], strides = [1, 1]} : vector<2x256xf32> to vector<2x64xf32>
    %236 = arith.negf %235 : vector<2x64xf32>
    %237 = math.exp %236 : vector<2x64xf32>
    %cst_60 = arith.constant 1.000000e+00 : f32
    %238 = vector.broadcast %cst_60 : f32 to vector<2x64xf32>
    %239 = arith.addf %238, %237 : vector<2x64xf32>
    %240 = arith.divf %238, %239 : vector<2x64xf32>
    %241 = vector.extract_strided_slice %228 {offsets = [0, 128], sizes = [2, 64], strides = [1, 1]} : vector<2x256xf32> to vector<2x64xf32>
    %242 = math.tanh %241 : vector<2x64xf32>
    %243 = vector.extract_strided_slice %228 {offsets = [0, 192], sizes = [2, 64], strides = [1, 1]} : vector<2x256xf32> to vector<2x64xf32>
    %244 = arith.negf %243 : vector<2x64xf32>
    %245 = math.exp %244 : vector<2x64xf32>
    %cst_61 = arith.constant 1.000000e+00 : f32
    %246 = vector.broadcast %cst_61 : f32 to vector<2x64xf32>
    %247 = arith.addf %246, %245 : vector<2x64xf32>
    %248 = arith.divf %246, %247 : vector<2x64xf32>
    %249 = arith.mulf %240, %193 : vector<2x64xf32>
    %250 = arith.mulf %234, %242 : vector<2x64xf32>
    %251 = arith.addf %249, %250 : vector<2x64xf32>
    %252 = math.tanh %251 : vector<2x64xf32>
    %253 = arith.mulf %248, %252 : vector<2x64xf32>
    %c8 = arith.constant 8 : index
    %c64_62 = arith.constant 64 : index
    %254 = vector.load %arg8[%c8, %c64_62] : memref<16x128xf32, #tpu.memory_space<vmem>>, vector<2x64xf32>
    tpu.vector_store %arg8[%c8, %c64_62], %253 {strides = array<i32>} : memref<16x128xf32, #tpu.memory_space<vmem>>, vector<2x64xf32>,
    %255 = vector.extract_strided_slice %7 {offsets = [8, 0], sizes = [2, 256], strides = [1, 1]} : vector<16x256xf32> to vector<2x256xf32>
    %cst_63 = arith.constant dense<0.000000e+00> : vector<2x256xf32>
    %256 = tpu.matmul %224, %16, %cst_63 {dimension_numbers = #tpu.dot_dimension_numbers<[1], [0], [0], [1], [0, 0, 1, 1], [], []>} : vector<2x64xf32>, vector<64x256xf32>, vector<2x256xf32> -> vector<2x256xf32>
    %257 = arith.addf %255, %256 : vector<2x256xf32>
    %258 = vector.extract_strided_slice %257 {offsets = [0, 0], sizes = [2, 64], strides = [1, 1]} : vector<2x256xf32> to vector<2x64xf32>
    %259 = arith.negf %258 : vector<2x64xf32>
    %260 = math.exp %259 : vector<2x64xf32>
    %cst_64 = arith.constant 1.000000e+00 : f32
    %261 = vector.broadcast %cst_64 : f32 to vector<2x64xf32>
    %262 = arith.addf %261, %260 : vector<2x64xf32>
    %263 = arith.divf %261, %262 : vector<2x64xf32>
    %264 = vector.extract_strided_slice %257 {offsets = [0, 64], sizes = [2, 64], strides = [1, 1]} : vector<2x256xf32> to vector<2x64xf32>
    %265 = arith.negf %264 : vector<2x64xf32>
    %266 = math.exp %265 : vector<2x64xf32>
    %cst_65 = arith.constant 1.000000e+00 : f32
    %267 = vector.broadcast %cst_65 : f32 to vector<2x64xf32>
    %268 = arith.addf %267, %266 : vector<2x64xf32>
    %269 = arith.divf %267, %268 : vector<2x64xf32>
    %270 = vector.extract_strided_slice %257 {offsets = [0, 128], sizes = [2, 64], strides = [1, 1]} : vector<2x256xf32> to vector<2x64xf32>
    %271 = math.tanh %270 : vector<2x64xf32>
    %272 = vector.extract_strided_slice %257 {offsets = [0, 192], sizes = [2, 64], strides = [1, 1]} : vector<2x256xf32> to vector<2x64xf32>
    %273 = arith.negf %272 : vector<2x64xf32>
    %274 = math.exp %273 : vector<2x64xf32>
    %cst_66 = arith.constant 1.000000e+00 : f32
    %275 = vector.broadcast %cst_66 : f32 to vector<2x64xf32>
    %276 = arith.addf %275, %274 : vector<2x64xf32>
    %277 = arith.divf %275, %276 : vector<2x64xf32>
    %278 = arith.mulf %269, %222 : vector<2x64xf32>
    %279 = arith.mulf %263, %271 : vector<2x64xf32>
    %280 = arith.addf %278, %279 : vector<2x64xf32>
    %281 = math.tanh %280 : vector<2x64xf32>
    %282 = arith.mulf %277, %281 : vector<2x64xf32>
    %c8_67 = arith.constant 8 : index
    %c0_68 = arith.constant 0 : index
    %283 = vector.load %arg8[%c8_67, %c0_68] : memref<16x128xf32, #tpu.memory_space<vmem>>, vector<2x64xf32>
    tpu.vector_store %arg8[%c8_67, %c0_68], %282 {strides = array<i32>} : memref<16x128xf32, #tpu.memory_space<vmem>>, vector<2x64xf32>,
    %284 = vector.extract_strided_slice %14 {offsets = [6, 0], sizes = [2, 256], strides = [1, 1]} : vector<16x256xf32> to vector<2x256xf32>
    %cst_69 = arith.constant dense<0.000000e+00> : vector<2x256xf32>
    %285 = tpu.matmul %253, %18, %cst_69 {dimension_numbers = #tpu.dot_dimension_numbers<[1], [0], [0], [1], [0, 0, 1, 1], [], []>} : vector<2x64xf32>, vector<64x256xf32>, vector<2x256xf32> -> vector<2x256xf32>
    %286 = arith.addf %284, %285 : vector<2x256xf32>
    %287 = vector.extract_strided_slice %286 {offsets = [0, 0], sizes = [2, 64], strides = [1, 1]} : vector<2x256xf32> to vector<2x64xf32>
    %288 = arith.negf %287 : vector<2x64xf32>
    %289 = math.exp %288 : vector<2x64xf32>
    %cst_70 = arith.constant 1.000000e+00 : f32
    %290 = vector.broadcast %cst_70 : f32 to vector<2x64xf32>
    %291 = arith.addf %290, %289 : vector<2x64xf32>
    %292 = arith.divf %290, %291 : vector<2x64xf32>
    %293 = vector.extract_strided_slice %286 {offsets = [0, 64], sizes = [2, 64], strides = [1, 1]} : vector<2x256xf32> to vector<2x64xf32>
    %294 = arith.negf %293 : vector<2x64xf32>
    %295 = math.exp %294 : vector<2x64xf32>
    %cst_71 = arith.constant 1.000000e+00 : f32
    %296 = vector.broadcast %cst_71 : f32 to vector<2x64xf32>
    %297 = arith.addf %296, %295 : vector<2x64xf32>
    %298 = arith.divf %296, %297 : vector<2x64xf32>
    %299 = vector.extract_strided_slice %286 {offsets = [0, 128], sizes = [2, 64], strides = [1, 1]} : vector<2x256xf32> to vector<2x64xf32>
    %300 = math.tanh %299 : vector<2x64xf32>
    %301 = vector.extract_strided_slice %286 {offsets = [0, 192], sizes = [2, 64], strides = [1, 1]} : vector<2x256xf32> to vector<2x64xf32>
    %302 = arith.negf %301 : vector<2x64xf32>
    %303 = math.exp %302 : vector<2x64xf32>
    %cst_72 = arith.constant 1.000000e+00 : f32
    %304 = vector.broadcast %cst_72 : f32 to vector<2x64xf32>
    %305 = arith.addf %304, %303 : vector<2x64xf32>
    %306 = arith.divf %304, %305 : vector<2x64xf32>
    %307 = arith.mulf %298, %251 : vector<2x64xf32>
    %308 = arith.mulf %292, %300 : vector<2x64xf32>
    %309 = arith.addf %307, %308 : vector<2x64xf32>
    %310 = math.tanh %309 : vector<2x64xf32>
    %311 = arith.mulf %306, %310 : vector<2x64xf32>
    %c6_73 = arith.constant 6 : index
    %c64_74 = arith.constant 64 : index
    %312 = vector.load %arg8[%c6_73, %c64_74] : memref<16x128xf32, #tpu.memory_space<vmem>>, vector<2x64xf32>
    tpu.vector_store %arg8[%c6_73, %c64_74], %311 {strides = array<i32>} : memref<16x128xf32, #tpu.memory_space<vmem>>, vector<2x64xf32>,
    %313 = vector.extract_strided_slice %7 {offsets = [10, 0], sizes = [2, 256], strides = [1, 1]} : vector<16x256xf32> to vector<2x256xf32>
    %cst_75 = arith.constant dense<0.000000e+00> : vector<2x256xf32>
    %314 = tpu.matmul %282, %16, %cst_75 {dimension_numbers = #tpu.dot_dimension_numbers<[1], [0], [0], [1], [0, 0, 1, 1], [], []>} : vector<2x64xf32>, vector<64x256xf32>, vector<2x256xf32> -> vector<2x256xf32>
    %315 = arith.addf %313, %314 : vector<2x256xf32>
    %316 = vector.extract_strided_slice %315 {offsets = [0, 0], sizes = [2, 64], strides = [1, 1]} : vector<2x256xf32> to vector<2x64xf32>
    %317 = arith.negf %316 : vector<2x64xf32>
    %318 = math.exp %317 : vector<2x64xf32>
    %cst_76 = arith.constant 1.000000e+00 : f32
    %319 = vector.broadcast %cst_76 : f32 to vector<2x64xf32>
    %320 = arith.addf %319, %318 : vector<2x64xf32>
    %321 = arith.divf %319, %320 : vector<2x64xf32>
    %322 = vector.extract_strided_slice %315 {offsets = [0, 64], sizes = [2, 64], strides = [1, 1]} : vector<2x256xf32> to vector<2x64xf32>
    %323 = arith.negf %322 : vector<2x64xf32>
    %324 = math.exp %323 : vector<2x64xf32>
    %cst_77 = arith.constant 1.000000e+00 : f32
    %325 = vector.broadcast %cst_77 : f32 to vector<2x64xf32>
    %326 = arith.addf %325, %324 : vector<2x64xf32>
    %327 = arith.divf %325, %326 : vector<2x64xf32>
    %328 = vector.extract_strided_slice %315 {offsets = [0, 128], sizes = [2, 64], strides = [1, 1]} : vector<2x256xf32> to vector<2x64xf32>
    %329 = math.tanh %328 : vector<2x64xf32>
    %330 = vector.extract_strided_slice %315 {offsets = [0, 192], sizes = [2, 64], strides = [1, 1]} : vector<2x256xf32> to vector<2x64xf32>
    %331 = arith.negf %330 : vector<2x64xf32>
    %332 = math.exp %331 : vector<2x64xf32>
    %cst_78 = arith.constant 1.000000e+00 : f32
    %333 = vector.broadcast %cst_78 : f32 to vector<2x64xf32>
    %334 = arith.addf %333, %332 : vector<2x64xf32>
    %335 = arith.divf %333, %334 : vector<2x64xf32>
    %336 = arith.mulf %327, %280 : vector<2x64xf32>
    %337 = arith.mulf %321, %329 : vector<2x64xf32>
    %338 = arith.addf %336, %337 : vector<2x64xf32>
    %339 = math.tanh %338 : vector<2x64xf32>
    %340 = arith.mulf %335, %339 : vector<2x64xf32>
    %c10_79 = arith.constant 10 : index
    %c0_80 = arith.constant 0 : index
    %341 = vector.load %arg8[%c10_79, %c0_80] : memref<16x128xf32, #tpu.memory_space<vmem>>, vector<2x64xf32>
    tpu.vector_store %arg8[%c10_79, %c0_80], %340 {strides = array<i32>} : memref<16x128xf32, #tpu.memory_space<vmem>>, vector<2x64xf32>,
    %342 = vector.extract_strided_slice %14 {offsets = [4, 0], sizes = [2, 256], strides = [1, 1]} : vector<16x256xf32> to vector<2x256xf32>
    %cst_81 = arith.constant dense<0.000000e+00> : vector<2x256xf32>
    %343 = tpu.matmul %311, %18, %cst_81 {dimension_numbers = #tpu.dot_dimension_numbers<[1], [0], [0], [1], [0, 0, 1, 1], [], []>} : vector<2x64xf32>, vector<64x256xf32>, vector<2x256xf32> -> vector<2x256xf32>
    %344 = arith.addf %342, %343 : vector<2x256xf32>
    %345 = vector.extract_strided_slice %344 {offsets = [0, 0], sizes = [2, 64], strides = [1, 1]} : vector<2x256xf32> to vector<2x64xf32>
    %346 = arith.negf %345 : vector<2x64xf32>
    %347 = math.exp %346 : vector<2x64xf32>
    %cst_82 = arith.constant 1.000000e+00 : f32
    %348 = vector.broadcast %cst_82 : f32 to vector<2x64xf32>
    %349 = arith.addf %348, %347 : vector<2x64xf32>
    %350 = arith.divf %348, %349 : vector<2x64xf32>
    %351 = vector.extract_strided_slice %344 {offsets = [0, 64], sizes = [2, 64], strides = [1, 1]} : vector<2x256xf32> to vector<2x64xf32>
    %352 = arith.negf %351 : vector<2x64xf32>
    %353 = math.exp %352 : vector<2x64xf32>
    %cst_83 = arith.constant 1.000000e+00 : f32
    %354 = vector.broadcast %cst_83 : f32 to vector<2x64xf32>
    %355 = arith.addf %354, %353 : vector<2x64xf32>
    %356 = arith.divf %354, %355 : vector<2x64xf32>
    %357 = vector.extract_strided_slice %344 {offsets = [0, 128], sizes = [2, 64], strides = [1, 1]} : vector<2x256xf32> to vector<2x64xf32>
    %358 = math.tanh %357 : vector<2x64xf32>
    %359 = vector.extract_strided_slice %344 {offsets = [0, 192], sizes = [2, 64], strides = [1, 1]} : vector<2x256xf32> to vector<2x64xf32>
    %360 = arith.negf %359 : vector<2x64xf32>
    %361 = math.exp %360 : vector<2x64xf32>
    %cst_84 = arith.constant 1.000000e+00 : f32
    %362 = vector.broadcast %cst_84 : f32 to vector<2x64xf32>
    %363 = arith.addf %362, %361 : vector<2x64xf32>
    %364 = arith.divf %362, %363 : vector<2x64xf32>
    %365 = arith.mulf %356, %309 : vector<2x64xf32>
    %366 = arith.mulf %350, %358 : vector<2x64xf32>
    %367 = arith.addf %365, %366 : vector<2x64xf32>
    %368 = math.tanh %367 : vector<2x64xf32>
    %369 = arith.mulf %364, %368 : vector<2x64xf32>
    %c4_85 = arith.constant 4 : index
    %c64_86 = arith.constant 64 : index
    %370 = vector.load %arg8[%c4_85, %c64_86] : memref<16x128xf32, #tpu.memory_space<vmem>>, vector<2x64xf32>
    tpu.vector_store %arg8[%c4_85, %c64_86], %369 {strides = array<i32>} : memref<16x128xf32, #tpu.memory_space<vmem>>, vector<2x64xf32>,
    %371 = vector.extract_strided_slice %7 {offsets = [12, 0], sizes = [2, 256], strides = [1, 1]} : vector<16x256xf32> to vector<2x256xf32>
    %cst_87 = arith.constant dense<0.000000e+00> : vector<2x256xf32>
    %372 = tpu.matmul %340, %16, %cst_87 {dimension_numbers = #tpu.dot_dimension_numbers<[1], [0], [0], [1], [0, 0, 1, 1], [], []>} : vector<2x64xf32>, vector<64x256xf32>, vector<2x256xf32> -> vector<2x256xf32>
    %373 = arith.addf %371, %372 : vector<2x256xf32>
    %374 = vector.extract_strided_slice %373 {offsets = [0, 0], sizes = [2, 64], strides = [1, 1]} : vector<2x256xf32> to vector<2x64xf32>
    %375 = arith.negf %374 : vector<2x64xf32>
    %376 = math.exp %375 : vector<2x64xf32>
    %cst_88 = arith.constant 1.000000e+00 : f32
    %377 = vector.broadcast %cst_88 : f32 to vector<2x64xf32>
    %378 = arith.addf %377, %376 : vector<2x64xf32>
    %379 = arith.divf %377, %378 : vector<2x64xf32>
    %380 = vector.extract_strided_slice %373 {offsets = [0, 64], sizes = [2, 64], strides = [1, 1]} : vector<2x256xf32> to vector<2x64xf32>
    %381 = arith.negf %380 : vector<2x64xf32>
    %382 = math.exp %381 : vector<2x64xf32>
    %cst_89 = arith.constant 1.000000e+00 : f32
    %383 = vector.broadcast %cst_89 : f32 to vector<2x64xf32>
    %384 = arith.addf %383, %382 : vector<2x64xf32>
    %385 = arith.divf %383, %384 : vector<2x64xf32>
    %386 = vector.extract_strided_slice %373 {offsets = [0, 128], sizes = [2, 64], strides = [1, 1]} : vector<2x256xf32> to vector<2x64xf32>
    %387 = math.tanh %386 : vector<2x64xf32>
    %388 = vector.extract_strided_slice %373 {offsets = [0, 192], sizes = [2, 64], strides = [1, 1]} : vector<2x256xf32> to vector<2x64xf32>
    %389 = arith.negf %388 : vector<2x64xf32>
    %390 = math.exp %389 : vector<2x64xf32>
    %cst_90 = arith.constant 1.000000e+00 : f32
    %391 = vector.broadcast %cst_90 : f32 to vector<2x64xf32>
    %392 = arith.addf %391, %390 : vector<2x64xf32>
    %393 = arith.divf %391, %392 : vector<2x64xf32>
    %394 = arith.mulf %385, %338 : vector<2x64xf32>
    %395 = arith.mulf %379, %387 : vector<2x64xf32>
    %396 = arith.addf %394, %395 : vector<2x64xf32>
    %397 = math.tanh %396 : vector<2x64xf32>
    %398 = arith.mulf %393, %397 : vector<2x64xf32>
    %c12_91 = arith.constant 12 : index
    %c0_92 = arith.constant 0 : index
    %399 = vector.load %arg8[%c12_91, %c0_92] : memref<16x128xf32, #tpu.memory_space<vmem>>, vector<2x64xf32>
    tpu.vector_store %arg8[%c12_91, %c0_92], %398 {strides = array<i32>} : memref<16x128xf32, #tpu.memory_space<vmem>>, vector<2x64xf32>,
    %400 = vector.extract_strided_slice %14 {offsets = [2, 0], sizes = [2, 256], strides = [1, 1]} : vector<16x256xf32> to vector<2x256xf32>
    %cst_93 = arith.constant dense<0.000000e+00> : vector<2x256xf32>
    %401 = tpu.matmul %369, %18, %cst_93 {dimension_numbers = #tpu.dot_dimension_numbers<[1], [0], [0], [1], [0, 0, 1, 1], [], []>} : vector<2x64xf32>, vector<64x256xf32>, vector<2x256xf32> -> vector<2x256xf32>
    %402 = arith.addf %400, %401 : vector<2x256xf32>
    %403 = vector.extract_strided_slice %402 {offsets = [0, 0], sizes = [2, 64], strides = [1, 1]} : vector<2x256xf32> to vector<2x64xf32>
    %404 = arith.negf %403 : vector<2x64xf32>
    %405 = math.exp %404 : vector<2x64xf32>
    %cst_94 = arith.constant 1.000000e+00 : f32
    %406 = vector.broadcast %cst_94 : f32 to vector<2x64xf32>
    %407 = arith.addf %406, %405 : vector<2x64xf32>
    %408 = arith.divf %406, %407 : vector<2x64xf32>
    %409 = vector.extract_strided_slice %402 {offsets = [0, 64], sizes = [2, 64], strides = [1, 1]} : vector<2x256xf32> to vector<2x64xf32>
    %410 = arith.negf %409 : vector<2x64xf32>
    %411 = math.exp %410 : vector<2x64xf32>
    %cst_95 = arith.constant 1.000000e+00 : f32
    %412 = vector.broadcast %cst_95 : f32 to vector<2x64xf32>
    %413 = arith.addf %412, %411 : vector<2x64xf32>
    %414 = arith.divf %412, %413 : vector<2x64xf32>
    %415 = vector.extract_strided_slice %402 {offsets = [0, 128], sizes = [2, 64], strides = [1, 1]} : vector<2x256xf32> to vector<2x64xf32>
    %416 = math.tanh %415 : vector<2x64xf32>
    %417 = vector.extract_strided_slice %402 {offsets = [0, 192], sizes = [2, 64], strides = [1, 1]} : vector<2x256xf32> to vector<2x64xf32>
    %418 = arith.negf %417 : vector<2x64xf32>
    %419 = math.exp %418 : vector<2x64xf32>
    %cst_96 = arith.constant 1.000000e+00 : f32
    %420 = vector.broadcast %cst_96 : f32 to vector<2x64xf32>
    %421 = arith.addf %420, %419 : vector<2x64xf32>
    %422 = arith.divf %420, %421 : vector<2x64xf32>
    %423 = arith.mulf %414, %367 : vector<2x64xf32>
    %424 = arith.mulf %408, %416 : vector<2x64xf32>
    %425 = arith.addf %423, %424 : vector<2x64xf32>
    %426 = math.tanh %425 : vector<2x64xf32>
    %427 = arith.mulf %422, %426 : vector<2x64xf32>
    %c2_97 = arith.constant 2 : index
    %c64_98 = arith.constant 64 : index
    %428 = vector.load %arg8[%c2_97, %c64_98] : memref<16x128xf32, #tpu.memory_space<vmem>>, vector<2x64xf32>
    tpu.vector_store %arg8[%c2_97, %c64_98], %427 {strides = array<i32>} : memref<16x128xf32, #tpu.memory_space<vmem>>, vector<2x64xf32>,
    %429 = vector.extract_strided_slice %7 {offsets = [14, 0], sizes = [2, 256], strides = [1, 1]} : vector<16x256xf32> to vector<2x256xf32>
    %cst_99 = arith.constant dense<0.000000e+00> : vector<2x256xf32>
    %430 = tpu.matmul %398, %16, %cst_99 {dimension_numbers = #tpu.dot_dimension_numbers<[1], [0], [0], [1], [0, 0, 1, 1], [], []>} : vector<2x64xf32>, vector<64x256xf32>, vector<2x256xf32> -> vector<2x256xf32>
    %431 = arith.addf %429, %430 : vector<2x256xf32>
    %432 = vector.extract_strided_slice %431 {offsets = [0, 0], sizes = [2, 64], strides = [1, 1]} : vector<2x256xf32> to vector<2x64xf32>
    %433 = arith.negf %432 : vector<2x64xf32>
    %434 = math.exp %433 : vector<2x64xf32>
    %cst_100 = arith.constant 1.000000e+00 : f32
    %435 = vector.broadcast %cst_100 : f32 to vector<2x64xf32>
    %436 = arith.addf %435, %434 : vector<2x64xf32>
    %437 = arith.divf %435, %436 : vector<2x64xf32>
    %438 = vector.extract_strided_slice %431 {offsets = [0, 64], sizes = [2, 64], strides = [1, 1]} : vector<2x256xf32> to vector<2x64xf32>
    %439 = arith.negf %438 : vector<2x64xf32>
    %440 = math.exp %439 : vector<2x64xf32>
    %cst_101 = arith.constant 1.000000e+00 : f32
    %441 = vector.broadcast %cst_101 : f32 to vector<2x64xf32>
    %442 = arith.addf %441, %440 : vector<2x64xf32>
    %443 = arith.divf %441, %442 : vector<2x64xf32>
    %444 = vector.extract_strided_slice %431 {offsets = [0, 128], sizes = [2, 64], strides = [1, 1]} : vector<2x256xf32> to vector<2x64xf32>
    %445 = math.tanh %444 : vector<2x64xf32>
    %446 = vector.extract_strided_slice %431 {offsets = [0, 192], sizes = [2, 64], strides = [1, 1]} : vector<2x256xf32> to vector<2x64xf32>
    %447 = arith.negf %446 : vector<2x64xf32>
    %448 = math.exp %447 : vector<2x64xf32>
    %cst_102 = arith.constant 1.000000e+00 : f32
    %449 = vector.broadcast %cst_102 : f32 to vector<2x64xf32>
    %450 = arith.addf %449, %448 : vector<2x64xf32>
    %451 = arith.divf %449, %450 : vector<2x64xf32>
    %452 = arith.mulf %443, %396 : vector<2x64xf32>
    %453 = arith.mulf %437, %445 : vector<2x64xf32>
    %454 = arith.addf %452, %453 : vector<2x64xf32>
    %455 = math.tanh %454 : vector<2x64xf32>
    %456 = arith.mulf %451, %455 : vector<2x64xf32>
    %c14_103 = arith.constant 14 : index
    %c0_104 = arith.constant 0 : index
    %457 = vector.load %arg8[%c14_103, %c0_104] : memref<16x128xf32, #tpu.memory_space<vmem>>, vector<2x64xf32>
    tpu.vector_store %arg8[%c14_103, %c0_104], %456 {strides = array<i32>} : memref<16x128xf32, #tpu.memory_space<vmem>>, vector<2x64xf32>,
    %458 = vector.extract_strided_slice %14 {offsets = [0, 0], sizes = [2, 256], strides = [1, 1]} : vector<16x256xf32> to vector<2x256xf32>
    %cst_105 = arith.constant dense<0.000000e+00> : vector<2x256xf32>
    %459 = tpu.matmul %427, %18, %cst_105 {dimension_numbers = #tpu.dot_dimension_numbers<[1], [0], [0], [1], [0, 0, 1, 1], [], []>} : vector<2x64xf32>, vector<64x256xf32>, vector<2x256xf32> -> vector<2x256xf32>
    %460 = arith.addf %458, %459 : vector<2x256xf32>
    %461 = vector.extract_strided_slice %460 {offsets = [0, 0], sizes = [2, 64], strides = [1, 1]} : vector<2x256xf32> to vector<2x64xf32>
    %462 = arith.negf %461 : vector<2x64xf32>
    %463 = math.exp %462 : vector<2x64xf32>
    %cst_106 = arith.constant 1.000000e+00 : f32
    %464 = vector.broadcast %cst_106 : f32 to vector<2x64xf32>
    %465 = arith.addf %464, %463 : vector<2x64xf32>
    %466 = arith.divf %464, %465 : vector<2x64xf32>
    %467 = vector.extract_strided_slice %460 {offsets = [0, 64], sizes = [2, 64], strides = [1, 1]} : vector<2x256xf32> to vector<2x64xf32>
    %468 = arith.negf %467 : vector<2x64xf32>
    %469 = math.exp %468 : vector<2x64xf32>
    %cst_107 = arith.constant 1.000000e+00 : f32
    %470 = vector.broadcast %cst_107 : f32 to vector<2x64xf32>
    %471 = arith.addf %470, %469 : vector<2x64xf32>
    %472 = arith.divf %470, %471 : vector<2x64xf32>
    %473 = vector.extract_strided_slice %460 {offsets = [0, 128], sizes = [2, 64], strides = [1, 1]} : vector<2x256xf32> to vector<2x64xf32>
    %474 = math.tanh %473 : vector<2x64xf32>
    %475 = vector.extract_strided_slice %460 {offsets = [0, 192], sizes = [2, 64], strides = [1, 1]} : vector<2x256xf32> to vector<2x64xf32>
    %476 = arith.negf %475 : vector<2x64xf32>
    %477 = math.exp %476 : vector<2x64xf32>
    %cst_108 = arith.constant 1.000000e+00 : f32
    %478 = vector.broadcast %cst_108 : f32 to vector<2x64xf32>
    %479 = arith.addf %478, %477 : vector<2x64xf32>
    %480 = arith.divf %478, %479 : vector<2x64xf32>
    %481 = arith.mulf %472, %425 : vector<2x64xf32>
    %482 = arith.mulf %466, %474 : vector<2x64xf32>
    %483 = arith.addf %481, %482 : vector<2x64xf32>
    %484 = math.tanh %483 : vector<2x64xf32>
    %485 = arith.mulf %480, %484 : vector<2x64xf32>
    %c0_109 = arith.constant 0 : index
    %c64_110 = arith.constant 64 : index
    %486 = vector.load %arg8[%c0_109, %c64_110] : memref<16x128xf32, #tpu.memory_space<vmem>>, vector<2x64xf32>
    tpu.vector_store %arg8[%c0_109, %c64_110], %485 {strides = array<i32>} : memref<16x128xf32, #tpu.memory_space<vmem>>, vector<2x64xf32>,
    %c0_111 = arith.constant 0 : index
    %c0_112 = arith.constant 0 : index
    %487 = vector.load %arg8[%c0_111, %c0_112] : memref<16x128xf32, #tpu.memory_space<vmem>>, vector<16x128xf32>
    %c0_113 = arith.constant 0 : index
    %c0_114 = arith.constant 0 : index
    %c0_115 = arith.constant 0 : index
    %488 = vector.load %arg4[%c0_113, %c0_114, %c0_115] : memref<2x128x256xf32, #tpu.memory_space<vmem>>, vector<1x128x256xf32>
    %489 = vector.shape_cast %488 : vector<1x128x256xf32> to vector<128x256xf32>
    %cst_116 = arith.constant dense<0.000000e+00> : vector<16x256xf32>
    %490 = tpu.matmul %487, %489, %cst_116 {dimension_numbers = #tpu.dot_dimension_numbers<[1], [0], [0], [1], [0, 0, 1, 1], [], []>} : vector<16x128xf32>, vector<128x256xf32>, vector<16x256xf32> -> vector<16x256xf32>
    %c0_117 = arith.constant 0 : index
    %c0_118 = arith.constant 0 : index
    %c0_119 = arith.constant 0 : index
    %491 = vector.load %arg6[%c0_117, %c0_118, %c0_119] : memref<2x1x256xf32, #tpu.memory_space<vmem>>, vector<1x1x256xf32>
    %492 = vector.shape_cast %491 : vector<1x1x256xf32> to vector<1x256xf32>
    %493 = vector.broadcast %492 : vector<1x256xf32> to vector<16x256xf32>
    %494 = arith.addf %490, %493 : vector<16x256xf32>
    %c1_120 = arith.constant 1 : index
    %c0_121 = arith.constant 0 : index
    %c0_122 = arith.constant 0 : index
    %495 = vector.load %arg4[%c1_120, %c0_121, %c0_122] : memref<2x128x256xf32, #tpu.memory_space<vmem>>, vector<1x128x256xf32>
    %496 = vector.shape_cast %495 : vector<1x128x256xf32> to vector<128x256xf32>
    %cst_123 = arith.constant dense<0.000000e+00> : vector<16x256xf32>
    %497 = tpu.matmul %487, %496, %cst_123 {dimension_numbers = #tpu.dot_dimension_numbers<[1], [0], [0], [1], [0, 0, 1, 1], [], []>} : vector<16x128xf32>, vector<128x256xf32>, vector<16x256xf32> -> vector<16x256xf32>
    %c1_124 = arith.constant 1 : index
    %c0_125 = arith.constant 0 : index
    %c0_126 = arith.constant 0 : index
    %498 = vector.load %arg6[%c1_124, %c0_125, %c0_126] : memref<2x1x256xf32, #tpu.memory_space<vmem>>, vector<1x1x256xf32>
    %499 = vector.shape_cast %498 : vector<1x1x256xf32> to vector<1x256xf32>
    %500 = vector.broadcast %499 : vector<1x256xf32> to vector<16x256xf32>
    %501 = arith.addf %497, %500 : vector<16x256xf32>
    %c0_127 = arith.constant 0 : index
    %c0_128 = arith.constant 0 : index
    %c0_129 = arith.constant 0 : index
    %502 = vector.load %arg5[%c0_127, %c0_128, %c0_129] : memref<2x64x256xf32, #tpu.memory_space<vmem>>, vector<1x64x256xf32>
    %503 = vector.shape_cast %502 : vector<1x64x256xf32> to vector<64x256xf32>
    %c1_130 = arith.constant 1 : index
    %c0_131 = arith.constant 0 : index
    %c0_132 = arith.constant 0 : index
    %504 = vector.load %arg5[%c1_130, %c0_131, %c0_132] : memref<2x64x256xf32, #tpu.memory_space<vmem>>, vector<1x64x256xf32>
    %505 = vector.shape_cast %504 : vector<1x64x256xf32> to vector<64x256xf32>
    %cst_133 = arith.constant 0.000000e+00 : f32
    %506 = vector.broadcast %cst_133 : f32 to vector<2x64xf32>
    %cst_134 = arith.constant 0.000000e+00 : f32
    %507 = vector.broadcast %cst_134 : f32 to vector<2x64xf32>
    %cst_135 = arith.constant 0.000000e+00 : f32
    %508 = vector.broadcast %cst_135 : f32 to vector<2x64xf32>
    %cst_136 = arith.constant 0.000000e+00 : f32
    %509 = vector.broadcast %cst_136 : f32 to vector<2x64xf32>
    %510 = vector.extract_strided_slice %494 {offsets = [0, 0], sizes = [2, 256], strides = [1, 1]} : vector<16x256xf32> to vector<2x256xf32>
    %cst_137 = arith.constant dense<0.000000e+00> : vector<2x256xf32>
    %511 = tpu.matmul %506, %503, %cst_137 {dimension_numbers = #tpu.dot_dimension_numbers<[1], [0], [0], [1], [0, 0, 1, 1], [], []>} : vector<2x64xf32>, vector<64x256xf32>, vector<2x256xf32> -> vector<2x256xf32>
    %512 = arith.addf %510, %511 : vector<2x256xf32>
    %513 = vector.extract_strided_slice %512 {offsets = [0, 0], sizes = [2, 64], strides = [1, 1]} : vector<2x256xf32> to vector<2x64xf32>
    %514 = arith.negf %513 : vector<2x64xf32>
    %515 = math.exp %514 : vector<2x64xf32>
    %cst_138 = arith.constant 1.000000e+00 : f32
    %516 = vector.broadcast %cst_138 : f32 to vector<2x64xf32>
    %517 = arith.addf %516, %515 : vector<2x64xf32>
    %518 = arith.divf %516, %517 : vector<2x64xf32>
    %519 = vector.extract_strided_slice %512 {offsets = [0, 64], sizes = [2, 64], strides = [1, 1]} : vector<2x256xf32> to vector<2x64xf32>
    %520 = arith.negf %519 : vector<2x64xf32>
    %521 = math.exp %520 : vector<2x64xf32>
    %cst_139 = arith.constant 1.000000e+00 : f32
    %522 = vector.broadcast %cst_139 : f32 to vector<2x64xf32>
    %523 = arith.addf %522, %521 : vector<2x64xf32>
    %524 = arith.divf %522, %523 : vector<2x64xf32>
    %525 = vector.extract_strided_slice %512 {offsets = [0, 128], sizes = [2, 64], strides = [1, 1]} : vector<2x256xf32> to vector<2x64xf32>
    %526 = math.tanh %525 : vector<2x64xf32>
    %527 = vector.extract_strided_slice %512 {offsets = [0, 192], sizes = [2, 64], strides = [1, 1]} : vector<2x256xf32> to vector<2x64xf32>
    %528 = arith.negf %527 : vector<2x64xf32>
    %529 = math.exp %528 : vector<2x64xf32>
    %cst_140 = arith.constant 1.000000e+00 : f32
    %530 = vector.broadcast %cst_140 : f32 to vector<2x64xf32>
    %531 = arith.addf %530, %529 : vector<2x64xf32>
    %532 = arith.divf %530, %531 : vector<2x64xf32>
    %533 = arith.mulf %524, %507 : vector<2x64xf32>
    %534 = arith.mulf %518, %526 : vector<2x64xf32>
    %535 = arith.addf %533, %534 : vector<2x64xf32>
    %536 = math.tanh %535 : vector<2x64xf32>
    %537 = arith.mulf %532, %536 : vector<2x64xf32>
    %c0_141 = arith.constant 0 : index
    %c0_142 = arith.constant 0 : index
    %538 = vector.load %arg8[%c0_141, %c0_142] : memref<16x128xf32, #tpu.memory_space<vmem>>, vector<2x64xf32>
    tpu.vector_store %arg8[%c0_141, %c0_142], %537 {strides = array<i32>} : memref<16x128xf32, #tpu.memory_space<vmem>>, vector<2x64xf32>,
    %539 = vector.extract_strided_slice %501 {offsets = [14, 0], sizes = [2, 256], strides = [1, 1]} : vector<16x256xf32> to vector<2x256xf32>
    %cst_143 = arith.constant dense<0.000000e+00> : vector<2x256xf32>
    %540 = tpu.matmul %508, %505, %cst_143 {dimension_numbers = #tpu.dot_dimension_numbers<[1], [0], [0], [1], [0, 0, 1, 1], [], []>} : vector<2x64xf32>, vector<64x256xf32>, vector<2x256xf32> -> vector<2x256xf32>
    %541 = arith.addf %539, %540 : vector<2x256xf32>
    %542 = vector.extract_strided_slice %541 {offsets = [0, 0], sizes = [2, 64], strides = [1, 1]} : vector<2x256xf32> to vector<2x64xf32>
    %543 = arith.negf %542 : vector<2x64xf32>
    %544 = math.exp %543 : vector<2x64xf32>
    %cst_144 = arith.constant 1.000000e+00 : f32
    %545 = vector.broadcast %cst_144 : f32 to vector<2x64xf32>
    %546 = arith.addf %545, %544 : vector<2x64xf32>
    %547 = arith.divf %545, %546 : vector<2x64xf32>
    %548 = vector.extract_strided_slice %541 {offsets = [0, 64], sizes = [2, 64], strides = [1, 1]} : vector<2x256xf32> to vector<2x64xf32>
    %549 = arith.negf %548 : vector<2x64xf32>
    %550 = math.exp %549 : vector<2x64xf32>
    %cst_145 = arith.constant 1.000000e+00 : f32
    %551 = vector.broadcast %cst_145 : f32 to vector<2x64xf32>
    %552 = arith.addf %551, %550 : vector<2x64xf32>
    %553 = arith.divf %551, %552 : vector<2x64xf32>
    %554 = vector.extract_strided_slice %541 {offsets = [0, 128], sizes = [2, 64], strides = [1, 1]} : vector<2x256xf32> to vector<2x64xf32>
    %555 = math.tanh %554 : vector<2x64xf32>
    %556 = vector.extract_strided_slice %541 {offsets = [0, 192], sizes = [2, 64], strides = [1, 1]} : vector<2x256xf32> to vector<2x64xf32>
    %557 = arith.negf %556 : vector<2x64xf32>
    %558 = math.exp %557 : vector<2x64xf32>
    %cst_146 = arith.constant 1.000000e+00 : f32
    %559 = vector.broadcast %cst_146 : f32 to vector<2x64xf32>
    %560 = arith.addf %559, %558 : vector<2x64xf32>
    %561 = arith.divf %559, %560 : vector<2x64xf32>
    %562 = arith.mulf %553, %509 : vector<2x64xf32>
    %563 = arith.mulf %547, %555 : vector<2x64xf32>
    %564 = arith.addf %562, %563 : vector<2x64xf32>
    %565 = math.tanh %564 : vector<2x64xf32>
    %566 = arith.mulf %561, %565 : vector<2x64xf32>
    %c14_147 = arith.constant 14 : index
    %c64_148 = arith.constant 64 : index
    %567 = vector.load %arg8[%c14_147, %c64_148] : memref<16x128xf32, #tpu.memory_space<vmem>>, vector<2x64xf32>
    tpu.vector_store %arg8[%c14_147, %c64_148], %566 {strides = array<i32>} : memref<16x128xf32, #tpu.memory_space<vmem>>, vector<2x64xf32>,
    %568 = vector.extract_strided_slice %494 {offsets = [2, 0], sizes = [2, 256], strides = [1, 1]} : vector<16x256xf32> to vector<2x256xf32>
    %cst_149 = arith.constant dense<0.000000e+00> : vector<2x256xf32>
    %569 = tpu.matmul %537, %503, %cst_149 {dimension_numbers = #tpu.dot_dimension_numbers<[1], [0], [0], [1], [0, 0, 1, 1], [], []>} : vector<2x64xf32>, vector<64x256xf32>, vector<2x256xf32> -> vector<2x256xf32>
    %570 = arith.addf %568, %569 : vector<2x256xf32>
    %571 = vector.extract_strided_slice %570 {offsets = [0, 0], sizes = [2, 64], strides = [1, 1]} : vector<2x256xf32> to vector<2x64xf32>
    %572 = arith.negf %571 : vector<2x64xf32>
    %573 = math.exp %572 : vector<2x64xf32>
    %cst_150 = arith.constant 1.000000e+00 : f32
    %574 = vector.broadcast %cst_150 : f32 to vector<2x64xf32>
    %575 = arith.addf %574, %573 : vector<2x64xf32>
    %576 = arith.divf %574, %575 : vector<2x64xf32>
    %577 = vector.extract_strided_slice %570 {offsets = [0, 64], sizes = [2, 64], strides = [1, 1]} : vector<2x256xf32> to vector<2x64xf32>
    %578 = arith.negf %577 : vector<2x64xf32>
    %579 = math.exp %578 : vector<2x64xf32>
    %cst_151 = arith.constant 1.000000e+00 : f32
    %580 = vector.broadcast %cst_151 : f32 to vector<2x64xf32>
    %581 = arith.addf %580, %579 : vector<2x64xf32>
    %582 = arith.divf %580, %581 : vector<2x64xf32>
    %583 = vector.extract_strided_slice %570 {offsets = [0, 128], sizes = [2, 64], strides = [1, 1]} : vector<2x256xf32> to vector<2x64xf32>
    %584 = math.tanh %583 : vector<2x64xf32>
    %585 = vector.extract_strided_slice %570 {offsets = [0, 192], sizes = [2, 64], strides = [1, 1]} : vector<2x256xf32> to vector<2x64xf32>
    %586 = arith.negf %585 : vector<2x64xf32>
    %587 = math.exp %586 : vector<2x64xf32>
    %cst_152 = arith.constant 1.000000e+00 : f32
    %588 = vector.broadcast %cst_152 : f32 to vector<2x64xf32>
    %589 = arith.addf %588, %587 : vector<2x64xf32>
    %590 = arith.divf %588, %589 : vector<2x64xf32>
    %591 = arith.mulf %582, %535 : vector<2x64xf32>
    %592 = arith.mulf %576, %584 : vector<2x64xf32>
    %593 = arith.addf %591, %592 : vector<2x64xf32>
    %594 = math.tanh %593 : vector<2x64xf32>
    %595 = arith.mulf %590, %594 : vector<2x64xf32>
    %c2_153 = arith.constant 2 : index
    %c0_154 = arith.constant 0 : index
    %596 = vector.load %arg8[%c2_153, %c0_154] : memref<16x128xf32, #tpu.memory_space<vmem>>, vector<2x64xf32>
    tpu.vector_store %arg8[%c2_153, %c0_154], %595 {strides = array<i32>} : memref<16x128xf32, #tpu.memory_space<vmem>>, vector<2x64xf32>,
    %597 = vector.extract_strided_slice %501 {offsets = [12, 0], sizes = [2, 256], strides = [1, 1]} : vector<16x256xf32> to vector<2x256xf32>
    %cst_155 = arith.constant dense<0.000000e+00> : vector<2x256xf32>
    %598 = tpu.matmul %566, %505, %cst_155 {dimension_numbers = #tpu.dot_dimension_numbers<[1], [0], [0], [1], [0, 0, 1, 1], [], []>} : vector<2x64xf32>, vector<64x256xf32>, vector<2x256xf32> -> vector<2x256xf32>
    %599 = arith.addf %597, %598 : vector<2x256xf32>
    %600 = vector.extract_strided_slice %599 {offsets = [0, 0], sizes = [2, 64], strides = [1, 1]} : vector<2x256xf32> to vector<2x64xf32>
    %601 = arith.negf %600 : vector<2x64xf32>
    %602 = math.exp %601 : vector<2x64xf32>
    %cst_156 = arith.constant 1.000000e+00 : f32
    %603 = vector.broadcast %cst_156 : f32 to vector<2x64xf32>
    %604 = arith.addf %603, %602 : vector<2x64xf32>
    %605 = arith.divf %603, %604 : vector<2x64xf32>
    %606 = vector.extract_strided_slice %599 {offsets = [0, 64], sizes = [2, 64], strides = [1, 1]} : vector<2x256xf32> to vector<2x64xf32>
    %607 = arith.negf %606 : vector<2x64xf32>
    %608 = math.exp %607 : vector<2x64xf32>
    %cst_157 = arith.constant 1.000000e+00 : f32
    %609 = vector.broadcast %cst_157 : f32 to vector<2x64xf32>
    %610 = arith.addf %609, %608 : vector<2x64xf32>
    %611 = arith.divf %609, %610 : vector<2x64xf32>
    %612 = vector.extract_strided_slice %599 {offsets = [0, 128], sizes = [2, 64], strides = [1, 1]} : vector<2x256xf32> to vector<2x64xf32>
    %613 = math.tanh %612 : vector<2x64xf32>
    %614 = vector.extract_strided_slice %599 {offsets = [0, 192], sizes = [2, 64], strides = [1, 1]} : vector<2x256xf32> to vector<2x64xf32>
    %615 = arith.negf %614 : vector<2x64xf32>
    %616 = math.exp %615 : vector<2x64xf32>
    %cst_158 = arith.constant 1.000000e+00 : f32
    %617 = vector.broadcast %cst_158 : f32 to vector<2x64xf32>
    %618 = arith.addf %617, %616 : vector<2x64xf32>
    %619 = arith.divf %617, %618 : vector<2x64xf32>
    %620 = arith.mulf %611, %564 : vector<2x64xf32>
    %621 = arith.mulf %605, %613 : vector<2x64xf32>
    %622 = arith.addf %620, %621 : vector<2x64xf32>
    %623 = math.tanh %622 : vector<2x64xf32>
    %624 = arith.mulf %619, %623 : vector<2x64xf32>
    %c12_159 = arith.constant 12 : index
    %c64_160 = arith.constant 64 : index
    %625 = vector.load %arg8[%c12_159, %c64_160] : memref<16x128xf32, #tpu.memory_space<vmem>>, vector<2x64xf32>
    tpu.vector_store %arg8[%c12_159, %c64_160], %624 {strides = array<i32>} : memref<16x128xf32, #tpu.memory_space<vmem>>, vector<2x64xf32>,
    %626 = vector.extract_strided_slice %494 {offsets = [4, 0], sizes = [2, 256], strides = [1, 1]} : vector<16x256xf32> to vector<2x256xf32>
    %cst_161 = arith.constant dense<0.000000e+00> : vector<2x256xf32>
    %627 = tpu.matmul %595, %503, %cst_161 {dimension_numbers = #tpu.dot_dimension_numbers<[1], [0], [0], [1], [0, 0, 1, 1], [], []>} : vector<2x64xf32>, vector<64x256xf32>, vector<2x256xf32> -> vector<2x256xf32>
    %628 = arith.addf %626, %627 : vector<2x256xf32>
    %629 = vector.extract_strided_slice %628 {offsets = [0, 0], sizes = [2, 64], strides = [1, 1]} : vector<2x256xf32> to vector<2x64xf32>
    %630 = arith.negf %629 : vector<2x64xf32>
    %631 = math.exp %630 : vector<2x64xf32>
    %cst_162 = arith.constant 1.000000e+00 : f32
    %632 = vector.broadcast %cst_162 : f32 to vector<2x64xf32>
    %633 = arith.addf %632, %631 : vector<2x64xf32>
    %634 = arith.divf %632, %633 : vector<2x64xf32>
    %635 = vector.extract_strided_slice %628 {offsets = [0, 64], sizes = [2, 64], strides = [1, 1]} : vector<2x256xf32> to vector<2x64xf32>
    %636 = arith.negf %635 : vector<2x64xf32>
    %637 = math.exp %636 : vector<2x64xf32>
    %cst_163 = arith.constant 1.000000e+00 : f32
    %638 = vector.broadcast %cst_163 : f32 to vector<2x64xf32>
    %639 = arith.addf %638, %637 : vector<2x64xf32>
    %640 = arith.divf %638, %639 : vector<2x64xf32>
    %641 = vector.extract_strided_slice %628 {offsets = [0, 128], sizes = [2, 64], strides = [1, 1]} : vector<2x256xf32> to vector<2x64xf32>
    %642 = math.tanh %641 : vector<2x64xf32>
    %643 = vector.extract_strided_slice %628 {offsets = [0, 192], sizes = [2, 64], strides = [1, 1]} : vector<2x256xf32> to vector<2x64xf32>
    %644 = arith.negf %643 : vector<2x64xf32>
    %645 = math.exp %644 : vector<2x64xf32>
    %cst_164 = arith.constant 1.000000e+00 : f32
    %646 = vector.broadcast %cst_164 : f32 to vector<2x64xf32>
    %647 = arith.addf %646, %645 : vector<2x64xf32>
    %648 = arith.divf %646, %647 : vector<2x64xf32>
    %649 = arith.mulf %640, %593 : vector<2x64xf32>
    %650 = arith.mulf %634, %642 : vector<2x64xf32>
    %651 = arith.addf %649, %650 : vector<2x64xf32>
    %652 = math.tanh %651 : vector<2x64xf32>
    %653 = arith.mulf %648, %652 : vector<2x64xf32>
    %c4_165 = arith.constant 4 : index
    %c0_166 = arith.constant 0 : index
    %654 = vector.load %arg8[%c4_165, %c0_166] : memref<16x128xf32, #tpu.memory_space<vmem>>, vector<2x64xf32>
    tpu.vector_store %arg8[%c4_165, %c0_166], %653 {strides = array<i32>} : memref<16x128xf32, #tpu.memory_space<vmem>>, vector<2x64xf32>,
    %655 = vector.extract_strided_slice %501 {offsets = [10, 0], sizes = [2, 256], strides = [1, 1]} : vector<16x256xf32> to vector<2x256xf32>
    %cst_167 = arith.constant dense<0.000000e+00> : vector<2x256xf32>
    %656 = tpu.matmul %624, %505, %cst_167 {dimension_numbers = #tpu.dot_dimension_numbers<[1], [0], [0], [1], [0, 0, 1, 1], [], []>} : vector<2x64xf32>, vector<64x256xf32>, vector<2x256xf32> -> vector<2x256xf32>
    %657 = arith.addf %655, %656 : vector<2x256xf32>
    %658 = vector.extract_strided_slice %657 {offsets = [0, 0], sizes = [2, 64], strides = [1, 1]} : vector<2x256xf32> to vector<2x64xf32>
    %659 = arith.negf %658 : vector<2x64xf32>
    %660 = math.exp %659 : vector<2x64xf32>
    %cst_168 = arith.constant 1.000000e+00 : f32
    %661 = vector.broadcast %cst_168 : f32 to vector<2x64xf32>
    %662 = arith.addf %661, %660 : vector<2x64xf32>
    %663 = arith.divf %661, %662 : vector<2x64xf32>
    %664 = vector.extract_strided_slice %657 {offsets = [0, 64], sizes = [2, 64], strides = [1, 1]} : vector<2x256xf32> to vector<2x64xf32>
    %665 = arith.negf %664 : vector<2x64xf32>
    %666 = math.exp %665 : vector<2x64xf32>
    %cst_169 = arith.constant 1.000000e+00 : f32
    %667 = vector.broadcast %cst_169 : f32 to vector<2x64xf32>
    %668 = arith.addf %667, %666 : vector<2x64xf32>
    %669 = arith.divf %667, %668 : vector<2x64xf32>
    %670 = vector.extract_strided_slice %657 {offsets = [0, 128], sizes = [2, 64], strides = [1, 1]} : vector<2x256xf32> to vector<2x64xf32>
    %671 = math.tanh %670 : vector<2x64xf32>
    %672 = vector.extract_strided_slice %657 {offsets = [0, 192], sizes = [2, 64], strides = [1, 1]} : vector<2x256xf32> to vector<2x64xf32>
    %673 = arith.negf %672 : vector<2x64xf32>
    %674 = math.exp %673 : vector<2x64xf32>
    %cst_170 = arith.constant 1.000000e+00 : f32
    %675 = vector.broadcast %cst_170 : f32 to vector<2x64xf32>
    %676 = arith.addf %675, %674 : vector<2x64xf32>
    %677 = arith.divf %675, %676 : vector<2x64xf32>
    %678 = arith.mulf %669, %622 : vector<2x64xf32>
    %679 = arith.mulf %663, %671 : vector<2x64xf32>
    %680 = arith.addf %678, %679 : vector<2x64xf32>
    %681 = math.tanh %680 : vector<2x64xf32>
    %682 = arith.mulf %677, %681 : vector<2x64xf32>
    %c10_171 = arith.constant 10 : index
    %c64_172 = arith.constant 64 : index
    %683 = vector.load %arg8[%c10_171, %c64_172] : memref<16x128xf32, #tpu.memory_space<vmem>>, vector<2x64xf32>
    tpu.vector_store %arg8[%c10_171, %c64_172], %682 {strides = array<i32>} : memref<16x128xf32, #tpu.memory_space<vmem>>, vector<2x64xf32>,
    %684 = vector.extract_strided_slice %494 {offsets = [6, 0], sizes = [2, 256], strides = [1, 1]} : vector<16x256xf32> to vector<2x256xf32>
    %cst_173 = arith.constant dense<0.000000e+00> : vector<2x256xf32>
    %685 = tpu.matmul %653, %503, %cst_173 {dimension_numbers = #tpu.dot_dimension_numbers<[1], [0], [0], [1], [0, 0, 1, 1], [], []>} : vector<2x64xf32>, vector<64x256xf32>, vector<2x256xf32> -> vector<2x256xf32>
    %686 = arith.addf %684, %685 : vector<2x256xf32>
    %687 = vector.extract_strided_slice %686 {offsets = [0, 0], sizes = [2, 64], strides = [1, 1]} : vector<2x256xf32> to vector<2x64xf32>
    %688 = arith.negf %687 : vector<2x64xf32>
    %689 = math.exp %688 : vector<2x64xf32>
    %cst_174 = arith.constant 1.000000e+00 : f32
    %690 = vector.broadcast %cst_174 : f32 to vector<2x64xf32>
    %691 = arith.addf %690, %689 : vector<2x64xf32>
    %692 = arith.divf %690, %691 : vector<2x64xf32>
    %693 = vector.extract_strided_slice %686 {offsets = [0, 64], sizes = [2, 64], strides = [1, 1]} : vector<2x256xf32> to vector<2x64xf32>
    %694 = arith.negf %693 : vector<2x64xf32>
    %695 = math.exp %694 : vector<2x64xf32>
    %cst_175 = arith.constant 1.000000e+00 : f32
    %696 = vector.broadcast %cst_175 : f32 to vector<2x64xf32>
    %697 = arith.addf %696, %695 : vector<2x64xf32>
    %698 = arith.divf %696, %697 : vector<2x64xf32>
    %699 = vector.extract_strided_slice %686 {offsets = [0, 128], sizes = [2, 64], strides = [1, 1]} : vector<2x256xf32> to vector<2x64xf32>
    %700 = math.tanh %699 : vector<2x64xf32>
    %701 = vector.extract_strided_slice %686 {offsets = [0, 192], sizes = [2, 64], strides = [1, 1]} : vector<2x256xf32> to vector<2x64xf32>
    %702 = arith.negf %701 : vector<2x64xf32>
    %703 = math.exp %702 : vector<2x64xf32>
    %cst_176 = arith.constant 1.000000e+00 : f32
    %704 = vector.broadcast %cst_176 : f32 to vector<2x64xf32>
    %705 = arith.addf %704, %703 : vector<2x64xf32>
    %706 = arith.divf %704, %705 : vector<2x64xf32>
    %707 = arith.mulf %698, %651 : vector<2x64xf32>
    %708 = arith.mulf %692, %700 : vector<2x64xf32>
    %709 = arith.addf %707, %708 : vector<2x64xf32>
    %710 = math.tanh %709 : vector<2x64xf32>
    %711 = arith.mulf %706, %710 : vector<2x64xf32>
    %c6_177 = arith.constant 6 : index
    %c0_178 = arith.constant 0 : index
    %712 = vector.load %arg8[%c6_177, %c0_178] : memref<16x128xf32, #tpu.memory_space<vmem>>, vector<2x64xf32>
    tpu.vector_store %arg8[%c6_177, %c0_178], %711 {strides = array<i32>} : memref<16x128xf32, #tpu.memory_space<vmem>>, vector<2x64xf32>,
    %713 = vector.extract_strided_slice %501 {offsets = [8, 0], sizes = [2, 256], strides = [1, 1]} : vector<16x256xf32> to vector<2x256xf32>
    %cst_179 = arith.constant dense<0.000000e+00> : vector<2x256xf32>
    %714 = tpu.matmul %682, %505, %cst_179 {dimension_numbers = #tpu.dot_dimension_numbers<[1], [0], [0], [1], [0, 0, 1, 1], [], []>} : vector<2x64xf32>, vector<64x256xf32>, vector<2x256xf32> -> vector<2x256xf32>
    %715 = arith.addf %713, %714 : vector<2x256xf32>
    %716 = vector.extract_strided_slice %715 {offsets = [0, 0], sizes = [2, 64], strides = [1, 1]} : vector<2x256xf32> to vector<2x64xf32>
    %717 = arith.negf %716 : vector<2x64xf32>
    %718 = math.exp %717 : vector<2x64xf32>
    %cst_180 = arith.constant 1.000000e+00 : f32
    %719 = vector.broadcast %cst_180 : f32 to vector<2x64xf32>
    %720 = arith.addf %719, %718 : vector<2x64xf32>
    %721 = arith.divf %719, %720 : vector<2x64xf32>
    %722 = vector.extract_strided_slice %715 {offsets = [0, 64], sizes = [2, 64], strides = [1, 1]} : vector<2x256xf32> to vector<2x64xf32>
    %723 = arith.negf %722 : vector<2x64xf32>
    %724 = math.exp %723 : vector<2x64xf32>
    %cst_181 = arith.constant 1.000000e+00 : f32
    %725 = vector.broadcast %cst_181 : f32 to vector<2x64xf32>
    %726 = arith.addf %725, %724 : vector<2x64xf32>
    %727 = arith.divf %725, %726 : vector<2x64xf32>
    %728 = vector.extract_strided_slice %715 {offsets = [0, 128], sizes = [2, 64], strides = [1, 1]} : vector<2x256xf32> to vector<2x64xf32>
    %729 = math.tanh %728 : vector<2x64xf32>
    %730 = vector.extract_strided_slice %715 {offsets = [0, 192], sizes = [2, 64], strides = [1, 1]} : vector<2x256xf32> to vector<2x64xf32>
    %731 = arith.negf %730 : vector<2x64xf32>
    %732 = math.exp %731 : vector<2x64xf32>
    %cst_182 = arith.constant 1.000000e+00 : f32
    %733 = vector.broadcast %cst_182 : f32 to vector<2x64xf32>
    %734 = arith.addf %733, %732 : vector<2x64xf32>
    %735 = arith.divf %733, %734 : vector<2x64xf32>
    %736 = arith.mulf %727, %680 : vector<2x64xf32>
    %737 = arith.mulf %721, %729 : vector<2x64xf32>
    %738 = arith.addf %736, %737 : vector<2x64xf32>
    %739 = math.tanh %738 : vector<2x64xf32>
    %740 = arith.mulf %735, %739 : vector<2x64xf32>
    %c8_183 = arith.constant 8 : index
    %c64_184 = arith.constant 64 : index
    %741 = vector.load %arg8[%c8_183, %c64_184] : memref<16x128xf32, #tpu.memory_space<vmem>>, vector<2x64xf32>
    tpu.vector_store %arg8[%c8_183, %c64_184], %740 {strides = array<i32>} : memref<16x128xf32, #tpu.memory_space<vmem>>, vector<2x64xf32>,
    %742 = vector.extract_strided_slice %494 {offsets = [8, 0], sizes = [2, 256], strides = [1, 1]} : vector<16x256xf32> to vector<2x256xf32>
    %cst_185 = arith.constant dense<0.000000e+00> : vector<2x256xf32>
    %743 = tpu.matmul %711, %503, %cst_185 {dimension_numbers = #tpu.dot_dimension_numbers<[1], [0], [0], [1], [0, 0, 1, 1], [], []>} : vector<2x64xf32>, vector<64x256xf32>, vector<2x256xf32> -> vector<2x256xf32>
    %744 = arith.addf %742, %743 : vector<2x256xf32>
    %745 = vector.extract_strided_slice %744 {offsets = [0, 0], sizes = [2, 64], strides = [1, 1]} : vector<2x256xf32> to vector<2x64xf32>
    %746 = arith.negf %745 : vector<2x64xf32>
    %747 = math.exp %746 : vector<2x64xf32>
    %cst_186 = arith.constant 1.000000e+00 : f32
    %748 = vector.broadcast %cst_186 : f32 to vector<2x64xf32>
    %749 = arith.addf %748, %747 : vector<2x64xf32>
    %750 = arith.divf %748, %749 : vector<2x64xf32>
    %751 = vector.extract_strided_slice %744 {offsets = [0, 64], sizes = [2, 64], strides = [1, 1]} : vector<2x256xf32> to vector<2x64xf32>
    %752 = arith.negf %751 : vector<2x64xf32>
    %753 = math.exp %752 : vector<2x64xf32>
    %cst_187 = arith.constant 1.000000e+00 : f32
    %754 = vector.broadcast %cst_187 : f32 to vector<2x64xf32>
    %755 = arith.addf %754, %753 : vector<2x64xf32>
    %756 = arith.divf %754, %755 : vector<2x64xf32>
    %757 = vector.extract_strided_slice %744 {offsets = [0, 128], sizes = [2, 64], strides = [1, 1]} : vector<2x256xf32> to vector<2x64xf32>
    %758 = math.tanh %757 : vector<2x64xf32>
    %759 = vector.extract_strided_slice %744 {offsets = [0, 192], sizes = [2, 64], strides = [1, 1]} : vector<2x256xf32> to vector<2x64xf32>
    %760 = arith.negf %759 : vector<2x64xf32>
    %761 = math.exp %760 : vector<2x64xf32>
    %cst_188 = arith.constant 1.000000e+00 : f32
    %762 = vector.broadcast %cst_188 : f32 to vector<2x64xf32>
    %763 = arith.addf %762, %761 : vector<2x64xf32>
    %764 = arith.divf %762, %763 : vector<2x64xf32>
    %765 = arith.mulf %756, %709 : vector<2x64xf32>
    %766 = arith.mulf %750, %758 : vector<2x64xf32>
    %767 = arith.addf %765, %766 : vector<2x64xf32>
    %768 = math.tanh %767 : vector<2x64xf32>
    %769 = arith.mulf %764, %768 : vector<2x64xf32>
    %c8_189 = arith.constant 8 : index
    %c0_190 = arith.constant 0 : index
    %770 = vector.load %arg8[%c8_189, %c0_190] : memref<16x128xf32, #tpu.memory_space<vmem>>, vector<2x64xf32>
    tpu.vector_store %arg8[%c8_189, %c0_190], %769 {strides = array<i32>} : memref<16x128xf32, #tpu.memory_space<vmem>>, vector<2x64xf32>,
    %771 = vector.extract_strided_slice %501 {offsets = [6, 0], sizes = [2, 256], strides = [1, 1]} : vector<16x256xf32> to vector<2x256xf32>
    %cst_191 = arith.constant dense<0.000000e+00> : vector<2x256xf32>
    %772 = tpu.matmul %740, %505, %cst_191 {dimension_numbers = #tpu.dot_dimension_numbers<[1], [0], [0], [1], [0, 0, 1, 1], [], []>} : vector<2x64xf32>, vector<64x256xf32>, vector<2x256xf32> -> vector<2x256xf32>
    %773 = arith.addf %771, %772 : vector<2x256xf32>
    %774 = vector.extract_strided_slice %773 {offsets = [0, 0], sizes = [2, 64], strides = [1, 1]} : vector<2x256xf32> to vector<2x64xf32>
    %775 = arith.negf %774 : vector<2x64xf32>
    %776 = math.exp %775 : vector<2x64xf32>
    %cst_192 = arith.constant 1.000000e+00 : f32
    %777 = vector.broadcast %cst_192 : f32 to vector<2x64xf32>
    %778 = arith.addf %777, %776 : vector<2x64xf32>
    %779 = arith.divf %777, %778 : vector<2x64xf32>
    %780 = vector.extract_strided_slice %773 {offsets = [0, 64], sizes = [2, 64], strides = [1, 1]} : vector<2x256xf32> to vector<2x64xf32>
    %781 = arith.negf %780 : vector<2x64xf32>
    %782 = math.exp %781 : vector<2x64xf32>
    %cst_193 = arith.constant 1.000000e+00 : f32
    %783 = vector.broadcast %cst_193 : f32 to vector<2x64xf32>
    %784 = arith.addf %783, %782 : vector<2x64xf32>
    %785 = arith.divf %783, %784 : vector<2x64xf32>
    %786 = vector.extract_strided_slice %773 {offsets = [0, 128], sizes = [2, 64], strides = [1, 1]} : vector<2x256xf32> to vector<2x64xf32>
    %787 = math.tanh %786 : vector<2x64xf32>
    %788 = vector.extract_strided_slice %773 {offsets = [0, 192], sizes = [2, 64], strides = [1, 1]} : vector<2x256xf32> to vector<2x64xf32>
    %789 = arith.negf %788 : vector<2x64xf32>
    %790 = math.exp %789 : vector<2x64xf32>
    %cst_194 = arith.constant 1.000000e+00 : f32
    %791 = vector.broadcast %cst_194 : f32 to vector<2x64xf32>
    %792 = arith.addf %791, %790 : vector<2x64xf32>
    %793 = arith.divf %791, %792 : vector<2x64xf32>
    %794 = arith.mulf %785, %738 : vector<2x64xf32>
    %795 = arith.mulf %779, %787 : vector<2x64xf32>
    %796 = arith.addf %794, %795 : vector<2x64xf32>
    %797 = math.tanh %796 : vector<2x64xf32>
    %798 = arith.mulf %793, %797 : vector<2x64xf32>
    %c6_195 = arith.constant 6 : index
    %c64_196 = arith.constant 64 : index
    %799 = vector.load %arg8[%c6_195, %c64_196] : memref<16x128xf32, #tpu.memory_space<vmem>>, vector<2x64xf32>
    tpu.vector_store %arg8[%c6_195, %c64_196], %798 {strides = array<i32>} : memref<16x128xf32, #tpu.memory_space<vmem>>, vector<2x64xf32>,
    %800 = vector.extract_strided_slice %494 {offsets = [10, 0], sizes = [2, 256], strides = [1, 1]} : vector<16x256xf32> to vector<2x256xf32>
    %cst_197 = arith.constant dense<0.000000e+00> : vector<2x256xf32>
    %801 = tpu.matmul %769, %503, %cst_197 {dimension_numbers = #tpu.dot_dimension_numbers<[1], [0], [0], [1], [0, 0, 1, 1], [], []>} : vector<2x64xf32>, vector<64x256xf32>, vector<2x256xf32> -> vector<2x256xf32>
    %802 = arith.addf %800, %801 : vector<2x256xf32>
    %803 = vector.extract_strided_slice %802 {offsets = [0, 0], sizes = [2, 64], strides = [1, 1]} : vector<2x256xf32> to vector<2x64xf32>
    %804 = arith.negf %803 : vector<2x64xf32>
    %805 = math.exp %804 : vector<2x64xf32>
    %cst_198 = arith.constant 1.000000e+00 : f32
    %806 = vector.broadcast %cst_198 : f32 to vector<2x64xf32>
    %807 = arith.addf %806, %805 : vector<2x64xf32>
    %808 = arith.divf %806, %807 : vector<2x64xf32>
    %809 = vector.extract_strided_slice %802 {offsets = [0, 64], sizes = [2, 64], strides = [1, 1]} : vector<2x256xf32> to vector<2x64xf32>
    %810 = arith.negf %809 : vector<2x64xf32>
    %811 = math.exp %810 : vector<2x64xf32>
    %cst_199 = arith.constant 1.000000e+00 : f32
    %812 = vector.broadcast %cst_199 : f32 to vector<2x64xf32>
    %813 = arith.addf %812, %811 : vector<2x64xf32>
    %814 = arith.divf %812, %813 : vector<2x64xf32>
    %815 = vector.extract_strided_slice %802 {offsets = [0, 128], sizes = [2, 64], strides = [1, 1]} : vector<2x256xf32> to vector<2x64xf32>
    %816 = math.tanh %815 : vector<2x64xf32>
    %817 = vector.extract_strided_slice %802 {offsets = [0, 192], sizes = [2, 64], strides = [1, 1]} : vector<2x256xf32> to vector<2x64xf32>
    %818 = arith.negf %817 : vector<2x64xf32>
    %819 = math.exp %818 : vector<2x64xf32>
    %cst_200 = arith.constant 1.000000e+00 : f32
    %820 = vector.broadcast %cst_200 : f32 to vector<2x64xf32>
    %821 = arith.addf %820, %819 : vector<2x64xf32>
    %822 = arith.divf %820, %821 : vector<2x64xf32>
    %823 = arith.mulf %814, %767 : vector<2x64xf32>
    %824 = arith.mulf %808, %816 : vector<2x64xf32>
    %825 = arith.addf %823, %824 : vector<2x64xf32>
    %826 = math.tanh %825 : vector<2x64xf32>
    %827 = arith.mulf %822, %826 : vector<2x64xf32>
    %c10_201 = arith.constant 10 : index
    %c0_202 = arith.constant 0 : index
    %828 = vector.load %arg8[%c10_201, %c0_202] : memref<16x128xf32, #tpu.memory_space<vmem>>, vector<2x64xf32>
    tpu.vector_store %arg8[%c10_201, %c0_202], %827 {strides = array<i32>} : memref<16x128xf32, #tpu.memory_space<vmem>>, vector<2x64xf32>,
    %829 = vector.extract_strided_slice %501 {offsets = [4, 0], sizes = [2, 256], strides = [1, 1]} : vector<16x256xf32> to vector<2x256xf32>
    %cst_203 = arith.constant dense<0.000000e+00> : vector<2x256xf32>
    %830 = tpu.matmul %798, %505, %cst_203 {dimension_numbers = #tpu.dot_dimension_numbers<[1], [0], [0], [1], [0, 0, 1, 1], [], []>} : vector<2x64xf32>, vector<64x256xf32>, vector<2x256xf32> -> vector<2x256xf32>
    %831 = arith.addf %829, %830 : vector<2x256xf32>
    %832 = vector.extract_strided_slice %831 {offsets = [0, 0], sizes = [2, 64], strides = [1, 1]} : vector<2x256xf32> to vector<2x64xf32>
    %833 = arith.negf %832 : vector<2x64xf32>
    %834 = math.exp %833 : vector<2x64xf32>
    %cst_204 = arith.constant 1.000000e+00 : f32
    %835 = vector.broadcast %cst_204 : f32 to vector<2x64xf32>
    %836 = arith.addf %835, %834 : vector<2x64xf32>
    %837 = arith.divf %835, %836 : vector<2x64xf32>
    %838 = vector.extract_strided_slice %831 {offsets = [0, 64], sizes = [2, 64], strides = [1, 1]} : vector<2x256xf32> to vector<2x64xf32>
    %839 = arith.negf %838 : vector<2x64xf32>
    %840 = math.exp %839 : vector<2x64xf32>
    %cst_205 = arith.constant 1.000000e+00 : f32
    %841 = vector.broadcast %cst_205 : f32 to vector<2x64xf32>
    %842 = arith.addf %841, %840 : vector<2x64xf32>
    %843 = arith.divf %841, %842 : vector<2x64xf32>
    %844 = vector.extract_strided_slice %831 {offsets = [0, 128], sizes = [2, 64], strides = [1, 1]} : vector<2x256xf32> to vector<2x64xf32>
    %845 = math.tanh %844 : vector<2x64xf32>
    %846 = vector.extract_strided_slice %831 {offsets = [0, 192], sizes = [2, 64], strides = [1, 1]} : vector<2x256xf32> to vector<2x64xf32>
    %847 = arith.negf %846 : vector<2x64xf32>
    %848 = math.exp %847 : vector<2x64xf32>
    %cst_206 = arith.constant 1.000000e+00 : f32
    %849 = vector.broadcast %cst_206 : f32 to vector<2x64xf32>
    %850 = arith.addf %849, %848 : vector<2x64xf32>
    %851 = arith.divf %849, %850 : vector<2x64xf32>
    %852 = arith.mulf %843, %796 : vector<2x64xf32>
    %853 = arith.mulf %837, %845 : vector<2x64xf32>
    %854 = arith.addf %852, %853 : vector<2x64xf32>
    %855 = math.tanh %854 : vector<2x64xf32>
    %856 = arith.mulf %851, %855 : vector<2x64xf32>
    %c4_207 = arith.constant 4 : index
    %c64_208 = arith.constant 64 : index
    %857 = vector.load %arg8[%c4_207, %c64_208] : memref<16x128xf32, #tpu.memory_space<vmem>>, vector<2x64xf32>
    tpu.vector_store %arg8[%c4_207, %c64_208], %856 {strides = array<i32>} : memref<16x128xf32, #tpu.memory_space<vmem>>, vector<2x64xf32>,
    %858 = vector.extract_strided_slice %494 {offsets = [12, 0], sizes = [2, 256], strides = [1, 1]} : vector<16x256xf32> to vector<2x256xf32>
    %cst_209 = arith.constant dense<0.000000e+00> : vector<2x256xf32>
    %859 = tpu.matmul %827, %503, %cst_209 {dimension_numbers = #tpu.dot_dimension_numbers<[1], [0], [0], [1], [0, 0, 1, 1], [], []>} : vector<2x64xf32>, vector<64x256xf32>, vector<2x256xf32> -> vector<2x256xf32>
    %860 = arith.addf %858, %859 : vector<2x256xf32>
    %861 = vector.extract_strided_slice %860 {offsets = [0, 0], sizes = [2, 64], strides = [1, 1]} : vector<2x256xf32> to vector<2x64xf32>
    %862 = arith.negf %861 : vector<2x64xf32>
    %863 = math.exp %862 : vector<2x64xf32>
    %cst_210 = arith.constant 1.000000e+00 : f32
    %864 = vector.broadcast %cst_210 : f32 to vector<2x64xf32>
    %865 = arith.addf %864, %863 : vector<2x64xf32>
    %866 = arith.divf %864, %865 : vector<2x64xf32>
    %867 = vector.extract_strided_slice %860 {offsets = [0, 64], sizes = [2, 64], strides = [1, 1]} : vector<2x256xf32> to vector<2x64xf32>
    %868 = arith.negf %867 : vector<2x64xf32>
    %869 = math.exp %868 : vector<2x64xf32>
    %cst_211 = arith.constant 1.000000e+00 : f32
    %870 = vector.broadcast %cst_211 : f32 to vector<2x64xf32>
    %871 = arith.addf %870, %869 : vector<2x64xf32>
    %872 = arith.divf %870, %871 : vector<2x64xf32>
    %873 = vector.extract_strided_slice %860 {offsets = [0, 128], sizes = [2, 64], strides = [1, 1]} : vector<2x256xf32> to vector<2x64xf32>
    %874 = math.tanh %873 : vector<2x64xf32>
    %875 = vector.extract_strided_slice %860 {offsets = [0, 192], sizes = [2, 64], strides = [1, 1]} : vector<2x256xf32> to vector<2x64xf32>
    %876 = arith.negf %875 : vector<2x64xf32>
    %877 = math.exp %876 : vector<2x64xf32>
    %cst_212 = arith.constant 1.000000e+00 : f32
    %878 = vector.broadcast %cst_212 : f32 to vector<2x64xf32>
    %879 = arith.addf %878, %877 : vector<2x64xf32>
    %880 = arith.divf %878, %879 : vector<2x64xf32>
    %881 = arith.mulf %872, %825 : vector<2x64xf32>
    %882 = arith.mulf %866, %874 : vector<2x64xf32>
    %883 = arith.addf %881, %882 : vector<2x64xf32>
    %884 = math.tanh %883 : vector<2x64xf32>
    %885 = arith.mulf %880, %884 : vector<2x64xf32>
    %c12_213 = arith.constant 12 : index
    %c0_214 = arith.constant 0 : index
    %886 = vector.load %arg8[%c12_213, %c0_214] : memref<16x128xf32, #tpu.memory_space<vmem>>, vector<2x64xf32>
    tpu.vector_store %arg8[%c12_213, %c0_214], %885 {strides = array<i32>} : memref<16x128xf32, #tpu.memory_space<vmem>>, vector<2x64xf32>,
    %887 = vector.extract_strided_slice %501 {offsets = [2, 0], sizes = [2, 256], strides = [1, 1]} : vector<16x256xf32> to vector<2x256xf32>
    %cst_215 = arith.constant dense<0.000000e+00> : vector<2x256xf32>
    %888 = tpu.matmul %856, %505, %cst_215 {dimension_numbers = #tpu.dot_dimension_numbers<[1], [0], [0], [1], [0, 0, 1, 1], [], []>} : vector<2x64xf32>, vector<64x256xf32>, vector<2x256xf32> -> vector<2x256xf32>
    %889 = arith.addf %887, %888 : vector<2x256xf32>
    %890 = vector.extract_strided_slice %889 {offsets = [0, 0], sizes = [2, 64], strides = [1, 1]} : vector<2x256xf32> to vector<2x64xf32>
    %891 = arith.negf %890 : vector<2x64xf32>
    %892 = math.exp %891 : vector<2x64xf32>
    %cst_216 = arith.constant 1.000000e+00 : f32
    %893 = vector.broadcast %cst_216 : f32 to vector<2x64xf32>
    %894 = arith.addf %893, %892 : vector<2x64xf32>
    %895 = arith.divf %893, %894 : vector<2x64xf32>
    %896 = vector.extract_strided_slice %889 {offsets = [0, 64], sizes = [2, 64], strides = [1, 1]} : vector<2x256xf32> to vector<2x64xf32>
    %897 = arith.negf %896 : vector<2x64xf32>
    %898 = math.exp %897 : vector<2x64xf32>
    %cst_217 = arith.constant 1.000000e+00 : f32
    %899 = vector.broadcast %cst_217 : f32 to vector<2x64xf32>
    %900 = arith.addf %899, %898 : vector<2x64xf32>
    %901 = arith.divf %899, %900 : vector<2x64xf32>
    %902 = vector.extract_strided_slice %889 {offsets = [0, 128], sizes = [2, 64], strides = [1, 1]} : vector<2x256xf32> to vector<2x64xf32>
    %903 = math.tanh %902 : vector<2x64xf32>
    %904 = vector.extract_strided_slice %889 {offsets = [0, 192], sizes = [2, 64], strides = [1, 1]} : vector<2x256xf32> to vector<2x64xf32>
    %905 = arith.negf %904 : vector<2x64xf32>
    %906 = math.exp %905 : vector<2x64xf32>
    %cst_218 = arith.constant 1.000000e+00 : f32
    %907 = vector.broadcast %cst_218 : f32 to vector<2x64xf32>
    %908 = arith.addf %907, %906 : vector<2x64xf32>
    %909 = arith.divf %907, %908 : vector<2x64xf32>
    %910 = arith.mulf %901, %854 : vector<2x64xf32>
    %911 = arith.mulf %895, %903 : vector<2x64xf32>
    %912 = arith.addf %910, %911 : vector<2x64xf32>
    %913 = math.tanh %912 : vector<2x64xf32>
    %914 = arith.mulf %909, %913 : vector<2x64xf32>
    %c2_219 = arith.constant 2 : index
    %c64_220 = arith.constant 64 : index
    %915 = vector.load %arg8[%c2_219, %c64_220] : memref<16x128xf32, #tpu.memory_space<vmem>>, vector<2x64xf32>
    tpu.vector_store %arg8[%c2_219, %c64_220], %914 {strides = array<i32>} : memref<16x128xf32, #tpu.memory_space<vmem>>, vector<2x64xf32>,
    %916 = vector.extract_strided_slice %494 {offsets = [14, 0], sizes = [2, 256], strides = [1, 1]} : vector<16x256xf32> to vector<2x256xf32>
    %cst_221 = arith.constant dense<0.000000e+00> : vector<2x256xf32>
    %917 = tpu.matmul %885, %503, %cst_221 {dimension_numbers = #tpu.dot_dimension_numbers<[1], [0], [0], [1], [0, 0, 1, 1], [], []>} : vector<2x64xf32>, vector<64x256xf32>, vector<2x256xf32> -> vector<2x256xf32>
    %918 = arith.addf %916, %917 : vector<2x256xf32>
    %919 = vector.extract_strided_slice %918 {offsets = [0, 0], sizes = [2, 64], strides = [1, 1]} : vector<2x256xf32> to vector<2x64xf32>
    %920 = arith.negf %919 : vector<2x64xf32>
    %921 = math.exp %920 : vector<2x64xf32>
    %cst_222 = arith.constant 1.000000e+00 : f32
    %922 = vector.broadcast %cst_222 : f32 to vector<2x64xf32>
    %923 = arith.addf %922, %921 : vector<2x64xf32>
    %924 = arith.divf %922, %923 : vector<2x64xf32>
    %925 = vector.extract_strided_slice %918 {offsets = [0, 64], sizes = [2, 64], strides = [1, 1]} : vector<2x256xf32> to vector<2x64xf32>
    %926 = arith.negf %925 : vector<2x64xf32>
    %927 = math.exp %926 : vector<2x64xf32>
    %cst_223 = arith.constant 1.000000e+00 : f32
    %928 = vector.broadcast %cst_223 : f32 to vector<2x64xf32>
    %929 = arith.addf %928, %927 : vector<2x64xf32>
    %930 = arith.divf %928, %929 : vector<2x64xf32>
    %931 = vector.extract_strided_slice %918 {offsets = [0, 128], sizes = [2, 64], strides = [1, 1]} : vector<2x256xf32> to vector<2x64xf32>
    %932 = math.tanh %931 : vector<2x64xf32>
    %933 = vector.extract_strided_slice %918 {offsets = [0, 192], sizes = [2, 64], strides = [1, 1]} : vector<2x256xf32> to vector<2x64xf32>
    %934 = arith.negf %933 : vector<2x64xf32>
    %935 = math.exp %934 : vector<2x64xf32>
    %cst_224 = arith.constant 1.000000e+00 : f32
    %936 = vector.broadcast %cst_224 : f32 to vector<2x64xf32>
    %937 = arith.addf %936, %935 : vector<2x64xf32>
    %938 = arith.divf %936, %937 : vector<2x64xf32>
    %939 = arith.mulf %930, %883 : vector<2x64xf32>
    %940 = arith.mulf %924, %932 : vector<2x64xf32>
    %941 = arith.addf %939, %940 : vector<2x64xf32>
    %942 = math.tanh %941 : vector<2x64xf32>
    %943 = arith.mulf %938, %942 : vector<2x64xf32>
    %c14_225 = arith.constant 14 : index
    %c0_226 = arith.constant 0 : index
    %944 = vector.load %arg8[%c14_225, %c0_226] : memref<16x128xf32, #tpu.memory_space<vmem>>, vector<2x64xf32>
    tpu.vector_store %arg8[%c14_225, %c0_226], %943 {strides = array<i32>} : memref<16x128xf32, #tpu.memory_space<vmem>>, vector<2x64xf32>,
    %945 = vector.extract_strided_slice %501 {offsets = [0, 0], sizes = [2, 256], strides = [1, 1]} : vector<16x256xf32> to vector<2x256xf32>
    %cst_227 = arith.constant dense<0.000000e+00> : vector<2x256xf32>
    %946 = tpu.matmul %914, %505, %cst_227 {dimension_numbers = #tpu.dot_dimension_numbers<[1], [0], [0], [1], [0, 0, 1, 1], [], []>} : vector<2x64xf32>, vector<64x256xf32>, vector<2x256xf32> -> vector<2x256xf32>
    %947 = arith.addf %945, %946 : vector<2x256xf32>
    %948 = vector.extract_strided_slice %947 {offsets = [0, 0], sizes = [2, 64], strides = [1, 1]} : vector<2x256xf32> to vector<2x64xf32>
    %949 = arith.negf %948 : vector<2x64xf32>
    %950 = math.exp %949 : vector<2x64xf32>
    %cst_228 = arith.constant 1.000000e+00 : f32
    %951 = vector.broadcast %cst_228 : f32 to vector<2x64xf32>
    %952 = arith.addf %951, %950 : vector<2x64xf32>
    %953 = arith.divf %951, %952 : vector<2x64xf32>
    %954 = vector.extract_strided_slice %947 {offsets = [0, 64], sizes = [2, 64], strides = [1, 1]} : vector<2x256xf32> to vector<2x64xf32>
    %955 = arith.negf %954 : vector<2x64xf32>
    %956 = math.exp %955 : vector<2x64xf32>
    %cst_229 = arith.constant 1.000000e+00 : f32
    %957 = vector.broadcast %cst_229 : f32 to vector<2x64xf32>
    %958 = arith.addf %957, %956 : vector<2x64xf32>
    %959 = arith.divf %957, %958 : vector<2x64xf32>
    %960 = vector.extract_strided_slice %947 {offsets = [0, 128], sizes = [2, 64], strides = [1, 1]} : vector<2x256xf32> to vector<2x64xf32>
    %961 = math.tanh %960 : vector<2x64xf32>
    %962 = vector.extract_strided_slice %947 {offsets = [0, 192], sizes = [2, 64], strides = [1, 1]} : vector<2x256xf32> to vector<2x64xf32>
    %963 = arith.negf %962 : vector<2x64xf32>
    %964 = math.exp %963 : vector<2x64xf32>
    %cst_230 = arith.constant 1.000000e+00 : f32
    %965 = vector.broadcast %cst_230 : f32 to vector<2x64xf32>
    %966 = arith.addf %965, %964 : vector<2x64xf32>
    %967 = arith.divf %965, %966 : vector<2x64xf32>
    %968 = arith.mulf %959, %912 : vector<2x64xf32>
    %969 = arith.mulf %953, %961 : vector<2x64xf32>
    %970 = arith.addf %968, %969 : vector<2x64xf32>
    %971 = math.tanh %970 : vector<2x64xf32>
    %972 = arith.mulf %967, %971 : vector<2x64xf32>
    %c0_231 = arith.constant 0 : index
    %c64_232 = arith.constant 64 : index
    %973 = vector.load %arg8[%c0_231, %c64_232] : memref<16x128xf32, #tpu.memory_space<vmem>>, vector<2x64xf32>
    tpu.vector_store %arg8[%c0_231, %c64_232], %972 {strides = array<i32>} : memref<16x128xf32, #tpu.memory_space<vmem>>, vector<2x64xf32>,
    %c0_233 = arith.constant 0 : index
    %c0_234 = arith.constant 0 : index
    %974 = vector.load %arg8[%c0_233, %c0_234] : memref<16x128xf32, #tpu.memory_space<vmem>>, vector<16x128xf32>
    %975 = vector.extract_strided_slice %974 {offsets = [0, 0], sizes = [2, 128], strides = [1, 1]} : vector<16x128xf32> to vector<2x128xf32>
    %976 = vector.shape_cast %975 : vector<2x128xf32> to vector<2x1x128xf32>
    %c0_235 = arith.constant 0 : index
    %c0_236 = arith.constant 0 : index
    %c0_237 = arith.constant 0 : index
    %977 = vector.load %arg7[%c0_235, %c0_236, %c0_237] : memref<2x8x128xf32, #tpu.memory_space<vmem>>, vector<2x1x128xf32>
    tpu.vector_store %arg7[%c0_235, %c0_236, %c0_237], %976 {strides = array<i32>} : memref<2x8x128xf32, #tpu.memory_space<vmem>>, vector<2x1x128xf32>,
    %978 = vector.extract_strided_slice %974 {offsets = [2, 0], sizes = [2, 128], strides = [1, 1]} : vector<16x128xf32> to vector<2x128xf32>
    %979 = vector.shape_cast %978 : vector<2x128xf32> to vector<2x1x128xf32>
    %c0_238 = arith.constant 0 : index
    %c1_239 = arith.constant 1 : index
    %c0_240 = arith.constant 0 : index
    %980 = vector.load %arg7[%c0_238, %c1_239, %c0_240] : memref<2x8x128xf32, #tpu.memory_space<vmem>>, vector<2x1x128xf32>
    tpu.vector_store %arg7[%c0_238, %c1_239, %c0_240], %979 {strides = array<i32>} : memref<2x8x128xf32, #tpu.memory_space<vmem>>, vector<2x1x128xf32>,
    %981 = vector.extract_strided_slice %974 {offsets = [4, 0], sizes = [2, 128], strides = [1, 1]} : vector<16x128xf32> to vector<2x128xf32>
    %982 = vector.shape_cast %981 : vector<2x128xf32> to vector<2x1x128xf32>
    %c0_241 = arith.constant 0 : index
    %c2_242 = arith.constant 2 : index
    %c0_243 = arith.constant 0 : index
    %983 = vector.load %arg7[%c0_241, %c2_242, %c0_243] : memref<2x8x128xf32, #tpu.memory_space<vmem>>, vector<2x1x128xf32>
    tpu.vector_store %arg7[%c0_241, %c2_242, %c0_243], %982 {strides = array<i32>} : memref<2x8x128xf32, #tpu.memory_space<vmem>>, vector<2x1x128xf32>,
    %984 = vector.extract_strided_slice %974 {offsets = [6, 0], sizes = [2, 128], strides = [1, 1]} : vector<16x128xf32> to vector<2x128xf32>
    %985 = vector.shape_cast %984 : vector<2x128xf32> to vector<2x1x128xf32>
    %c0_244 = arith.constant 0 : index
    %c3 = arith.constant 3 : index
    %c0_245 = arith.constant 0 : index
    %986 = vector.load %arg7[%c0_244, %c3, %c0_245] : memref<2x8x128xf32, #tpu.memory_space<vmem>>, vector<2x1x128xf32>
    tpu.vector_store %arg7[%c0_244, %c3, %c0_245], %985 {strides = array<i32>} : memref<2x8x128xf32, #tpu.memory_space<vmem>>, vector<2x1x128xf32>,
    %987 = vector.extract_strided_slice %974 {offsets = [8, 0], sizes = [2, 128], strides = [1, 1]} : vector<16x128xf32> to vector<2x128xf32>
    %988 = vector.shape_cast %987 : vector<2x128xf32> to vector<2x1x128xf32>
    %c0_246 = arith.constant 0 : index
    %c4_247 = arith.constant 4 : index
    %c0_248 = arith.constant 0 : index
    %989 = vector.load %arg7[%c0_246, %c4_247, %c0_248] : memref<2x8x128xf32, #tpu.memory_space<vmem>>, vector<2x1x128xf32>
    tpu.vector_store %arg7[%c0_246, %c4_247, %c0_248], %988 {strides = array<i32>} : memref<2x8x128xf32, #tpu.memory_space<vmem>>, vector<2x1x128xf32>,
    %990 = vector.extract_strided_slice %974 {offsets = [10, 0], sizes = [2, 128], strides = [1, 1]} : vector<16x128xf32> to vector<2x128xf32>
    %991 = vector.shape_cast %990 : vector<2x128xf32> to vector<2x1x128xf32>
    %c0_249 = arith.constant 0 : index
    %c5 = arith.constant 5 : index
    %c0_250 = arith.constant 0 : index
    %992 = vector.load %arg7[%c0_249, %c5, %c0_250] : memref<2x8x128xf32, #tpu.memory_space<vmem>>, vector<2x1x128xf32>
    tpu.vector_store %arg7[%c0_249, %c5, %c0_250], %991 {strides = array<i32>} : memref<2x8x128xf32, #tpu.memory_space<vmem>>, vector<2x1x128xf32>,
    %993 = vector.extract_strided_slice %974 {offsets = [12, 0], sizes = [2, 128], strides = [1, 1]} : vector<16x128xf32> to vector<2x128xf32>
    %994 = vector.shape_cast %993 : vector<2x128xf32> to vector<2x1x128xf32>
    %c0_251 = arith.constant 0 : index
    %c6_252 = arith.constant 6 : index
    %c0_253 = arith.constant 0 : index
    %995 = vector.load %arg7[%c0_251, %c6_252, %c0_253] : memref<2x8x128xf32, #tpu.memory_space<vmem>>, vector<2x1x128xf32>
    tpu.vector_store %arg7[%c0_251, %c6_252, %c0_253], %994 {strides = array<i32>} : memref<2x8x128xf32, #tpu.memory_space<vmem>>, vector<2x1x128xf32>,
    %996 = vector.extract_strided_slice %974 {offsets = [14, 0], sizes = [2, 128], strides = [1, 1]} : vector<16x128xf32> to vector<2x128xf32>
    %997 = vector.shape_cast %996 : vector<2x128xf32> to vector<2x1x128xf32>
    %c0_254 = arith.constant 0 : index
    %c7 = arith.constant 7 : index
    %c0_255 = arith.constant 0 : index
    %998 = vector.load %arg7[%c0_254, %c7, %c0_255] : memref<2x8x128xf32, #tpu.memory_space<vmem>>, vector<2x1x128xf32>
    tpu.vector_store %arg7[%c0_254, %c7, %c0_255], %997 {strides = array<i32>} : memref<2x8x128xf32, #tpu.memory_space<vmem>>, vector<2x1x128xf32>,
    return
  }
}

</mosaic_0001>

<bundles_post_ra>
// kernel: tpu_custom_call.1
= control target key start
LH: loop header
LB: loop body
LE: loop exit
PB: predicated region body
PF: predicated region fallthrough
CT: control target
= control target key end

     0   :  { %12 = vsyncpa [#allocation4], 0  ;;  %s6494_s0 = inlined_call_operand.hbm [shape: f32[16,40], index: 0, kind: input, shape index: {}]   ;;  %s6495_s1 = inlined_call_operand.hbm [shape: f32[2,40,256], index: 1, kind: input, shape index: {}]   ;;  %s6496_s2 = inlined_call_operand.hbm [shape: f32[2,64,256], index: 2, kind: input, shape index: {}]   ;;  %s6497_s3 = inlined_call_operand.vmem [shape: f32[2,1,256], index: 3, kind: input, shape index: {}]   ;;  %s6498_s4 = inlined_call_operand.hbm [shape: f32[2,128,256], index: 4, kind: input, shape index: {}]   ;;  %s6499_s5 = inlined_call_operand.hbm [shape: f32[2,64,256], index: 5, kind: input, shape index: {}]   ;;  %s6500_s6 = inlined_call_operand.vmem [shape: f32[2,1,256], index: 6, kind: input, shape index: {}]   ;;  %s6501_s7 = inlined_call_operand.hbm [shape: f32[2,8,128], index: 7, kind: output, shape index: {}]  }
   0x1   :  { %13 = vsyncpa [#allocation7], 0 }
   0x2   :  { %14 = vsyncpa [#allocation10], 0 }
   0x3   :  { %15 = vsyncpa [#allocation5], 0  ;;  %s5520_s24 = smov [#allocation6]   ;;  %s5380_s28 = scalar_lea.hbm %s6495_s1, 2560 }
   0x4   :  { %s33_s25 = sshll.u32 %s5520_s24, 4  ;;  %p5381_p0 = scmp.ne.s32.totalorder %s6495_s1, %s5380_s28  ;;  %s34_s25 = int_to_ptr.vmem [resolvable:$true] %s33_s25 }
   0x5   :  { %p5384_p1 = scmp.lt.u32.totalorder %s5380_s28, %s6495_s1 }
   0x7   :  { %p5386_p2 = pnand %p5384_p1, %p5381_p0 }
   0x9   :  { %5389 = shalt.err (!%p5386_p2)
}
   0xa   :  { %s5390_s10 = scalar_lea.vmem %s34_s25, 2560  ;;  %p5395_p4 = scmp.lt.s32.totalorder %s34_s25, %s34_s25 }
   0xb   :  { %p5391_p3 = scmp.ne.s32.totalorder %s34_s25, %s5390_s10  ;;  %p5396_p5 = scmp.lt.s32.totalorder %s5390_s10, %s5390_s10 }
   0xd   :  { %p5397_p6 = por %p5396_p5, %p5395_p4 }
   0xf   :  { %p5398_p7 = pnand %p5397_p6, %p5391_p3 }
  0x11   :  { %5401 = shalt.err (!%p5398_p7)
}
  0x12   :  { %s5521_s11 = smov 256   ;;  %s5522_s12 = smov 16  }
  0x13   :  { %39 = dma.hbm_to_vmem [thread:$0]  %s6495_s1, 2560, %s34_s25, [#allocation7], %s5521_s11, %s5521_s11, %s5522_s12  }
  0x14   :  { %s5523_s15 = smov [#allocation9]   ;;  %s5524_s17 = smov [#allocation3]  }
  0x15   :  { %s59_s16 = sshll.u32 %s5523_s15, 4  ;;  %s21_s18 = sshll.u32 %s5524_s17, 4  ;;  %s60_s16 = int_to_ptr.vmem [resolvable:$true] %s59_s16  ;;  %s22_s18 = int_to_ptr.vmem [resolvable:$true] %s21_s18 }
  0x16   :  { %s5402_s21 = scalar_lea.hbm %s6498_s4, 8192 }
  0x17   :  { %p5403_p8 = scmp.ne.s32.totalorder %s6498_s4, %s5402_s21  ;;  %p5406_p9 = scmp.lt.u32.totalorder %s5402_s21, %s6498_s4 }
  0x19   :  { %p5408_p10 = pnand %p5406_p9, %p5403_p8 }
  0x1b   :  { %5411 = shalt.err (!%p5408_p10)
}
  0x1c   :  { %s5412_s1 = scalar_lea.vmem %s60_s16, 8192  ;;  %p5417_p12 = scmp.lt.s32.totalorder %s60_s16, %s60_s16 }
  0x1d   :  { %p5413_p11 = scmp.ne.s32.totalorder %s60_s16, %s5412_s1  ;;  %p5418_p13 = scmp.lt.s32.totalorder %s5412_s1, %s5412_s1 }
  0x1f   :  { %p5419_p0 = por %p5418_p13, %p5417_p12 }
  0x21   :  { %p5420_p1 = pnand %p5419_p0, %p5413_p11 }
  0x23   :  { %5423 = shalt.err (!%p5420_p1)
}
  0x24   :  { %65 = dma.hbm_to_vmem [thread:$0]  %s6498_s4, 8192, %s60_s16, [#allocation10], %s5521_s11, %s5521_s11, %s5522_s12  }
  0x25   :  { %s5424_s30 = scalar_lea.hbm %s6494_s0, 256 }
  0x26   :  { %p5425_p2 = scmp.ne.s32.totalorder %s6494_s0, %s5424_s30  ;;  %p5428_p3 = scmp.lt.u32.totalorder %s5424_s30, %s6494_s0 }
  0x28   :  { %p5430_p4 = pnand %p5428_p3, %p5425_p2 }
  0x2a   :  { %5433 = shalt.err (!%p5430_p4)
}
  0x2b   :  { %s5434_s14 = scalar_lea.vmem %s22_s18, 256  ;;  %p5439_p6 = scmp.lt.s32.totalorder %s22_s18, %s22_s18 }
  0x2c   :  { %p5435_p5 = scmp.ne.s32.totalorder %s22_s18, %s5434_s14  ;;  %p5440_p7 = scmp.lt.s32.totalorder %s5434_s14, %s5434_s14 }
  0x2e   :  { %p5441_p8 = por %p5440_p7, %p5439_p6 }
  0x30   :  { %p5442_p9 = pnand %p5441_p8, %p5435_p5 }
  0x32   :  { %5445 = shalt.err (!%p5442_p9)
}
  0x33   :  { %s5525_s4 = smov 128   ;;  %s5526_s15 = smov 8  }
  0x34   :  { %27 = dma.hbm_to_vmem [thread:$0]  %s6494_s0, 256, %s22_s18, [#allocation4], %s5525_s4, %s5525_s4, %s5526_s15  }
  0x35   :  { %s5527_s19 = smov [#allocation8]   ;;  %s5528_s21 = smov [#allocation11]  }
  0x36   :  { %s45_s20 = sshll.u32 %s5527_s19, 4  ;;  %s71_s22 = sshll.u32 %s5528_s21, 4  ;;  %s46_s20 = int_to_ptr.vmem [resolvable:$true] %s45_s20  ;;  %s72_s22 = int_to_ptr.vmem [resolvable:$true] %s71_s22 }
  0x37   :  { %s5446_s26 = scalar_lea.hbm %s6496_s2, 4096 }
  0x38   :  { %p5447_p10 = scmp.ne.s32.totalorder %s6496_s2, %s5446_s26  ;;  %p5450_p11 = scmp.lt.u32.totalorder %s5446_s26, %s6496_s2 }
  0x3a   :  { %p5452_p12 = pnand %p5450_p11, %p5447_p10 }
  0x3c   :  { %5455 = shalt.err (!%p5452_p12)
}
  0x3d   :  { %s5456_s0 = scalar_lea.vmem %s46_s20, 4096  ;;  %p5461_p0 = scmp.lt.s32.totalorder %s46_s20, %s46_s20 }
  0x3e   :  { %p5457_p13 = scmp.ne.s32.totalorder %s46_s20, %s5456_s0  ;;  %p5462_p1 = scmp.lt.s32.totalorder %s5456_s0, %s5456_s0 }
  0x40   :  { %p5463_p2 = por %p5462_p1, %p5461_p0 }
  0x42   :  { %p5464_p3 = pnand %p5463_p2, %p5457_p13 }
  0x44   :  { %5467 = shalt.err (!%p5464_p3)
}
  0x45   :  { %51 = dma.hbm_to_vmem [thread:$0]  %s6496_s2, 4096, %s46_s20, [#allocation7], %s5521_s11, %s5521_s11, %s5522_s12  }
  0x46   :  { %s5468_s9 = scalar_lea.hbm %s6499_s5, 4096 }
  0x47   :  { %p5469_p4 = scmp.ne.s32.totalorder %s6499_s5, %s5468_s9  ;;  %p5472_p5 = scmp.lt.u32.totalorder %s5468_s9, %s6499_s5 }
  0x49   :  { %p5474_p6 = pnand %p5472_p5, %p5469_p4 }
  0x4b   :  { %5477 = shalt.err (!%p5474_p6)
}
  0x4c   :  { %s5478_s17 = scalar_lea.vmem %s72_s22, 4096  ;;  %p5483_p8 = scmp.lt.s32.totalorder %s72_s22, %s72_s22 }
  0x4d   :  { %p5479_p7 = scmp.ne.s32.totalorder %s72_s22, %s5478_s17  ;;  %p5484_p9 = scmp.lt.s32.totalorder %s5478_s17, %s5478_s17 }
  0x4f   :  { %p5485_p10 = por %p5484_p9, %p5483_p8 }
  0x51   :  { %p5486_p11 = pnand %p5485_p10, %p5479_p7 }
  0x53   :  { %5489 = shalt.err (!%p5486_p11)
}
  0x54   :  { %77 = dma.hbm_to_vmem [thread:$0]  %s6499_s5, 4096, %s72_s22, [#allocation10], %s5521_s11, %s5521_s11, %s5522_s12  }
  0x55   :  { %5512 = dma.done.wait [#allocation4], 256  }
  0x56   :  { %5513 = vsyncadd [#allocation4], 4294967040 }
  0x57   :  { %5514 = dma.done.wait [#allocation7], 6656  }
  0x58   :  { %5515 = vsyncadd [#allocation7], 4294960640 }
  0x59   :  { %5516 = dma.done.wait [#allocation10], 12288  }
  0x5a   :  { %5517 = vsyncadd [#allocation10], 4294955008  ;;  %v5529_v0 = vmov 0.0   ;;  %v98_v1 = vld [vmem:[#allocation6 + $0x8] sm:$0xff]  ;;  %v100_v2 = vld [vmem:[#allocation6 + $0x18] sm:$0xff]  ;;  %vm119_vm0 = vcmask 326656  }
  0x5b   :  { %190 = vmatprep.mubr.f32.mxu0 %v5529_v0  ;;  %291 = vmatprep.mubr.f32.mxu1 %v5529_v0  ;;  %v97_v3 = vld [vmem:[#allocation6] sm:$0xff]  ;;  %v4391_v4 = vpack.c.bf16 %v100_v2, %v98_v1  ;;  %v99_v5 = vld [vmem:[#allocation6 + $0x10] sm:$0xff]  ;;  %v205_v6 = vld [vmem:[#allocation6 + $0x58] sm:$0xff]  ;;  %vm543_vm1 = vcmask 1048070   ;;  %vm440_vm2 = vcmask 517120   ;;  %vm337_vm3 = vcmask 523264  }
  0x5c   :  { %v207_v7 = vld [vmem:[#allocation6 + $0x68] sm:$0xff]  ;;  %v4393_v8 = vpack.c.bf16 %v99_v5, %v97_v3  ;;  %v204_v10 = vld [vmem:[#allocation6 + $0x50] sm:$0xff]  ;;  %v206_v11 = vld [vmem:[#allocation6 + $0x60] sm:$0xff]  ;;  %vm767_vm4 = vcmask 1046020   ;;  %vm994_vm5 = vcmask 1043970   ;;  %vm1215_vm6 = vcmask 1041920  }
  0x5d   :  { %v4399_v9 = vpack.c.bf16 %v207_v7, %v205_v6  ;;  %v102_v12 = vld [vmem:[#allocation6 + $0x28] sm:$0xff]  ;;  %4392 = vmatprep.subr.bf16.mxu0 %v4391_v4  ;;  %v4401_v13 = vpack.c.bf16 %v206_v11, %v204_v10  ;;  %v104_v14 = vld [vmem:[#allocation6 + $0x38] sm:$0xff]  ;;  %v101_v15 = vld [vmem:[#allocation6 + $0x20] sm:$0xff]  ;;  %vm655_vm7 = vcmask 519170   ;;  %vm1109_vm8 = vcmask 523270  }
  0x5e   :  { %v103_v16 = vld [vmem:[#allocation6 + $0x30] sm:$0xff]  ;;  %4394 = vmatpush1.bf16.msra.mxu0 %v4393_v8  ;;  %v4395_v17 = vpack.c.bf16 %v104_v14, %v102_v12  ;;  %v209_v19 = vld [vmem:[#allocation6 + $0x78] sm:$0xff]  ;;  %v211_v20 = vld [vmem:[#allocation6 + $0x88] sm:$0xff]  ;;  %vm882_vm9 = vcmask 521220  }
  0x5f   :  { %4400 = vmatprep.subr.bf16.mxu1 %v4399_v9  ;;  %v4397_v18 = vpack.c.bf16 %v103_v16, %v101_v15  ;;  %v208_v21 = vld [vmem:[#allocation6 + $0x70] sm:$0xff]  ;;  %v4403_v22 = vpack.c.bf16 %v211_v20, %v209_v19  ;;  %v210_v23 = vld [vmem:[#allocation6 + $0x80] sm:$0xff]  ;;  %v106_v25 = vld [vmem:[#allocation6 + $0x48] sm:$0xff]  ;;  %v109_v16 = vlaneseq }
  0x60   :  { %4402 = vmatpush1.bf16.msra.mxu1 %v4401_v13  ;;  %4396 = vmatprep.subr.bf16.mxu0 %v4395_v17  ;;  %v4405_v24 = vpack.c.bf16 %v210_v23, %v208_v21  ;;  %v305_v26 = vld [vmem:[#allocation8 + $0x8] sm:$0xff]  ;;  %v105_v27 = vld [vmem:[#allocation6 + $0x40] sm:$0xff]  ;;  %v213_v28 = vld [vmem:[#allocation6 + $0x98] sm:$0xff] }
  0x61   :  { %4404 = vmatprep.subr.bf16.mxu1 %v4403_v22  ;;  %v307_v29 = vld [vmem:[#allocation8 + $0x18] sm:$0xff]  ;;  %v304_v30 = vld [vmem:[#allocation8] sm:$0xff]  ;;  %v95_v31 = vld [vmem:[#allocation3] sm:$0xff]  ;;  %v5728_v17 = vshrl.u32 %v109_v16, 7 }
  0x62   :  { %4398 = vmatpush1.bf16.msra.mxu0 %v4397_v18  ;;  %v306_v32 = vld [vmem:[#allocation8 + $0x10] sm:$0xff]  ;;  %v322_v33 = vld [vmem:[#allocation8 + $0x88] sm:$0xff]  ;;  %v324_v34 = vld [vmem:[#allocation8 + $0x98] sm:$0xff]  ;;  %v5650_v35 = vpack.c.bf16 %v307_v29, %v305_v26 }
  0x63   :  { %134 = vmatprep.subr.mxu0 %v106_v25  ;;  %v321_v36 = vld [vmem:[#allocation8 + $0x80] sm:$0xff]  ;;  %v323_v37 = vld [vmem:[#allocation8 + $0x90] sm:$0xff]  ;;  %v309_v38 = vld [vmem:[#allocation8 + $0x28] sm:$0xff]  ;;  %v5652_v40 = vpack.c.bf16 %v306_v32, %v304_v30  ;;  %v5654_v43 = vpack.c.bf16 %v324_v34, %v322_v33  ;;  %v5734_v19 = vsub.s32 0, %v5728_v17  ;;  %v5737_v21 = vsub.s32 1, %v5728_v17 }
  0x64   :  { %4406 = vmatpush1.bf16.msra.mxu1 %v4405_v24  ;;  %v212_v39 = vld [vmem:[#allocation6 + $0x90] sm:$0xff]  ;;  %v311_v41 = vld [vmem:[#allocation8 + $0x38] sm:$0xff]  ;;  %v308_v42 = vld [vmem:[#allocation8 + $0x20] sm:$0xff]  ;;  %v5656_v47 = vpack.c.bf16 %v323_v37, %v321_v36 }
  0x65   :  { %235 = vmatprep.subr.mxu1 %v213_v28  ;;  %v310_v44 = vld [vmem:[#allocation8 + $0x30] sm:$0xff]  ;;  %v326_v45 = vld [vmem:[#allocation8 + $0xa8] sm:$0xff]  ;;  %v328_v46 = vld [vmem:[#allocation8 + $0xb8] sm:$0xff]  ;;  %v5658_v48 = vpack.c.bf16 %v311_v41, %v309_v38 }
  0x66   :  { %135 = vmatpush1.msra.mxu0 %v105_v27  ;;  %v313_v49 = vld [vmem:[#allocation8 + $0x48] sm:$0xff]  ;;  %v315_v50 = vld [vmem:[#allocation8 + $0x58] sm:$0xff]  ;;  %v5662_v51 = vpack.c.bf16 %v328_v46, %v326_v45  ;;  %v325_v52 = vld [vmem:[#allocation8 + $0xa0] sm:$0xff]  ;;  %v5665_v54 = vpack.c.bf16 %v310_v44, %v308_v42 }
  0x67   :  { %4285 = vmatmul.mubr.msk.f32.vlgmr.msra.gmra.mrb[0].mxu0 %vm119_vm0, %v95_v31  ;;  %4408 = vmatprep.subr.bf16.mxu0 %v5650_v35  ;;  %v327_v53 = vld [vmem:[#allocation8 + $0xb0] sm:$0xff]  ;;  %v330_v55 = vld [vmem:[#allocation8 + $0xc8] sm:$0xff]  ;;  %v332_v56 = vld [vmem:[#allocation8 + $0xd8] sm:$0xff]  ;;  %v5669_v57 = vpack.c.bf16 %v315_v50, %v313_v49 }
  0x68   :  { %236 = vmatpush1.msra.mxu1 %v212_v39  ;;  %4410 = vmatpush1.bf16.msra.mxu0 %v5652_v40  ;;  %v312_v58 = vld [vmem:[#allocation8 + $0x40] sm:$0xff]  ;;  %v314_v59 = vld [vmem:[#allocation8 + $0x50] sm:$0xff]  ;;  %v5673_v60 = vpack.c.bf16 %v327_v53, %v325_v52  ;;  %v96_v61 = vld [vmem:[#allocation3 + $0x8] sm:$0xff]  ;;  %v5677_v1 = vpack.c.bf16 %v332_v56, %v330_v55 }
  0x69   :  { %4424 = vmatprep.subr.bf16.mxu1 %v5654_v43  ;;  %4288 = vmatmul.mubr.msk.f32.vlgmr.msra.gmra.mrb[0].mxu1 %vm119_vm0, %v95_v31  ;;  %v317_v62 = vld [vmem:[#allocation8 + $0x68] sm:$0xff]  ;;  %v319_v63 = vld [vmem:[#allocation8 + $0x78] sm:$0xff]  ;;  %v329_v2 = vld [vmem:[#allocation8 + $0xc0] sm:$0xff]  ;;  %v5680_v4 = vpack.c.bf16 %v314_v59, %v312_v58 }
  0x6a   :  { %4426 = vmatpush1.bf16.msra.mxu1 %v5656_v47  ;;  %4412 = vmatprep.subr.bf16.mxu0 %v5658_v48  ;;  %v331_v3 = vld [vmem:[#allocation8 + $0xd0] sm:$0xff]  ;;  %v334_v5 = vld [vmem:[#allocation8 + $0xe8] sm:$0xff]  ;;  %v336_v6 = vld [vmem:[#allocation8 + $0xf8] sm:$0xff]  ;;  %v5685_v7 = vpack.c.bf16 %v319_v63, %v317_v62 }
  0x6b   :  { %4428 = vmatprep.subr.bf16.mxu1 %v5662_v51  ;;  %196 = vmatprep.mubr.f32.mxu0 %v5529_v0  ;;  %v316_v8 = vld [vmem:[#allocation8 + $0x60] sm:$0xff]  ;;  %v318_v9 = vld [vmem:[#allocation8 + $0x70] sm:$0xff]  ;;  %v5688_v10 = vpack.c.bf16 %v331_v3, %v329_v2  ;;  %v5693_v11 = vpack.c.bf16 %v336_v6, %v334_v5 }
  0x6c   :  { %4414 = vmatpush1.bf16.msra.mxu0 %v5665_v54  ;;  %297 = vmatprep.mubr.f32.mxu1 %v5529_v0  ;;  %v333_v12 = vld [vmem:[#allocation8 + $0xe0] sm:$0xff]  ;;  %v335_v13 = vld [vmem:[#allocation8 + $0xf0] sm:$0xff]  ;;  %v5696_v14 = vpack.c.bf16 %v318_v9, %v316_v8 }
  0x6d   :  { %4416 = vmatprep.subr.bf16.mxu0 %v5669_v57  ;;  %4286 = vmatmul.mubr.msk.f32.gmra.mrb[2].mxu0 %vm119_vm0, %v96_v61  ;;  %v5701_v15 = vpack.c.bf16 %v335_v13, %v333_v12  ;;  %v4287_v18 = vld [vmem:[%s6497_s3 + $0x2] sm:$0x3]  ;;  %v107_v24 = vld [vmem:[%s6497_s3] sm:$0x3]  ;;  %s5530_s3 = smov 64  }
  0x6e   :  { %4430 = vmatpush1.bf16.msra.mxu1 %v5673_v60  ;;  %405 = vmatprep.mubr.f32.mxu0 %v5529_v0  ;;  %v220_v23 = vrot.slane %v4287_v18, %v5734_v19  ;;  %v224_v26 = vrot.slane %v4287_v18, %v5737_v21  ;;  %v112_v30 = vrot.slane %v107_v24, %v5734_v19 }
  0x6f   :  { %4432 = vmatprep.subr.bf16.mxu1 %v5677_v1  ;;  %4289 = vmatmul.mubr.msk.f32.gmra.mrb[2].mxu1 %vm119_vm0, %v96_v61  ;;  %v116_v31 = vrot.slane %v107_v24, %v5737_v21 }
  0x70   :  { %4418 = vmatpush1.bf16.msra.mxu0 %v5680_v4  ;;  %506 = vmatprep.mubr.f32.mxu1 %v5529_v0 }
  0x71   :  { %4420 = vmatprep.subr.bf16.mxu0 %v5685_v7 }
  0x72   :  { %4434 = vmatpush1.bf16.msra.mxu1 %v5688_v10 }
  0x73   :  { %4436 = vmatprep.subr.bf16.mxu1 %v5693_v11 }
  0x74   :  { %4422 = vmatpush1.bf16.msra.mxu0 %v5696_v14 }
  0x75   :  { %4440 = vmatprep.subr.bf16.mxu0 %v5650_v35 }
  0x76   :  { %4438 = vmatpush1.bf16.msra.mxu1 %v5701_v15 }
  0x77   :  { %406 = vmatmul.mubr.f32.vlgmr.msra.gmra.mrb[4].mxu0 %v5529_v0  ;;  %4456 = vmatprep.subr.bf16.mxu1 %v5654_v43 }
  0x78   :  { %4442 = vmatpush1.bf16.msra.mxu0 %v5652_v40  ;;  %611 = vmatprep.mubr.f32.mxu0 %v5529_v0 }
  0x79   :  { %507 = vmatmul.mubr.f32.vlgmr.msra.gmra.mrb[4].mxu1 %v5529_v0  ;;  %4444 = vmatprep.subr.bf16.mxu0 %v5658_v48 }
  0x7a   :  { %4458 = vmatpush1.bf16.msra.mxu1 %v5656_v47  ;;  %727 = vmatprep.mubr.f32.mxu1 %v5529_v0 }
  0x7b   :  { %4460 = vmatprep.subr.bf16.mxu1 %v5662_v51 }
  0x7c   :  { %4446 = vmatpush1.bf16.msra.mxu0 %v5665_v54 }
  0x7d   :  { %4448 = vmatprep.subr.bf16.mxu0 %v5669_v57 }
  0x7e   :  { %4462 = vmatpush1.bf16.msra.mxu1 %v5673_v60 }
  0x7f   :  { %4464 = vmatprep.subr.bf16.mxu1 %v5677_v1 }
  0x80   :  { %4450 = vmatpush1.bf16.msra.mxu0 %v5680_v4 }
  0x81   :  { %4452 = vmatprep.subr.bf16.mxu0 %v5685_v7 }
  0x82   :  { %4466 = vmatpush1.bf16.msra.mxu1 %v5688_v10 }
  0x83   :  { %4468 = vmatprep.subr.bf16.mxu1 %v5693_v11 }
  0x84   :  { %4454 = vmatpush1.bf16.msra.mxu0 %v5696_v14 }
  0x85   :  { %4472 = vmatprep.subr.bf16.mxu0 %v5650_v35 }
  0x86   :  { %4470 = vmatpush1.bf16.msra.mxu1 %v5701_v15 }
  0x87   :  { %4488 = vmatprep.subr.bf16.mxu1 %v5654_v43 }
 0x13a   :  { %v192_v20 = vpop.f32.mrb[0].mxu0 }
 0x13b   :  { %v194_v22 = vpop.f32.mrb[1].mxu0  ;;  %v5754_v39 = vadd.f32 %v192_v20, %v112_v30 }
 0x13c   :  { %v293_v25 = vpop.f32.mrb[0].mxu1  ;;  %v5760_v56 = vadd.f32 %v194_v22, %v116_v31 }
 0x13d   :  { %v5744_v27 = vadd.f32 %v293_v25, %v220_v23  ;;  %v295_v28 = vpop.f32.mrb[1].mxu1 }
 0x13e   :  { %v5746_v29 = vadd.f32 %v295_v28, %v224_v26 }
 0x140   :  { %v198_v32 = vpop.f32.mrb[2].mxu0 }
 0x141   :  { %v5750_v33 = vadd.f32 %v198_v32, %v112_v30  ;;  %v200_v34 = vpop.f32.mrb[3].mxu0 }
 0x142   :  { %v5752_v36 = vadd.f32 %v200_v34, %v116_v31  ;;  %v299_v37 = vpop.f32.mrb[2].mxu1 }
 0x143   :  { %v301_v38 = vpop.f32.mrb[3].mxu1  ;;  %v5756_v42 = vadd.f32 %v299_v37, %v220_v23 }
 0x144   :  { %v5762_v58 = vadd.f32 %v301_v38, %v224_v26 }
 0x14a   :  { %v407_v41 = vpop.f32.mrb[4].mxu0 }
 0x14b   :  { %v412_v44 = vadd.f32 %v407_v41, %v5754_v39  ;;  %v409_v45 = vpop.f32.mrb[5].mxu0 }
 0x14c   :  { %v508_v46 = vpop.f32.mrb[4].mxu1  ;;  %v413_v61 = vadd.f32 %v409_v45, %v5760_v56 }
 0x14d   :  { %v4290_v49 = vmul.f32 -1.442695, %v412_v44  ;;  %v515_v50 = vrot.slane %v508_v46, 2  ;;  %v510_v52 = vpop.f32.mrb[5].mxu1 }
 0x14e   :  { %v516_v59 = vrot.slane %v510_v52, 2  ;;  %v4291_v18 = vmul.f32 -1.442695, %v413_v61 }
 0x14f   :  { %4996 = vpow2.f32 %v4290_v49  ;;  %v519_v53 = vadd.f32 %v515_v50, %v5756_v42 }
 0x150   :  { %v520_v2 = vadd.f32 %v516_v59, %v5762_v58 }
 0x151   :  { %v4292_v55 = vmul.f32 -1.442695, %v519_v53 }
 0x152   :  { %v4293_v20 = vmul.f32 -1.442695, %v520_v2 }
 0x153   :  { %4998 = vpow2.f32 %v4292_v55 }
 0x154   :  { %5000 = vtanh.f32 %v413_v61 }
 0x159   :  { %v4997_v62 = vpop.eup %4996 }
 0x15a   :  { %v417_v63 = vadd.f32 1.0, %v4997_v62 }
 0x15c   :  { %5002 = vrcp.f32 %v417_v63 }
 0x15d   :  { %v4999_v3 = vpop.eup %4998  ;;  %5004 = vtanh.f32 %v520_v2 }
 0x15e   :  { %v524_v5 = vadd.f32 1.0, %v4999_v3  ;;  %v5001_v6 = vpop.eup %5000 }
 0x160   :  { %5006 = vrcp.f32 %v524_v5 }
 0x161   :  { %5008 = vpow2.f32 %v4291_v18 }
 0x162   :  { %5010 = vpow2.f32 %v4293_v20 }
 0x166   :  { %v5003_v8 = vpop.eup %5002 }
 0x167   :  { %v428_v9 = vmul.f32 %v5003_v8, %v5001_v6  ;;  %v5005_v12 = vpop.eup %5004  ;;  %v427_v25 = vmul.f32 0.0, %v5003_v8 }
 0x169   :  { %430 = vrot.lane.b32.xlu0 %v428_v9, %s5530_s3 }
 0x16a   :  { %v5007_v13 = vpop.eup %5006 }
 0x16b   :  { %v535_v16 = vmul.f32 %v5007_v13, %v5005_v12  ;;  %v5009_v22 = vpop.eup %5008  ;;  %v534_v31 = vmul.f32 0.0, %v5007_v13 }
 0x16c   :  { %v424_v23 = vadd.f32 1.0, %v5009_v22  ;;  %v5011_v24 = vpop.eup %5010 }
 0x16d   :  { %537 = vrot.lane.b32.xlu0 %v535_v16, %s5530_s3  ;;  %v531_v30 = vadd.f32 1.0, %v5011_v24 }
 0x16e   :  { %5012 = vrcp.f32 %v424_v23 }
 0x178   :  { %v5013_v37 = vpop.eup %5012 }
 0x1db   :  { %v431_v26 = vpop.permute.xlu0 %430 }
 0x1dc   :  { %v5768_v28 = vadd.f32 %v431_v26, %v427_v25 }
 0x1de   :  { %5014 = vtanh.f32 %v5768_v28  ;;  %v640_v24 = vrot.slane %v5768_v28, 6 }
 0x1df   :  { %v538_v32 = vpop.permute.xlu0 %537  ;;  %5016 = vrcp.f32 %v531_v30 }
 0x1e0   :  { %v5771_v34 = vadd.f32 %v538_v32, %v534_v31 }
 0x1e2   :  { %5018 = vtanh.f32 %v5771_v34  ;;  %v756_v32 = vrot.slane %v5771_v34, 2 }
 0x1e8   :  { %v5015_v38 = vpop.eup %5014 }
 0x1e9   :  { %v435_v41 = vmul.f32 %v5015_v38, %v5013_v37  ;;  %v5017_v44 = vpop.eup %5016 }
 0x1eb   :  { %437 = vrot.lane.b32.xlu1 %v435_v41, %s5530_s3 }
 0x1ec   :  { %v5019_v45 = vpop.eup %5018 }
 0x1ed   :  { %v542_v46 = vmul.f32 %v5019_v45, %v5017_v44 }
 0x1ef   :  { %v658_v49 = vrot.slane %v542_v46, 6  ;;  %544 = vst.msk [vmem:[#allocation2 + $0x8] sm:$0xc0] %vm543_vm1, %v542_v46 }
 0x1f1   :  { %659 = vrot.lane.b32.xlu1 %v658_v49, %s5530_s3 }
 0x25d   :  { %v438_v50 = vpop.permute.xlu1 %437 }
 0x25e   :  { %441 = vst.msk [vmem:[#allocation2] sm:$0x3] %vm440_vm2, %v438_v50  ;;  %4294 = vmatmul.mubr.msk.f32.vlgmr.msra.gmra.mrb[6].mxu0 %vm337_vm3, %v438_v50 }
 0x25f   :  { %4474 = vmatpush1.bf16.msra.mxu0 %v5652_v40  ;;  %838 = vmatprep.mubr.f32.mxu0 %v5529_v0 }
 0x260   :  { %4476 = vmatprep.subr.bf16.mxu0 %v5658_v48 }
 0x263   :  { %v660_v52 = vpop.permute.xlu1 %659  ;;  %4478 = vmatpush1.bf16.msra.mxu0 %v5665_v54 }
 0x264   :  { %4297 = vmatmul.mubr.msk.f32.vlgmr.msra.gmra.mrb[6].mxu1 %vm337_vm3, %v660_v52  ;;  %4480 = vmatprep.subr.bf16.mxu0 %v5669_v57 }
 0x265   :  { %4490 = vmatpush1.bf16.msra.mxu1 %v5656_v47  ;;  %954 = vmatprep.mubr.f32.mxu1 %v5529_v0 }
 0x266   :  { %4492 = vmatprep.subr.bf16.mxu1 %v5662_v51 }
 0x267   :  { %4482 = vmatpush1.bf16.msra.mxu0 %v5680_v4 }
 0x268   :  { %4484 = vmatprep.subr.bf16.mxu0 %v5685_v7 }
 0x269   :  { %4494 = vmatpush1.bf16.msra.mxu1 %v5673_v60 }
 0x26a   :  { %4496 = vmatprep.subr.bf16.mxu1 %v5677_v1 }
 0x26b   :  { %4486 = vmatpush1.bf16.msra.mxu0 %v5696_v14 }
 0x26c   :  { %4504 = vmatprep.subr.bf16.mxu0 %v5650_v35 }
 0x26d   :  { %4498 = vmatpush1.bf16.msra.mxu1 %v5688_v10 }
 0x26e   :  { %4500 = vmatprep.subr.bf16.mxu1 %v5693_v11 }
 0x271   :  { %4502 = vmatpush1.bf16.msra.mxu1 %v5701_v15 }
 0x272   :  { %4520 = vmatprep.subr.bf16.mxu1 %v5654_v43 }
 0x331   :  { %v613_v53 = vpop.f32.mrb[6].mxu0 }
 0x332   :  { %v620_v55 = vrot.slane %v613_v53, 6  ;;  %v615_v59 = vpop.f32.mrb[7].mxu0 }
 0x333   :  { %v621_v6 = vrot.slane %v615_v59, 6 }
 0x334   :  { %v624_v61 = vadd.f32 %v620_v55, %v5754_v39 }
 0x335   :  { %v625_v9 = vadd.f32 %v621_v6, %v5760_v56 }
 0x336   :  { %v4295_v62 = vmul.f32 -1.442695, %v624_v61 }
 0x337   :  { %v729_v63 = vpop.f32.mrb[6].mxu1  ;;  %v4296_v44 = vmul.f32 -1.442695, %v625_v9 }
 0x338   :  { %5020 = vpow2.f32 %v4295_v62  ;;  %v736_v2 = vrot.slane %v729_v63, 4  ;;  %v731_v3 = vpop.f32.mrb[7].mxu1 }
 0x339   :  { %v737_v13 = vrot.slane %v731_v3, 4 }
 0x33a   :  { %v740_v5 = vadd.f32 %v736_v2, %v5756_v42 }
 0x33b   :  { %v741_v18 = vadd.f32 %v737_v13, %v5762_v58 }
 0x33c   :  { %v4298_v8 = vmul.f32 -1.442695, %v740_v5 }
 0x33d   :  { %v4299_v45 = vmul.f32 -1.442695, %v741_v18 }
 0x33e   :  { %5022 = vpow2.f32 %v4298_v8 }
 0x33f   :  { %5024 = vtanh.f32 %v625_v9 }
 0x342   :  { %v5021_v12 = vpop.eup %5020 }
 0x343   :  { %v629_v16 = vadd.f32 1.0, %v5021_v12 }
 0x345   :  { %5026 = vrcp.f32 %v629_v16 }
 0x346   :  { %5028 = vtanh.f32 %v741_v18 }
 0x348   :  { %v5023_v20 = vpop.eup %5022 }
 0x349   :  { %v745_v22 = vadd.f32 1.0, %v5023_v20  ;;  %v5025_v23 = vpop.eup %5024 }
 0x34b   :  { %5030 = vrcp.f32 %v745_v22 }
 0x34c   :  { %5032 = vpow2.f32 %v4296_v44 }
 0x34d   :  { %5034 = vpow2.f32 %v4299_v45 }
 0x34f   :  { %v5027_v25 = vpop.eup %5026 }
 0x350   :  { %v643_v26 = vmul.f32 %v5027_v25, %v5025_v23  ;;  %v642_v30 = vmul.f32 %v5027_v25, %v640_v24  ;;  %v5029_v31 = vpop.eup %5028 }
 0x352   :  { %645 = vrot.lane.b32.xlu0 %v643_v26, %s5530_s3 }
 0x355   :  { %v5031_v37 = vpop.eup %5030 }
 0x356   :  { %v759_v38 = vmul.f32 %v5031_v37, %v5029_v31  ;;  %v758_v41 = vmul.f32 %v5031_v37, %v756_v32  ;;  %v5033_v46 = vpop.eup %5032 }
 0x357   :  { %v636_v49 = vadd.f32 1.0, %v5033_v46  ;;  %v5035_v50 = vpop.eup %5034 }
 0x358   :  { %761 = vrot.lane.b32.xlu1 %v759_v38, %s5530_s3  ;;  %v752_v53 = vadd.f32 1.0, %v5035_v50 }
 0x359   :  { %5036 = vrcp.f32 %v636_v49 }
 0x363   :  { %v5037_v59 = vpop.eup %5036 }
 0x3c4   :  { %v646_v28 = vpop.permute.xlu0 %645 }
 0x3c5   :  { %v5806_v52 = vadd.f32 %v646_v28, %v642_v30 }
 0x3c7   :  { %5038 = vtanh.f32 %v5806_v52  ;;  %v867_v49 = vrot.slane %v5806_v52, 6 }
 0x3c8   :  { %5040 = vrcp.f32 %v752_v53 }
 0x3ca   :  { %v762_v34 = vpop.permute.xlu1 %761 }
 0x3cb   :  { %v5809_v55 = vadd.f32 %v762_v34, %v758_v41 }
 0x3cd   :  { %5042 = vtanh.f32 %v5809_v55 }
 0x3d1   :  { %v5039_v61 = vpop.eup %5038 }
 0x3d2   :  { %v5812_v62 = vmul.f32 %v5039_v61, %v5037_v59  ;;  %v5041_v2 = vpop.eup %5040  ;;  %v983_v59 = vrot.slane %v5809_v55, 2 }
 0x3d4   :  { %v769_v63 = vrot.slane %v5812_v62, 2 }
 0x3d6   :  { %770 = vrot.lane.b32.xlu0 %v769_v63, %s5530_s3 }
 0x3d7   :  { %v5043_v3 = vpop.eup %5042 }
 0x3d8   :  { %v766_v5 = vmul.f32 %v5043_v3, %v5041_v2 }
 0x3da   :  { %v885_v6 = vrot.slane %v766_v5, 4  ;;  %768 = vst.msk [vmem:[#allocation2 + $0x8] sm:$0x30] %vm767_vm4, %v766_v5 }
 0x3dc   :  { %886 = vrot.lane.b32.xlu1 %v885_v6, %s5530_s3 }
 0x448   :  { %v771_v8 = vpop.permute.xlu0 %770 }
 0x449   :  { %4300 = vmatmul.mubr.msk.f32.vlgmr.msra.gmra.mrb[8].mxu0 %vm337_vm3, %v771_v8 }
 0x44a   :  { %4506 = vmatpush1.bf16.msra.mxu0 %v5652_v40  ;;  %1065 = vmatprep.mubr.f32.mxu0 %v5529_v0 }
 0x44b   :  { %4508 = vmatprep.subr.bf16.mxu0 %v5658_v48 }
 0x44e   :  { %v887_v9 = vpop.permute.xlu1 %886  ;;  %4510 = vmatpush1.bf16.msra.mxu0 %v5665_v54 }
 0x44f   :  { %4303 = vmatmul.mubr.msk.f32.vlgmr.msra.gmra.mrb[8].mxu1 %vm337_vm3, %v887_v9  ;;  %4512 = vmatprep.subr.bf16.mxu0 %v5669_v57 }
 0x450   :  { %4522 = vmatpush1.bf16.msra.mxu1 %v5656_v47  ;;  %1181 = vmatprep.mubr.f32.mxu1 %v5529_v0 }
 0x451   :  { %4524 = vmatprep.subr.bf16.mxu1 %v5662_v51 }
 0x452   :  { %4514 = vmatpush1.bf16.msra.mxu0 %v5680_v4 }
 0x453   :  { %4516 = vmatprep.subr.bf16.mxu0 %v5685_v7 }
 0x454   :  { %4526 = vmatpush1.bf16.msra.mxu1 %v5673_v60 }
 0x455   :  { %4528 = vmatprep.subr.bf16.mxu1 %v5677_v1 }
 0x456   :  { %4518 = vmatpush1.bf16.msra.mxu0 %v5696_v14 }
 0x457   :  { %4536 = vmatprep.subr.bf16.mxu0 %v5650_v35 }
 0x458   :  { %4530 = vmatpush1.bf16.msra.mxu1 %v5688_v10 }
 0x459   :  { %4532 = vmatprep.subr.bf16.mxu1 %v5693_v11 }
 0x45c   :  { %4534 = vmatpush1.bf16.msra.mxu1 %v5701_v15 }
 0x45d   :  { %4552 = vmatprep.subr.bf16.mxu1 %v5654_v43 }
 0x51c   :  { %v840_v12 = vpop.f32.mrb[8].mxu0 }
 0x51d   :  { %v847_v13 = vrot.slane %v840_v12, 4  ;;  %v842_v16 = vpop.f32.mrb[9].mxu0 }
 0x51e   :  { %v848_v26 = vrot.slane %v842_v16, 4 }
 0x51f   :  { %v851_v18 = vadd.f32 %v847_v13, %v5754_v39 }
 0x520   :  { %v852_v31 = vadd.f32 %v848_v26, %v5760_v56 }
 0x521   :  { %v4301_v20 = vmul.f32 -1.442695, %v851_v18 }
 0x522   :  { %v956_v22 = vpop.f32.mrb[8].mxu1  ;;  %v4302_v3 = vmul.f32 -1.442695, %v852_v31 }
 0x523   :  { %5044 = vpow2.f32 %v4301_v20  ;;  %v963_v23 = vrot.slane %v956_v22, 6  ;;  %v958_v24 = vpop.f32.mrb[9].mxu1 }
 0x524   :  { %v964_v37 = vrot.slane %v958_v24, 6 }
 0x525   :  { %v967_v25 = vadd.f32 %v963_v23, %v5756_v42 }
 0x526   :  { %v968_v41 = vadd.f32 %v964_v37, %v5762_v58 }
 0x527   :  { %v4304_v30 = vmul.f32 -1.442695, %v967_v25 }
 0x528   :  { %v4305_v5 = vmul.f32 -1.442695, %v968_v41 }
 0x529   :  { %5046 = vpow2.f32 %v4304_v30 }
 0x52a   :  { %5048 = vtanh.f32 %v852_v31 }
 0x52d   :  { %v5045_v32 = vpop.eup %5044 }
 0x52e   :  { %v856_v38 = vadd.f32 1.0, %v5045_v32 }
 0x530   :  { %5050 = vrcp.f32 %v856_v38 }
 0x531   :  { %5052 = vtanh.f32 %v968_v41 }
 0x533   :  { %v5047_v44 = vpop.eup %5046 }
 0x534   :  { %v972_v45 = vadd.f32 1.0, %v5047_v44  ;;  %v5049_v46 = vpop.eup %5048 }
 0x536   :  { %5054 = vrcp.f32 %v972_v45 }
 0x537   :  { %5056 = vpow2.f32 %v4302_v3 }
 0x538   :  { %5058 = vpow2.f32 %v4305_v5 }
 0x53a   :  { %v5051_v28 = vpop.eup %5050 }
 0x53b   :  { %v870_v50 = vmul.f32 %v5051_v28, %v5049_v46  ;;  %v869_v53 = vmul.f32 %v5051_v28, %v867_v49  ;;  %v5053_v34 = vpop.eup %5052 }
 0x53d   :  { %872 = vrot.lane.b32.xlu0 %v870_v50, %s5530_s3 }
 0x540   :  { %v5055_v61 = vpop.eup %5054 }
 0x541   :  { %v986_v63 = vmul.f32 %v5055_v61, %v5053_v34  ;;  %v985_v2 = vmul.f32 %v5055_v61, %v983_v59  ;;  %v5057_v6 = vpop.eup %5056 }
 0x542   :  { %v863_v8 = vadd.f32 1.0, %v5057_v6  ;;  %v5059_v9 = vpop.eup %5058 }
 0x543   :  { %988 = vrot.lane.b32.xlu1 %v986_v63, %s5530_s3  ;;  %v979_v13 = vadd.f32 1.0, %v5059_v9 }
 0x544   :  { %5060 = vrcp.f32 %v863_v8 }
 0x54e   :  { %v5061_v18 = vpop.eup %5060 }
 0x5af   :  { %v873_v52 = vpop.permute.xlu0 %872 }
 0x5b0   :  { %v5846_v12 = vadd.f32 %v873_v52, %v869_v53 }
 0x5b2   :  { %5062 = vtanh.f32 %v5846_v12  ;;  %v1094_v5 = vrot.slane %v5846_v12, 6 }
 0x5b3   :  { %5064 = vrcp.f32 %v979_v13 }
 0x5b5   :  { %v989_v55 = vpop.permute.xlu1 %988 }
 0x5b6   :  { %v5849_v16 = vadd.f32 %v989_v55, %v985_v2 }
 0x5b8   :  { %5066 = vtanh.f32 %v5849_v16  ;;  %v1204_v9 = vrot.slane %v5849_v16, 2 }
 0x5bc   :  { %v5063_v20 = vpop.eup %5062 }
 0x5bd   :  { %v5852_v22 = vmul.f32 %v5063_v20, %v5061_v18  ;;  %v5065_v24 = vpop.eup %5064 }
 0x5bf   :  { %v996_v23 = vrot.slane %v5852_v22, 4 }
 0x5c1   :  { %997 = vrot.lane.b32.xlu0 %v996_v23, %s5530_s3 }
 0x5c2   :  { %v5067_v25 = vpop.eup %5066 }
 0x5c3   :  { %v993_v26 = vmul.f32 %v5067_v25, %v5065_v24 }
 0x5c5   :  { %v1112_v30 = vrot.slane %v993_v26, 2  ;;  %995 = vst.msk [vmem:[#allocation2 + $0x8] sm:$0xc] %vm994_vm5, %v993_v26 }
 0x5c7   :  { %1113 = vrot.lane.b32.xlu1 %v1112_v30, %s5530_s3 }
 0x633   :  { %v998_v31 = vpop.permute.xlu0 %997 }
 0x634   :  { %4306 = vmatmul.mubr.msk.f32.vlgmr.msra.gmra.mrb[10].mxu0 %vm337_vm3, %v998_v31 }
 0x635   :  { %4538 = vmatpush1.bf16.msra.mxu0 %v5652_v40  ;;  %1286 = vmatprep.mubr.f32.mxu0 %v5529_v0 }
 0x636   :  { %4540 = vmatprep.subr.bf16.mxu0 %v5658_v48 }
 0x639   :  { %v1114_v32 = vpop.permute.xlu1 %1113  ;;  %4542 = vmatpush1.bf16.msra.mxu0 %v5665_v54 }
 0x63a   :  { %4309 = vmatmul.mubr.msk.f32.vlgmr.msra.gmra.mrb[10].mxu1 %vm337_vm3, %v1114_v32  ;;  %4544 = vmatprep.subr.bf16.mxu0 %v5669_v57 }
 0x63b   :  { %4554 = vmatpush1.bf16.msra.mxu1 %v5656_v47  ;;  %1394 = vmatprep.mubr.f32.mxu1 %v5529_v0 }
 0x63c   :  { %4556 = vmatprep.subr.bf16.mxu1 %v5662_v51 }
 0x63d   :  { %4546 = vmatpush1.bf16.msra.mxu0 %v5680_v4 }
 0x63e   :  { %4548 = vmatprep.subr.bf16.mxu0 %v5685_v7 }
 0x63f   :  { %4558 = vmatpush1.bf16.msra.mxu1 %v5673_v60 }
 0x640   :  { %4560 = vmatprep.subr.bf16.mxu1 %v5677_v1 }
 0x641   :  { %4550 = vmatpush1.bf16.msra.mxu0 %v5696_v14 }
 0x642   :  { %4568 = vmatprep.subr.bf16.mxu0 %v5650_v35 }
 0x643   :  { %4562 = vmatpush1.bf16.msra.mxu1 %v5688_v10 }
 0x644   :  { %4564 = vmatprep.subr.bf16.mxu1 %v5693_v11 }
 0x647   :  { %4566 = vmatpush1.bf16.msra.mxu1 %v5701_v15 }
 0x648   :  { %4584 = vmatprep.subr.bf16.mxu1 %v5654_v43 }
 0x707   :  { %v1067_v37 = vpop.f32.mrb[10].mxu0 }
 0x708   :  { %v1074_v38 = vrot.slane %v1067_v37, 2  ;;  %v1069_v41 = vpop.f32.mrb[11].mxu0 }
 0x709   :  { %v1075_v53 = vrot.slane %v1069_v41, 2 }
 0x70a   :  { %v1078_v44 = vadd.f32 %v1074_v38, %v5754_v39 }
 0x70b   :  { %v1079_v34 = vadd.f32 %v1075_v53, %v5760_v56 }
 0x70c   :  { %v4307_v45 = vmul.f32 -1.442695, %v1078_v44 }
 0x70d   :  { %v1183_v46 = vpop.f32.mrb[10].mxu1 }
 0x70e   :  { %5068 = vpow2.f32 %v4307_v45  ;;  %v1188_v49 = vadd.f32 %v1183_v46, %v5756_v42  ;;  %v1185_v28 = vpop.f32.mrb[11].mxu1 }
 0x70f   :  { %v1189_v63 = vadd.f32 %v1185_v28, %v5762_v58  ;;  %v4308_v58 = vmul.f32 -1.442695, %v1079_v34 }
 0x710   :  { %v4310_v50 = vmul.f32 -1.442695, %v1188_v49 }
 0x711   :  { %v4311_v18 = vmul.f32 -1.442695, %v1189_v63 }
 0x712   :  { %5070 = vpow2.f32 %v4310_v50 }
 0x713   :  { %5072 = vtanh.f32 %v1079_v34 }
 0x718   :  { %v5069_v59 = vpop.eup %5068 }
 0x719   :  { %v1083_v61 = vadd.f32 1.0, %v5069_v59 }
 0x71b   :  { %5074 = vrcp.f32 %v1083_v61 }
 0x71c   :  { %v5071_v2 = vpop.eup %5070  ;;  %5076 = vtanh.f32 %v1189_v63 }
 0x71d   :  { %v1193_v3 = vadd.f32 1.0, %v5071_v2  ;;  %v5073_v39 = vpop.eup %5072 }
 0x71f   :  { %5078 = vrcp.f32 %v1193_v3 }
 0x720   :  { %5080 = vpow2.f32 %v4308_v58 }
 0x721   :  { %5082 = vpow2.f32 %v4311_v18 }
 0x725   :  { %v5075_v42 = vpop.eup %5074 }
 0x726   :  { %v1097_v6 = vmul.f32 %v5075_v42, %v5073_v39  ;;  %v1096_v8 = vmul.f32 %v5075_v42, %v1094_v5  ;;  %v5077_v52 = vpop.eup %5076 }
 0x728   :  { %1099 = vrot.lane.b32.xlu0 %v1097_v6, %s5530_s3 }
 0x729   :  { %v5079_v56 = vpop.eup %5078 }
 0x72a   :  { %v1207_v13 = vmul.f32 %v5079_v56, %v5077_v52  ;;  %v1206_v55 = vmul.f32 %v5079_v56, %v1204_v9  ;;  %v5081_v20 = vpop.eup %5080 }
 0x72b   :  { %v1090_v23 = vadd.f32 1.0, %v5081_v20  ;;  %v5083_v12 = vpop.eup %5082 }
 0x72c   :  { %1209 = vrot.lane.b32.xlu1 %v1207_v13, %s5530_s3  ;;  %v1200_v26 = vadd.f32 1.0, %v5083_v12 }
 0x72d   :  { %5084 = vrcp.f32 %v1090_v23 }
 0x737   :  { %v5085_v31 = vpop.eup %5084 }
 0x79a   :  { %v1100_v24 = vpop.permute.xlu0 %1099 }
 0x79b   :  { %v5886_v25 = vadd.f32 %v1100_v24, %v1096_v8 }
 0x79d   :  { %5086 = vtanh.f32 %v5886_v25  ;;  %v1309_v13 = vrot.slane %v5886_v25, 6 }
 0x79e   :  { %v1210_v16 = vpop.permute.xlu1 %1209  ;;  %5088 = vrcp.f32 %v1200_v26 }
 0x79f   :  { %v5889_v30 = vadd.f32 %v1210_v16, %v1206_v55 }
 0x7a1   :  { %5090 = vtanh.f32 %v5889_v30  ;;  %v1423_v23 = vrot.slane %v5889_v30, 2 }
 0x7a7   :  { %v5087_v32 = vpop.eup %5086 }
 0x7a8   :  { %v5892_v37 = vmul.f32 %v5087_v32, %v5085_v31  ;;  %v5089_v38 = vpop.eup %5088 }
 0x7aa   :  { %v1217_v41 = vrot.slane %v5892_v37, 6 }
 0x7ab   :  { %v5091_v44 = vpop.eup %5090 }
 0x7ac   :  { %1218 = vrot.lane.b32.xlu0 %v1217_v41, %s5530_s3  ;;  %v1214_v45 = vmul.f32 %v5091_v44, %v5089_v38 }
 0x7ae   :  { %1326 = vrot.lane.b32.xlu1 %v1214_v45, %s5530_s3  ;;  %1216 = vst.msk [vmem:[#allocation2 + $0x8] sm:$0x3] %vm1215_vm6, %v1214_v45 }
 0x81e   :  { %v1219_v46 = vpop.permute.xlu0 %1218 }
 0x81f   :  { %4312 = vmatmul.mubr.msk.f32.vlgmr.msra.gmra.mrb[12].mxu0 %vm337_vm3, %v1219_v46 }
 0x820   :  { %v1327_v49 = vpop.permute.xlu1 %1326  ;;  %4570 = vmatpush1.bf16.msra.mxu0 %v5652_v40  ;;  %1501 = vmatprep.mubr.f32.mxu0 %v5529_v0 }
 0x821   :  { %4315 = vmatmul.mubr.msk.f32.vlgmr.msra.gmra.mrb[12].mxu1 %vm337_vm3, %v1327_v49  ;;  %4572 = vmatprep.subr.bf16.mxu0 %v5658_v48 }
 0x822   :  { %4586 = vmatpush1.bf16.msra.mxu1 %v5656_v47  ;;  %1616 = vmatprep.mubr.f32.mxu1 %v5529_v0 }
 0x823   :  { %4588 = vmatprep.subr.bf16.mxu1 %v5662_v51 }
 0x824   :  { %4574 = vmatpush1.bf16.msra.mxu0 %v5665_v54 }
 0x825   :  { %4576 = vmatprep.subr.bf16.mxu0 %v5669_v57 }
 0x826   :  { %4590 = vmatpush1.bf16.msra.mxu1 %v5673_v60 }
 0x827   :  { %4592 = vmatprep.subr.bf16.mxu1 %v5677_v1 }
 0x828   :  { %4578 = vmatpush1.bf16.msra.mxu0 %v5680_v4 }
 0x829   :  { %4580 = vmatprep.subr.bf16.mxu0 %v5685_v7 }
 0x82a   :  { %4594 = vmatpush1.bf16.msra.mxu1 %v5688_v10 }
 0x82b   :  { %4596 = vmatprep.subr.bf16.mxu1 %v5693_v11 }
 0x82c   :  { %4582 = vmatpush1.bf16.msra.mxu0 %v5696_v14 }
 0x82d   :  { %4600 = vmatprep.subr.bf16.mxu0 %v5650_v35 }
 0x82e   :  { %4598 = vmatpush1.bf16.msra.mxu1 %v5701_v15 }
 0x82f   :  { %4616 = vmatprep.subr.bf16.mxu1 %v5654_v43 }
 0x8f2   :  { %v1288_v28 = vpop.f32.mrb[12].mxu0 }
 0x8f3   :  { %v1293_v50 = vadd.f32 %v1288_v28, %v5750_v33  ;;  %v1290_v53 = vpop.f32.mrb[13].mxu0 }
 0x8f4   :  { %v1396_v34 = vpop.f32.mrb[12].mxu1  ;;  %v1294_v39 = vadd.f32 %v1290_v53, %v5752_v36 }
 0x8f5   :  { %v4313_v59 = vmul.f32 -1.442695, %v1293_v50  ;;  %v1403_v61 = vrot.slane %v1396_v34, 2  ;;  %v1398_v63 = vpop.f32.mrb[13].mxu1 }
 0x8f6   :  { %v1404_v5 = vrot.slane %v1398_v63, 2  ;;  %v4314_v16 = vmul.f32 -1.442695, %v1294_v39 }
 0x8f7   :  { %5092 = vpow2.f32 %v4313_v59  ;;  %v1407_v2 = vadd.f32 %v1403_v61, %v5744_v27 }
 0x8f8   :  { %v1408_v8 = vadd.f32 %v1404_v5, %v5746_v29 }
 0x8f9   :  { %v4316_v3 = vmul.f32 -1.442695, %v1407_v2 }
 0x8fa   :  { %v4317_v31 = vmul.f32 -1.442695, %v1408_v8 }
 0x8fb   :  { %5094 = vpow2.f32 %v4316_v3 }
 0x8fc   :  { %5096 = vtanh.f32 %v1294_v39 }
 0x901   :  { %v5093_v42 = vpop.eup %5092 }
 0x902   :  { %v1298_v6 = vadd.f32 1.0, %v5093_v42 }
 0x904   :  { %5098 = vrcp.f32 %v1298_v6 }
 0x905   :  { %v5095_v52 = vpop.eup %5094  ;;  %5100 = vtanh.f32 %v1408_v8 }
 0x906   :  { %v1412_v9 = vadd.f32 1.0, %v5095_v52  ;;  %v5097_v56 = vpop.eup %5096 }
 0x908   :  { %5102 = vrcp.f32 %v1412_v9 }
 0x909   :  { %5104 = vpow2.f32 %v4314_v16 }
 0x90a   :  { %5106 = vpow2.f32 %v4317_v31 }
 0x90e   :  { %v5099_v55 = vpop.eup %5098 }
 0x90f   :  { %v1312_v58 = vmul.f32 %v5099_v55, %v5097_v56  ;;  %v1311_v18 = vmul.f32 %v5099_v55, %v1309_v13  ;;  %v5101_v20 = vpop.eup %5100 }
 0x911   :  { %1314 = vrot.lane.b32.xlu0 %v1312_v58, %s5530_s3 }
 0x912   :  { %v5103_v12 = vpop.eup %5102 }
 0x913   :  { %v1426_v24 = vmul.f32 %v5103_v12, %v5101_v20  ;;  %v1425_v26 = vmul.f32 %v5103_v12, %v1423_v23  ;;  %v5105_v32 = vpop.eup %5104 }
 0x914   :  { %v1305_v38 = vadd.f32 1.0, %v5105_v32  ;;  %v5107_v25 = vpop.eup %5106 }
 0x915   :  { %1428 = vrot.lane.b32.xlu1 %v1426_v24, %s5530_s3  ;;  %v1419_v45 = vadd.f32 1.0, %v5107_v25 }
 0x916   :  { %5108 = vrcp.f32 %v1305_v38 }
 0x920   :  { %v5109_v49 = vpop.eup %5108 }
 0x983   :  { %v1315_v41 = vpop.permute.xlu0 %1314 }
 0x984   :  { %v5926_v44 = vadd.f32 %v1315_v41, %v1311_v18 }
 0x986   :  { %5110 = vtanh.f32 %v5926_v44 }
 0x987   :  { %v1429_v30 = vpop.permute.xlu1 %1428  ;;  %5112 = vrcp.f32 %v1419_v45 }
 0x988   :  { %v5929_v46 = vadd.f32 %v1429_v30, %v1425_v26  ;;  %v1530_v26 = vrot.slane %v5926_v44, 6 }
 0x98a   :  { %5114 = vtanh.f32 %v5929_v46  ;;  %v1645_v25 = vrot.slane %v5929_v46, 2 }
 0x990   :  { %v5111_v28 = vpop.eup %5110 }
 0x991   :  { %v1319_v50 = vmul.f32 %v5111_v28, %v5109_v49  ;;  %v5113_v53 = vpop.eup %5112 }
 0x993   :  { %1321 = vrot.lane.b32.xlu0 %v1319_v50, %s5530_s3 }
 0x994   :  { %v5115_v34 = vpop.eup %5114 }
 0x995   :  { %v5933_v59 = vmul.f32 %v5115_v34, %v5113_v53 }
 0x997   :  { %v1547_v61 = vrot.slane %v5933_v59, 6 }
 0x999   :  { %1548 = vrot.lane.b32.xlu1 %v1547_v61, %s5530_s3 }
 0xa05   :  { %v1322_v63 = vpop.permute.xlu0 %1321 }
 0xa06   :  { %1324 = vst.msk [vmem:[#allocation2 + $0x8] sm:$0x3] %vm440_vm2, %v1322_v63  ;;  %4318 = vmatmul.mubr.msk.f32.vlgmr.msra.gmra.mrb[14].mxu0 %vm337_vm3, %v1322_v63 }
 0xa07   :  { %4602 = vmatpush1.bf16.msra.mxu0 %v5652_v40  ;;  %1726 = vmatprep.mubr.f32.mxu0 %v5529_v0 }
 0xa08   :  { %4604 = vmatprep.subr.bf16.mxu0 %v5658_v48 }
 0xa0b   :  { %v1549_v2 = vpop.permute.xlu1 %1548  ;;  %4606 = vmatpush1.bf16.msra.mxu0 %v5665_v54 }
 0xa0c   :  { %4321 = vmatmul.mubr.msk.f32.vlgmr.msra.gmra.mrb[14].mxu1 %vm337_vm3, %v1549_v2  ;;  %4608 = vmatprep.subr.bf16.mxu0 %v5669_v57 }
 0xa0d   :  { %4618 = vmatpush1.bf16.msra.mxu1 %v5656_v47  ;;  %1841 = vmatprep.mubr.f32.mxu1 %v5529_v0 }
 0xa0e   :  { %4620 = vmatprep.subr.bf16.mxu1 %v5662_v51 }
 0xa0f   :  { %4610 = vmatpush1.bf16.msra.mxu0 %v5680_v4 }
 0xa10   :  { %4612 = vmatprep.subr.bf16.mxu0 %v5685_v7 }
 0xa11   :  { %4622 = vmatpush1.bf16.msra.mxu1 %v5673_v60 }
 0xa12   :  { %4624 = vmatprep.subr.bf16.mxu1 %v5677_v1 }
 0xa13   :  { %4614 = vmatpush1.bf16.msra.mxu0 %v5696_v14 }
 0xa14   :  { %4632 = vmatprep.subr.bf16.mxu0 %v5650_v35 }
 0xa15   :  { %4626 = vmatpush1.bf16.msra.mxu1 %v5688_v10 }
 0xa16   :  { %4628 = vmatprep.subr.bf16.mxu1 %v5693_v11 }
 0xa19   :  { %4630 = vmatpush1.bf16.msra.mxu1 %v5701_v15 }
 0xa1a   :  { %4648 = vmatprep.subr.bf16.mxu1 %v5654_v43 }
 0xad9   :  { %v1503_v3 = vpop.f32.mrb[14].mxu0 }
 0xada   :  { %v1510_v39 = vrot.slane %v1503_v3, 6  ;;  %v1505_v5 = vpop.f32.mrb[15].mxu0 }
 0xadb   :  { %v1511_v56 = vrot.slane %v1505_v5, 6 }
 0xadc   :  { %v1514_v42 = vadd.f32 %v1510_v39, %v5750_v33 }
 0xadd   :  { %v1515_v55 = vadd.f32 %v1511_v56, %v5752_v36 }
 0xade   :  { %v4319_v6 = vmul.f32 -1.442695, %v1514_v42 }
 0xadf   :  { %v1618_v8 = vpop.f32.mrb[14].mxu1  ;;  %v4320_v49 = vmul.f32 -1.442695, %v1515_v55 }
 0xae0   :  { %5116 = vpow2.f32 %v4319_v6  ;;  %v1625_v52 = vrot.slane %v1618_v8, 4  ;;  %v1620_v9 = vpop.f32.mrb[15].mxu1 }
 0xae1   :  { %v1626_v18 = vrot.slane %v1620_v9, 4 }
 0xae2   :  { %v1629_v35 = vadd.f32 %v1625_v52, %v5744_v27 }
 0xae3   :  { %v1630_v20 = vadd.f32 %v1626_v18, %v5746_v29 }
 0xae4   :  { %v4322_v13 = vmul.f32 -1.442695, %v1629_v35 }
 0xae5   :  { %v4323_v28 = vmul.f32 -1.442695, %v1630_v20 }
 0xae6   :  { %5118 = vpow2.f32 %v4322_v13 }
 0xae7   :  { %5120 = vtanh.f32 %v1515_v55 }
 0xaea   :  { %v5117_v58 = vpop.eup %5116 }
 0xaeb   :  { %v1519_v43 = vadd.f32 1.0, %v5117_v58 }
 0xaed   :  { %5122 = vrcp.f32 %v1519_v43 }
 0xaee   :  { %5124 = vtanh.f32 %v1630_v20 }
 0xaf0   :  { %v5119_v23 = vpop.eup %5118 }
 0xaf1   :  { %v1634_v12 = vadd.f32 1.0, %v5119_v23  ;;  %v5121_v24 = vpop.eup %5120 }
 0xaf3   :  { %5126 = vrcp.f32 %v1634_v12 }
 0xaf4   :  { %5128 = vpow2.f32 %v4320_v49 }
 0xaf5   :  { %5130 = vpow2.f32 %v4323_v28 }
 0xaf7   :  { %v5123_v16 = vpop.eup %5122 }
 0xaf8   :  { %v1533_v31 = vmul.f32 %v5123_v16, %v5121_v24  ;;  %v1532_v32 = vmul.f32 %v5123_v16, %v1530_v26  ;;  %v5125_v38 = vpop.eup %5124 }
 0xafa   :  { %1535 = vrot.lane.b32.xlu0 %v1533_v31, %s5530_s3 }
 0xafd   :  { %v5127_v41 = vpop.eup %5126 }
 0xafe   :  { %v1648_v45 = vmul.f32 %v5127_v41, %v5125_v38  ;;  %v1647_v30 = vmul.f32 %v5127_v41, %v1645_v25  ;;  %v5129_v50 = vpop.eup %5128 }
 0xaff   :  { %v1526_v53 = vadd.f32 1.0, %v5129_v50  ;;  %v5131_v34 = vpop.eup %5130 }
 0xb00   :  { %1650 = vrot.lane.b32.xlu1 %v1648_v45, %s5530_s3  ;;  %v1641_v63 = vadd.f32 1.0, %v5131_v34 }
 0xb01   :  { %5132 = vrcp.f32 %v1526_v53 }
 0xb0b   :  { %v5133_v3 = vpop.eup %5132 }
 0xb6c   :  { %v1536_v44 = vpop.permute.xlu0 %1535 }
 0xb6d   :  { %v5966_v61 = vadd.f32 %v1536_v44, %v1532_v32 }
 0xb6f   :  { %5134 = vtanh.f32 %v5966_v61  ;;  %v1755_v20 = vrot.slane %v5966_v61, 6 }
 0xb70   :  { %5136 = vrcp.f32 %v1641_v63 }
 0xb72   :  { %v1651_v46 = vpop.permute.xlu1 %1650 }
 0xb73   :  { %v5969_v2 = vadd.f32 %v1651_v46, %v1647_v30 }
 0xb75   :  { %5138 = vtanh.f32 %v5969_v2  ;;  %v1870_v16 = vrot.slane %v5969_v2, 2 }
 0xb79   :  { %v5135_v39 = vpop.eup %5134 }
 0xb7a   :  { %v5972_v5 = vmul.f32 %v5135_v39, %v5133_v3  ;;  %v5137_v6 = vpop.eup %5136 }
 0xb7c   :  { %v1657_v42 = vrot.slane %v5972_v5, 2 }
 0xb7e   :  { %1658 = vrot.lane.b32.xlu0 %v1657_v42, %s5530_s3 }
 0xb7f   :  { %v5139_v8 = vpop.eup %5138 }
 0xb80   :  { %v5976_v52 = vmul.f32 %v5139_v8, %v5137_v6 }
 0xb82   :  { %v1772_v9 = vrot.slane %v5976_v52, 4 }
 0xb84   :  { %1773 = vrot.lane.b32.xlu1 %v1772_v9, %s5530_s3 }
 0xbf0   :  { %v1659_v35 = vpop.permute.xlu0 %1658 }
 0xbf1   :  { %4324 = vmatmul.mubr.msk.f32.vlgmr.msra.gmra.mrb[16].mxu0 %vm337_vm3, %v1659_v35  ;;  %v2104_v35 = vld [vmem:[#allocation9 + $0x8] sm:$0xff] }
 0xbf2   :  { %4634 = vmatpush1.bf16.msra.mxu0 %v5652_v40  ;;  %1951 = vmatprep.mubr.f32.mxu0 %v5529_v0 }
 0xbf3   :  { %4636 = vmatprep.subr.bf16.mxu0 %v5658_v48 }
 0xbf6   :  { %v1774_v56 = vpop.permute.xlu1 %1773  ;;  %4638 = vmatpush1.bf16.msra.mxu0 %v5665_v54 }
 0xbf7   :  { %4327 = vmatmul.mubr.msk.f32.vlgmr.msra.gmra.mrb[16].mxu1 %vm337_vm3, %v1774_v56  ;;  %4640 = vmatprep.subr.bf16.mxu0 %v5669_v57  ;;  %v2106_v56 = vld [vmem:[#allocation9 + $0x18] sm:$0xff] }
 0xbf8   :  { %4650 = vmatpush1.bf16.msra.mxu1 %v5656_v47  ;;  %2066 = vmatprep.mubr.f32.mxu1 %v5529_v0 }
 0xbf9   :  { %4652 = vmatprep.subr.bf16.mxu1 %v5662_v51 }
 0xbfa   :  { %4642 = vmatpush1.bf16.msra.mxu0 %v5680_v4 }
 0xbfb   :  { %4644 = vmatprep.subr.bf16.mxu0 %v5685_v7 }
 0xbfc   :  { %4654 = vmatpush1.bf16.msra.mxu1 %v5673_v60 }
 0xbfd   :  { %4656 = vmatprep.subr.bf16.mxu1 %v5677_v1 }
 0xbfe   :  { %4646 = vmatpush1.bf16.msra.mxu0 %v5696_v14 }
 0xc00   :  { %4658 = vmatpush1.bf16.msra.mxu1 %v5688_v10 }
 0xc01   :  { %4660 = vmatprep.subr.bf16.mxu1 %v5693_v11 }
 0xc04   :  { %4662 = vmatpush1.bf16.msra.mxu1 %v5701_v15 }
 0xcc4   :  { %v1728_v40 = vpop.f32.mrb[16].mxu0 }
 0xcc5   :  { %v1735_v47 = vrot.slane %v1728_v40, 4  ;;  %v1730_v48 = vpop.f32.mrb[17].mxu0  ;;  %v2226_v40 = vld [vmem:[#allocation9 + $0x108] sm:$0xff] }
 0xcc6   :  { %v1736_v7 = vrot.slane %v1730_v48, 4  ;;  %v2228_v48 = vld [vmem:[#allocation9 + $0x118] sm:$0xff] }
 0xcc7   :  { %v1739_v51 = vadd.f32 %v1735_v47, %v5750_v33  ;;  %v4663_v47 = vpack.c.bf16 %v2106_v56, %v2104_v35  ;;  %v2233_v35 = vld [vmem:[#allocation9 + $0x140] sm:$0xff]  ;;  %v2235_v56 = vld [vmem:[#allocation9 + $0x150] sm:$0xff] }
 0xcc8   :  { %v1740_v10 = vadd.f32 %v1736_v7, %v5752_v36  ;;  %v2108_v7 = vld [vmem:[#allocation9 + $0x28] sm:$0xff] }
 0xcc9   :  { %v4325_v54 = vmul.f32 -1.442695, %v1739_v51  ;;  %v2103_v51 = vld [vmem:[#allocation9] sm:$0xff]  ;;  %4664 = vmatprep.subr.bf16.mxu0 %v4663_v47  ;;  %v2118_v47 = vld [vmem:[#allocation9 + $0x78] sm:$0xff] }
 0xcca   :  { %v1843_v57 = vpop.f32.mrb[16].mxu1  ;;  %v4326_v25 = vmul.f32 -1.442695, %v1740_v10 }
 0xccb   :  { %5140 = vpow2.f32 %v4325_v54  ;;  %v1850_v4 = vrot.slane %v1843_v57, 6  ;;  %v1845_v60 = vpop.f32.mrb[17].mxu1  ;;  %v2105_v54 = vld [vmem:[#allocation9 + $0x10] sm:$0xff]  ;;  %v4695_v57 = vpack.c.bf16 %v2228_v48, %v2226_v40  ;;  %v2116_v40 = vld [vmem:[#allocation9 + $0x68] sm:$0xff] }
 0xccc   :  { %v1851_v13 = vrot.slane %v1845_v60, 6  ;;  %v2225_v60 = vld [vmem:[#allocation9 + $0x100] sm:$0xff]  ;;  %v2238_v48 = vld [vmem:[#allocation9 + $0x168] sm:$0xff] }
 0xccd   :  { %v1854_v1 = vadd.f32 %v1850_v4, %v5744_v27  ;;  %v4665_v4 = vpack.c.bf16 %v2105_v54, %v2103_v51  ;;  %4696 = vmatprep.subr.bf16.mxu1 %v4695_v57  ;;  %v4675_v51 = vpack.c.bf16 %v2118_v47, %v2116_v40  ;;  %v2240_v54 = vld [vmem:[#allocation9 + $0x178] sm:$0xff]  ;;  %v2115_v57 = vld [vmem:[#allocation9 + $0x60] sm:$0xff] }
 0xcce   :  { %v1855_v55 = vadd.f32 %v1851_v13, %v5746_v29  ;;  %v2252_v40 = vld [vmem:[#allocation9 + $0x1d8] sm:$0xff]  ;;  %v2127_v47 = vld [vmem:[#allocation9 + $0xc0] sm:$0xff] }
 0xccf   :  { %v4328_v14 = vmul.f32 -1.442695, %v1854_v1  ;;  %v2227_v1 = vld [vmem:[#allocation9 + $0x110] sm:$0xff] }
 0xcd0   :  { %v4329_v41 = vmul.f32 -1.442695, %v1855_v55 }
 0xcd1   :  { %5142 = vpow2.f32 %v4328_v14  ;;  %v4697_v14 = vpack.c.bf16 %v2227_v1, %v2225_v60  ;;  %v4707_v60 = vpack.c.bf16 %v2240_v54, %v2238_v48  ;;  %v2129_v48 = vld [vmem:[#allocation9 + $0xd0] sm:$0xff] }
 0xcd2   :  { %5144 = vtanh.f32 %v1740_v10  ;;  %v2110_v10 = vld [vmem:[#allocation9 + $0x38] sm:$0xff]  ;;  %v4689_v54 = vpack.c.bf16 %v2129_v48, %v2127_v47  ;;  %v2370_v48 = vld [vmem:[#allocation11 + $0xb0] sm:$0xff] }
 0xcd5   :  { %v5141_v11 = vpop.eup %5140 }
 0xcd6   :  { %v1744_v15 = vadd.f32 1.0, %v5141_v11  ;;  %v4667_v11 = vpack.c.bf16 %v2110_v10, %v2108_v7  ;;  %v2237_v7 = vld [vmem:[#allocation9 + $0x160] sm:$0xff] }
 0xcd8   :  { %5146 = vrcp.f32 %v1744_v15 }
 0xcd9   :  { %5148 = vtanh.f32 %v1855_v55 }
 0xcdb   :  { %v5143_v58 = vpop.eup %5142 }
 0xcdc   :  { %v1859_v18 = vadd.f32 1.0, %v5143_v58  ;;  %v5145_v43 = vpop.eup %5144 }
 0xcde   :  { %5150 = vrcp.f32 %v1859_v18 }
 0xcdf   :  { %5152 = vpow2.f32 %v4326_v25  ;;  %v2107_v25 = vld [vmem:[#allocation9 + $0x20] sm:$0xff] }
 0xce0   :  { %5154 = vpow2.f32 %v4329_v41  ;;  %v2109_v41 = vld [vmem:[#allocation9 + $0x30] sm:$0xff] }
 0xce2   :  { %v5147_v23 = vpop.eup %5146 }
 0xce3   :  { %v1758_v12 = vmul.f32 %v5147_v23, %v5145_v43  ;;  %v1757_v24 = vmul.f32 %v5147_v23, %v1755_v20  ;;  %v5149_v26 = vpop.eup %5148 }
 0xce5   :  { %1760 = vrot.lane.b32.xlu0 %v1758_v12, %s5530_s3 }
 0xce8   :  { %v5151_v31 = vpop.eup %5150 }
 0xce9   :  { %v1873_v32 = vmul.f32 %v5151_v31, %v5149_v26  ;;  %v1872_v38 = vmul.f32 %v5151_v31, %v1870_v16  ;;  %v5153_v45 = vpop.eup %5152  ;;  %v2230_v16 = vld [vmem:[#allocation9 + $0x128] sm:$0xff]  ;;  %v2232_v31 = vld [vmem:[#allocation9 + $0x138] sm:$0xff] }
 0xcea   :  { %v1751_v30 = vadd.f32 1.0, %v5153_v45  ;;  %v5155_v28 = vpop.eup %5154  ;;  %v2229_v45 = vld [vmem:[#allocation9 + $0x120] sm:$0xff] }
 0xceb   :  { %1875 = vrot.lane.b32.xlu1 %v1873_v32, %s5530_s3  ;;  %v1866_v53 = vadd.f32 1.0, %v5155_v28 }
 0xcec   :  { %5156 = vrcp.f32 %v1751_v30  ;;  %v4669_v30 = vpack.c.bf16 %v2109_v41, %v2107_v25 }
 0xcf6   :  { %v5157_v61 = vpop.eup %5156 }
 0xd57   :  { %v1761_v49 = vpop.permute.xlu0 %1760 }
 0xd58   :  { %v6006_v50 = vadd.f32 %v1761_v49, %v1757_v24  ;;  %v2231_v49 = vld [vmem:[#allocation9 + $0x130] sm:$0xff] }
 0xd59   :  { %v4701_v28 = vpack.c.bf16 %v2231_v49, %v2229_v45  ;;  %v2124_v45 = vld [vmem:[#allocation9 + $0xa8] sm:$0xff] }
 0xd5a   :  { %5158 = vtanh.f32 %v6006_v50 }
 0xd5b   :  { %5160 = vrcp.f32 %v1866_v53  ;;  %v2114_v53 = vld [vmem:[#allocation9 + $0x58] sm:$0xff] }
 0xd5d   :  { %v1876_v44 = vpop.permute.xlu1 %1875 }
 0xd5e   :  { %v6009_v34 = vadd.f32 %v1876_v44, %v1872_v38  ;;  %v4699_v38 = vpack.c.bf16 %v2232_v31, %v2230_v16  ;;  %v2234_v44 = vld [vmem:[#allocation9 + $0x148] sm:$0xff]  ;;  %v2241_v31 = vld [vmem:[#allocation9 + $0x180] sm:$0xff] }
 0xd60   :  { %5162 = vtanh.f32 %v6009_v34  ;;  %v2089_v49 = vrot.slane %v6009_v34, 2  ;;  %v2128_v34 = vld [vmem:[#allocation9 + $0xc8] sm:$0xff] }
 0xd64   :  { %v5159_v63 = vpop.eup %5158 }
 0xd65   :  { %v6012_v46 = vmul.f32 %v5159_v63, %v5157_v61  ;;  %v5161_v3 = vpop.eup %5160 }
 0xd67   :  { %v1882_v2 = vrot.slane %v6012_v46, 4 }
 0xd69   :  { %1883 = vrot.lane.b32.xlu0 %v1882_v2, %s5530_s3  ;;  %v2236_v2 = vld [vmem:[#allocation9 + $0x158] sm:$0xff] }
 0xd6a   :  { %v5163_v39 = vpop.eup %5162 }
 0xd6b   :  { %v6016_v42 = vmul.f32 %v5163_v39, %v5161_v3  ;;  %v2111_v3 = vld [vmem:[#allocation9 + $0x40] sm:$0xff]  ;;  %v2113_v39 = vld [vmem:[#allocation9 + $0x50] sm:$0xff] }
 0xd6d   :  { %v1997_v6 = vrot.slane %v6016_v42, 2 }
 0xd6f   :  { %1998 = vrot.lane.b32.xlu1 %v1997_v6, %s5530_s3 }
 0xddb   :  { %v1884_v8 = vpop.permute.xlu0 %1883 }
 0xddc   :  { %4330 = vmatmul.mubr.msk.f32.vlgmr.msra.gmra.mrb[18].mxu0 %vm337_vm3, %v1884_v8  ;;  %v4703_v8 = vpack.c.bf16 %v2236_v2, %v2234_v44  ;;  %v2125_v44 = vld [vmem:[#allocation9 + $0xb0] sm:$0xff] }
 0xddd   :  { %2211 = vmatprep.mubr.f32.mxu0 %v5529_v0  ;;  %4666 = vmatpush1.bf16.msra.mxu0 %v4665_v4  ;;  %v2117_v4 = vld [vmem:[#allocation9 + $0x70] sm:$0xff] }
 0xdde   :  { %4668 = vmatprep.subr.bf16.mxu0 %v4667_v11  ;;  %v4677_v1 = vpack.c.bf16 %v2117_v4, %v2115_v57  ;;  %v2120_v11 = vld [vmem:[#allocation9 + $0x88] sm:$0xff]  ;;  %v2249_v57 = vld [vmem:[#allocation9 + $0x1c0] sm:$0xff]  ;;  %v2251_v4 = vld [vmem:[#allocation9 + $0x1d0] sm:$0xff] }
 0xde1   :  { %v1999_v9 = vpop.permute.xlu1 %1998  ;;  %4670 = vmatpush1.bf16.msra.mxu0 %v4669_v30 }
 0xde2   :  { %4333 = vmatmul.mubr.msk.f32.vlgmr.msra.gmra.mrb[18].mxu1 %vm337_vm3, %v1999_v9  ;;  %v4673_v9 = vpack.c.bf16 %v2113_v39, %v2111_v3  ;;  %v2245_v3 = vld [vmem:[#allocation9 + $0x1a0] sm:$0xff]  ;;  %v2247_v39 = vld [vmem:[#allocation9 + $0x1b0] sm:$0xff] }
 0xde3   :  { %2334 = vmatprep.mubr.f32.mxu1 %v5529_v0  ;;  %4698 = vmatpush1.bf16.msra.mxu1 %v4697_v14  ;;  %v2239_v14 = vld [vmem:[#allocation9 + $0x170] sm:$0xff] }
 0xde4   :  { %4700 = vmatprep.subr.bf16.mxu1 %v4699_v38  ;;  %v4709_v10 = vpack.c.bf16 %v2239_v14, %v2237_v7  ;;  %v2134_v7 = vld [vmem:[#allocation9 + $0xf8] sm:$0xff]  ;;  %v2254_v14 = vld [vmem:[#allocation9 + $0x1e8] sm:$0xff] }
 0xde7   :  { %4702 = vmatpush1.bf16.msra.mxu1 %v4701_v28 }
 0xde8   :  { %4704 = vmatprep.subr.bf16.mxu1 %v4703_v8 }
 0xeaf   :  { %v1953_v13 = vpop.f32.mrb[18].mxu0 }
 0xeb0   :  { %v1960_v15 = vrot.slane %v1953_v13, 2  ;;  %v1955_v55 = vpop.f32.mrb[19].mxu0  ;;  %v2122_v13 = vld [vmem:[#allocation9 + $0x98] sm:$0xff] }
 0xeb1   :  { %v1961_v24 = vrot.slane %v1955_v55, 2 }
 0xeb2   :  { %v1964_v58 = vadd.f32 %v1960_v15, %v5750_v33  ;;  %v2242_v15 = vld [vmem:[#allocation9 + $0x188] sm:$0xff] }
 0xeb3   :  { %v6027_v26 = vadd.f32 %v1961_v24, %v5752_v36  ;;  %v2112_v36 = vld [vmem:[#allocation9 + $0x48] sm:$0xff] }
 0xeb4   :  { %v4331_v18 = vmul.f32 -1.442695, %v1964_v58  ;;  %v4671_v63 = vpack.c.bf16 %v2114_v53, %v2112_v36  ;;  %v1980_v58 = vrot.slane %v6006_v50, 6  ;;  %v2246_v50 = vld [vmem:[#allocation9 + $0x1a8] sm:$0xff]  ;;  %v2248_v36 = vld [vmem:[#allocation9 + $0x1b8] sm:$0xff]  ;;  %v2123_v53 = vld [vmem:[#allocation9 + $0xa0] sm:$0xff] }
 0xeb5   :  { %v2068_v43 = vpop.f32.mrb[18].mxu1  ;;  %v4685_v2 = vpack.c.bf16 %v2125_v44, %v2123_v53 }
 0xeb6   :  { %5164 = vpow2.f32 %v4331_v18  ;;  %v2073_v20 = vadd.f32 %v2068_v43, %v5744_v27  ;;  %v2070_v23 = vpop.f32.mrb[19].mxu1  ;;  %4672 = vmatprep.subr.bf16.mxu0 %v4671_v63  ;;  %v4679_v18 = vpack.c.bf16 %v2122_v13, %v2120_v11  ;;  %v2244_v43 = vld [vmem:[#allocation9 + $0x198] sm:$0xff]  ;;  %v4715_v63 = vpack.c.bf16 %v2248_v36, %v2246_v50  ;;  %v2131_v11 = vld [vmem:[#allocation9 + $0xe0] sm:$0xff]  ;;  %v2133_v13 = vld [vmem:[#allocation9 + $0xf0] sm:$0xff] }
 0xeb7   :  { %v6031_v27 = vadd.f32 %v2070_v23, %v5746_v29  ;;  %v4705_v29 = vpack.c.bf16 %v2235_v56, %v2233_v35  ;;  %4674 = vmatpush1.bf16.msra.mxu0 %v4673_v9  ;;  %v2121_v23 = vld [vmem:[#allocation9 + $0x90] sm:$0xff]  ;;  %v4711_v24 = vpack.c.bf16 %v2244_v43, %v2242_v15  ;;  %v4717_v9 = vpack.c.bf16 %v2247_v39, %v2245_v3  ;;  %v2130_v35 = vld [vmem:[#allocation9 + $0xd8] sm:$0xff]  ;;  %v2250_v56 = vld [vmem:[#allocation9 + $0x1c8] sm:$0xff] }
 0xeb8   :  { %v4334_v12 = vmul.f32 -1.442695, %v2073_v20  ;;  %4676 = vmatprep.subr.bf16.mxu0 %v4675_v51  ;;  %v2119_v20 = vld [vmem:[#allocation9 + $0x80] sm:$0xff]  ;;  %v4719_v51 = vpack.c.bf16 %v2252_v40, %v2250_v56  ;;  %v2352_v3 = vld [vmem:[#allocation11 + $0x28] sm:$0xff]  ;;  %v2354_v39 = vld [vmem:[#allocation11 + $0x38] sm:$0xff] }
 0xeb9   :  { %4706 = vmatpush1.bf16.msra.mxu1 %v4705_v29  ;;  %v4681_v16 = vpack.c.bf16 %v2121_v23, %v2119_v20  ;;  %v4687_v29 = vpack.c.bf16 %v2130_v35, %v2128_v34  ;;  %v2350_v20 = vld [vmem:[#allocation11 + $0x18] sm:$0xff]  ;;  %v2365_v23 = vld [vmem:[#allocation11 + $0x88] sm:$0xff]  ;;  %v2351_v35 = vld [vmem:[#allocation11 + $0x20] sm:$0xff]  ;;  %v6079_v40 = vpack.c.bf16 %v2354_v39, %v2352_v3 }
 0xeba   :  { %5166 = vpow2.f32 %v4334_v12  ;;  %4708 = vmatprep.subr.bf16.mxu1 %v4707_v60  ;;  %v4721_v60 = vpack.c.bf16 %v2251_v4, %v2249_v57  ;;  %v2353_v56 = vld [vmem:[#allocation11 + $0x30] sm:$0xff]  ;;  %v2373_v4 = vld [vmem:[#allocation11 + $0xc8] sm:$0xff] }
 0xebb   :  { %5168 = vtanh.f32 %v6027_v26  ;;  %4678 = vmatpush1.bf16.msra.mxu0 %v4677_v1  ;;  %v2132_v1 = vld [vmem:[#allocation9 + $0xe8] sm:$0xff] }
 0xebc   :  { %4680 = vmatprep.subr.bf16.mxu0 %v4679_v18  ;;  %v2255_v18 = vld [vmem:[#allocation9 + $0x1f0] sm:$0xff] }
 0xebd   :  { %4710 = vmatpush1.bf16.msra.mxu1 %v4709_v10  ;;  %v4691_v10 = vpack.c.bf16 %v2134_v7, %v2132_v1  ;;  %v6085_v1 = vpack.c.bf16 %v2353_v56, %v2351_v35 }
 0xebe   :  { %4712 = vmatprep.subr.bf16.mxu1 %v4711_v24 }
 0xebf   :  { %4682 = vmatpush1.bf16.msra.mxu0 %v4681_v16  ;;  %v4332_v16 = vmul.f32 -1.442695, %v6027_v26 }
 0xec0   :  { %v5165_v32 = vpop.eup %5164 }
 0xec1   :  { %v1969_v33 = vadd.f32 1.0, %v5165_v32  ;;  %v2243_v32 = vld [vmem:[#allocation9 + $0x190] sm:$0xff] }
 0xec2   :  { %v4713_v41 = vpack.c.bf16 %v2243_v32, %v2241_v31 }
 0xec3   :  { %5170 = vrcp.f32 %v1969_v33  ;;  %v2126_v33 = vld [vmem:[#allocation9 + $0xb8] sm:$0xff] }
 0xec4   :  { %v5167_v61 = vpop.eup %5166  ;;  %5172 = vtanh.f32 %v6031_v27  ;;  %4714 = vmatpush1.bf16.msra.mxu1 %v4713_v41  ;;  %v4683_v28 = vpack.c.bf16 %v2126_v33, %v2124_v45 }
 0xec5   :  { %v2078_v6 = vadd.f32 1.0, %v5167_v61  ;;  %v5169_v55 = vpop.eup %5168  ;;  %4716 = vmatprep.subr.bf16.mxu1 %v4715_v63  ;;  %v2349_v63 = vld [vmem:[#allocation11 + $0x10] sm:$0xff] }
 0xec6   :  { %4684 = vmatprep.subr.bf16.mxu0 %v4683_v28 }
 0xec7   :  { %5174 = vrcp.f32 %v2078_v6  ;;  %4686 = vmatpush1.bf16.msra.mxu0 %v4685_v2  ;;  %v2364_v2 = vld [vmem:[#allocation11 + $0x80] sm:$0xff] }
 0xec8   :  { %4718 = vmatpush1.bf16.msra.mxu1 %v4717_v9  ;;  %4688 = vmatprep.subr.bf16.mxu0 %v4687_v29  ;;  %5176 = vpow2.f32 %v4332_v16  ;;  %v2368_v29 = vld [vmem:[#allocation11 + $0xa0] sm:$0xff] }
 0xec9   :  { %4720 = vmatprep.subr.bf16.mxu1 %v4719_v51  ;;  %v2356_v51 = vld [vmem:[#allocation11 + $0x48] sm:$0xff]  ;;  %v6087_v7 = vpack.c.bf16 %v2370_v48, %v2368_v29 }
 0xecb   :  { %4690 = vmatpush1.bf16.msra.mxu0 %v4689_v54  ;;  %v2358_v54 = vld [vmem:[#allocation11 + $0x58] sm:$0xff] }
 0xecc   :  { %4722 = vmatpush1.bf16.msra.mxu1 %v4721_v60  ;;  %4692 = vmatprep.subr.bf16.mxu0 %v4691_v10  ;;  %v2375_v60 = vld [vmem:[#allocation11 + $0xd8] sm:$0xff]  ;;  %v2357_v10 = vld [vmem:[#allocation11 + $0x50] sm:$0xff] }
 0xecd   :  { %v5171_v12 = vpop.eup %5170 }
 0xece   :  { %v1983_v38 = vmul.f32 %v5171_v12, %v5169_v55  ;;  %v6035_v25 = vmul.f32 %v5171_v12, %v1980_v58  ;;  %v5173_v30 = vpop.eup %5172  ;;  %v4693_v55 = vpack.c.bf16 %v2133_v13, %v2131_v11  ;;  %v2253_v58 = vld [vmem:[#allocation9 + $0x1e0] sm:$0xff]  ;;  %v2367_v12 = vld [vmem:[#allocation11 + $0x98] sm:$0xff]  ;;  %v6093_v11 = vpack.c.bf16 %v2375_v60, %v2373_v4 }
 0xecf   :  { %v4725_v43 = vpack.c.bf16 %v2255_v18, %v2253_v58  ;;  %v6054_v24 = vpack.c.bf16 %v2367_v12, %v2365_v23  ;;  %v2372_v13 = vld [vmem:[#allocation11 + $0xc0] sm:$0xff]  ;;  %v2362_v58 = vld [vmem:[#allocation11 + $0x78] sm:$0xff]  ;;  %v2377_v18 = vld [vmem:[#allocation11 + $0xe8] sm:$0xff] }
 0xed0   :  { %1985 = vrot.lane.b32.xlu0 %v1983_v38, %s5530_s3  ;;  %4694 = vmatpush1.bf16.msra.mxu0 %v4693_v55  ;;  %v2360_v55 = vld [vmem:[#allocation11 + $0x68] sm:$0xff]  ;;  %v2359_v23 = vld [vmem:[#allocation11 + $0x60] sm:$0xff] }
 0xed1   :  { %v5175_v61 = vpop.eup %5174  ;;  %v6105_v12 = vpack.c.bf16 %v2362_v58, %v2360_v55 }
 0xed2   :  { %v2092_v6 = vmul.f32 %v5175_v61, %v5173_v30  ;;  %v6039_v8 = vmul.f32 %v5175_v61, %v2089_v49 }
 0xed4   :  { %652 = vrot.lane.b32.xlu0 %v5812_v62, %s5530_s3  ;;  %2094 = vrot.lane.b32.xlu1 %v2092_v6, %s5530_s3  ;;  %v2256_v62 = vld [vmem:[#allocation9 + $0x1f8] sm:$0xff]  ;;  %v2369_v6 = vld [vmem:[#allocation11 + $0xa8] sm:$0xff] }
 0xed5   :  { %v4723_v15 = vpack.c.bf16 %v2256_v62, %v2254_v14  ;;  %v2355_v14 = vld [vmem:[#allocation11 + $0x40] sm:$0xff]  ;;  %v6091_v62 = vpack.c.bf16 %v2358_v54, %v2356_v51 }
 0xed7   :  { %4724 = vmatprep.subr.bf16.mxu1 %v4723_v15  ;;  %v2374_v15 = vld [vmem:[#allocation11 + $0xd0] sm:$0xff] }
 0xed8   :  { %1106 = vrot.lane.b32.xlu0 %v5892_v37, %s5530_s3  ;;  %879 = vrot.lane.b32.xlu1 %v5852_v22, %s5530_s3  ;;  %v2348_v37 = vld [vmem:[#allocation11 + $0x8] sm:$0xff] }
 0xed9   :  { %4726 = vmatpush1.bf16.msra.mxu1 %v4725_v43  ;;  %v6052_v22 = vpack.c.bf16 %v2350_v20, %v2348_v37  ;;  %v2379_v43 = vld [vmem:[#allocation11 + $0xf8] sm:$0xff]  ;;  %v6099_v37 = vpack.c.bf16 %v2357_v10, %v2355_v14  ;;  %v6101_v20 = vpack.c.bf16 %v2374_v15, %v2372_v13 }
 0xeda   :  { %4744 = vmatprep.subr.bf16.mxu1 %v6054_v24  ;;  %v6107_v16 = vpack.c.bf16 %v2379_v43, %v2377_v18 }
 0xedb   :  { %4728 = vmatprep.subr.bf16.mxu0 %v6052_v22 }
 0xedc   :  { %1767 = vrot.lane.b32.xlu0 %v6012_v46, %s5530_s3  ;;  %1542 = vrot.lane.b32.xlu1 %v5972_v5, %s5530_s3  ;;  %v4335_v46 = vmul.f32 -1.442695, %v6031_v27  ;;  %v5177_v5 = vpop.eup %5176 }
 0xedd   :  { %v1976_v31 = vadd.f32 1.0, %v5177_v5  ;;  %v2376_v5 = vld [vmem:[#allocation11 + $0xe0] sm:$0xff] }
 0xede   :  { %5178 = vpow2.f32 %v4335_v46  ;;  %v2361_v46 = vld [vmem:[#allocation11 + $0x70] sm:$0xff] }
 0xedf   :  { %5180 = vrcp.f32 %v1976_v31  ;;  %v2378_v31 = vld [vmem:[#allocation11 + $0xf0] sm:$0xff] }
 0xee8   :  { %v5179_v32 = vpop.eup %5178 }
 0xee9   :  { %v2085_v45 = vadd.f32 1.0, %v5179_v32  ;;  %v6111_v32 = vpack.c.bf16 %v2361_v46, %v2359_v23 }
 0xf42   :  { %v1986_v38 = vpop.permute.xlu0 %1985 }
 0xf43   :  { %v1988_v41 = vadd.f32 %v1986_v38, %v6035_v25  ;;  %v5181_v25 = vpop.eup %5180  ;;  %v6113_v38 = vpack.c.bf16 %v2378_v31, %v2376_v5 }
 0xf45   :  { %5182 = vtanh.f32 %v1988_v41 }
 0xf46   :  { %v653_v33 = vpop.permute.xlu0 %652  ;;  %v2095_v50 = vpop.permute.xlu1 %2094  ;;  %5184 = vrcp.f32 %v2085_v45 }
 0xf47   :  { %656 = vst.msk [vmem:[#allocation2] sm:$0xc] %vm655_vm7, %v653_v33  ;;  %v2097_v26 = vadd.f32 %v2095_v50, %v6039_v8  ;;  %v2371_v8 = vld [vmem:[#allocation11 + $0xb8] sm:$0xff] }
 0xf48   :  { %1881 = vst.msk [vmem:[#allocation2] sm:$0xc] %vm994_vm5, %v6016_v42  ;;  %v6081_v47 = vpack.c.bf16 %v2371_v8, %v2369_v6 }
 0xf49   :  { %5186 = vtanh.f32 %v2097_v26 }
 0xf4a   :  { %v1107_v27 = vpop.permute.xlu0 %1106  ;;  %v880_v30 = vpop.permute.xlu1 %879 }
 0xf4b   :  { %1110 = vst.msk [vmem:[#allocation2] sm:$0xc0] %vm1109_vm8, %v1107_v27 }
 0xf4c   :  { %883 = vst.msk [vmem:[#allocation2] sm:$0x30] %vm882_vm9, %v880_v30  ;;  %v2135_v30 = vld [vmem:[%s6500_s6] sm:$0x3] }
 0xf4d   :  { %1434 = vst.msk [vmem:[#allocation2] sm:$0xc0] %vm543_vm1, %v5933_v59  ;;  %v2347_v59 = vld [vmem:[#allocation11] sm:$0xff]  ;;  %v6173_v29 = vrot.slane %v2135_v30, %v5737_v21 }
 0xf4e   :  { %1656 = vst.msk [vmem:[#allocation2] sm:$0x30] %vm767_vm4, %v5976_v52  ;;  %v1768_v49 = vpop.permute.xlu0 %1767  ;;  %v1543_v28 = vpop.permute.xlu1 %1542  ;;  %v2366_v52 = vld [vmem:[#allocation11 + $0x90] sm:$0xff]  ;;  %v6075_v9 = vpack.c.bf16 %v2349_v63, %v2347_v59 }
 0xf4f   :  { %v5183_v36 = vpop.eup %5182  ;;  %1770 = vst.msk [vmem:[#allocation2 + $0x8] sm:$0x30] %vm882_vm9, %v1768_v49  ;;  %v6077_v34 = vpack.c.bf16 %v2366_v52, %v2364_v2  ;;  %v4336_v49 = vld [vmem:[%s6500_s6 + $0x2] sm:$0x3]  ;;  %s5532_s6 = smov [#allocation12]  }
 0xf50   :  { %1545 = vst.msk [vmem:[#allocation2 + $0x8] sm:$0xc] %vm655_vm7, %v1543_v28  ;;  %v1990_v42 = vmul.f32 %v5183_v36, %v5181_v25  ;;  %v5185_v53 = vpop.eup %5184  ;;  %v6152_v25 = vrot.slane %v2135_v30, %v5734_v19  ;;  %v6179_v48 = vrot.slane %v4336_v49, %v5737_v21  ;;  %s4271_s26 = sshll.u32 %s5532_s6, 4  ;;  %s4272_s26 = int_to_ptr.vmem [resolvable:$true] %s4271_s26 }
 0xf51   :  { %s5490_s1 = scalar_lea.vmem %s4272_s26, 256  ;;  %p5495_p13 = scmp.lt.s32.totalorder %s4272_s26, %s4272_s26 }
 0xf52   :  { %1992 = vrot.lane.b32.xlu1 %v1990_v42, %s5530_s3  ;;  %p5491_p12 = scmp.ne.s32.totalorder %s4272_s26, %s5490_s1  ;;  %p5496_p0 = scmp.lt.s32.totalorder %s5490_s1, %s5490_s1 }
 0xf53   :  { %v5187_v44 = vpop.eup %5186 }
 0xf54   :  { %v2099_v61 = vmul.f32 %v5187_v44, %v5185_v53  ;;  %p5497_p1 = por %p5496_p0, %p5495_p13 }
 0xf56   :  { %2100 = vst.msk [vmem:[#allocation2] sm:$0x3] %vm1215_vm6, %v2099_v61  ;;  %v6165_v61 = vrot.slane %v4336_v49, %v5734_v19  ;;  %p5498_p2 = pnand %p5497_p1, %p5491_p12 }
 0xf5d   :  { %v2101_v57 = vld [vmem:[#allocation2] sm:$0xff] }
 0xf5e   :  { %2212 = vmatmul.mubr.f32.vlgmr.msra.gmra.mrb[20].mxu0 %v2101_v57  ;;  %2335 = vmatmul.mubr.f32.vlgmr.msra.gmra.mrb[20].mxu1 %v2101_v57 }
 0xf5f   :  { %4730 = vmatpush1.bf16.msra.mxu0 %v6075_v9  ;;  %4746 = vmatpush1.bf16.msra.mxu1 %v6077_v34 }
 0xf60   :  { %4732 = vmatprep.subr.bf16.mxu0 %v6079_v40  ;;  %4748 = vmatprep.subr.bf16.mxu1 %v6081_v47 }
 0xf61   :  { %2217 = vmatprep.mubr.f32.mxu0 %v5529_v0  ;;  %2340 = vmatprep.mubr.f32.mxu1 %v5529_v0 }
 0xf63   :  { %4734 = vmatpush1.bf16.msra.mxu0 %v6085_v1  ;;  %4750 = vmatpush1.bf16.msra.mxu1 %v6087_v7 }
 0xf64   :  { %4736 = vmatprep.subr.bf16.mxu0 %v6091_v62  ;;  %4752 = vmatprep.subr.bf16.mxu1 %v6093_v11 }
 0xf67   :  { %4738 = vmatpush1.bf16.msra.mxu0 %v6099_v37  ;;  %4754 = vmatpush1.bf16.msra.mxu1 %v6101_v20 }
 0xf68   :  { %4740 = vmatprep.subr.bf16.mxu0 %v6105_v12  ;;  %4756 = vmatprep.subr.bf16.mxu1 %v6107_v16 }
 0xf6b   :  { %4742 = vmatpush1.bf16.msra.mxu0 %v6111_v32  ;;  %4758 = vmatpush1.bf16.msra.mxu1 %v6113_v38 }
 0xf6c   :  { %4760 = vmatprep.subr.bf16.mxu0 %v6052_v22  ;;  %4776 = vmatprep.subr.bf16.mxu1 %v6054_v24 }
 0xfc4   :  { %v1993_v41 = vpop.permute.xlu1 %1992 }
 0xfc5   :  { %1995 = vst.msk [vmem:[#allocation2 + $0x8] sm:$0xc0] %vm1109_vm8, %v1993_v41 }
 0xfcc   :  { %v2102_v45 = vld [vmem:[#allocation2 + $0x8] sm:$0xff] }
 0xfcd   :  { %2218 = vmatmul.mubr.f32.gmra.mrb[22].mxu0 %v2102_v45  ;;  %2341 = vmatmul.mubr.f32.gmra.mrb[22].mxu1 %v2102_v45 }
 0xfce   :  { %2444 = vmatprep.mubr.f32.mxu0 %v5529_v0  ;;  %2544 = vmatprep.mubr.f32.mxu1 %v5529_v0 }
 0xfd1   :  { %2445 = vmatmul.mubr.f32.vlgmr.msra.gmra.mrb[24].mxu0 %v5529_v0  ;;  %2545 = vmatmul.mubr.f32.vlgmr.msra.gmra.mrb[24].mxu1 %v5529_v0 }
 0xfd2   :  { %4762 = vmatpush1.bf16.msra.mxu0 %v6075_v9  ;;  %4778 = vmatpush1.bf16.msra.mxu1 %v6077_v34 }
 0xfd3   :  { %4764 = vmatprep.subr.bf16.mxu0 %v6079_v40  ;;  %4780 = vmatprep.subr.bf16.mxu1 %v6081_v47 }
 0xfd4   :  { %2648 = vmatprep.mubr.f32.mxu0 %v5529_v0  ;;  %2763 = vmatprep.mubr.f32.mxu1 %v5529_v0 }
 0xfd6   :  { %4766 = vmatpush1.bf16.msra.mxu0 %v6085_v1  ;;  %4782 = vmatpush1.bf16.msra.mxu1 %v6087_v7 }
 0xfd7   :  { %4768 = vmatprep.subr.bf16.mxu0 %v6091_v62  ;;  %4784 = vmatprep.subr.bf16.mxu1 %v6093_v11 }
 0xfda   :  { %4770 = vmatpush1.bf16.msra.mxu0 %v6099_v37  ;;  %4786 = vmatpush1.bf16.msra.mxu1 %v6101_v20 }
 0xfdb   :  { %4772 = vmatprep.subr.bf16.mxu0 %v6105_v12  ;;  %4788 = vmatprep.subr.bf16.mxu1 %v6107_v16 }
 0xfde   :  { %4774 = vmatpush1.bf16.msra.mxu0 %v6111_v32  ;;  %4790 = vmatpush1.bf16.msra.mxu1 %v6113_v38 }
 0xfdf   :  { %4792 = vmatprep.subr.bf16.mxu0 %v6052_v22  ;;  %4808 = vmatprep.subr.bf16.mxu1 %v6054_v24 }
0x1031   :  { %v2213_v33 = vpop.f32.mrb[20].mxu0  ;;  %v6144_v50 = vpop.f32.mrb[20].mxu1 }
0x1032   :  { %v2215_v26 = vpop.f32.mrb[21].mxu0  ;;  %v6146_v27 = vpop.f32.mrb[21].mxu1  ;;  %v6162_v44 = vadd.f32 %v2213_v33, %v6152_v25 }
0x1033   :  { %v6176_v19 = vadd.f32 %v2215_v26, %v6173_v29 }
0x10a0   :  { %v6157_v28 = vpop.f32.mrb[22].mxu0  ;;  %v2342_v36 = vpop.f32.mrb[22].mxu1 }
0x10a1   :  { %v6159_v42 = vpop.f32.mrb[23].mxu0  ;;  %v2344_v53 = vpop.f32.mrb[23].mxu1  ;;  %v6168_v2 = vadd.f32 %v2342_v36, %v6165_v61 }
0x10a2   :  { %v6182_v54 = vadd.f32 %v2344_v53, %v6179_v48 }
0x10a4   :  { %v2446_v59 = vpop.f32.mrb[24].mxu0  ;;  %v2546_v63 = vpop.f32.mrb[24].mxu1 }
0x10a5   :  { %v2451_v52 = vadd.f32 %v2446_v59, %v6162_v44  ;;  %v2553_v3 = vrot.slane %v2546_v63, 2  ;;  %v2448_v39 = vpop.f32.mrb[25].mxu0  ;;  %v2548_v6 = vpop.f32.mrb[25].mxu1 }
0x10a6   :  { %v2554_v51 = vrot.slane %v2548_v6, 2  ;;  %v2452_v57 = vadd.f32 %v2448_v39, %v6176_v19 }
0x10a7   :  { %v4337_v8 = vmul.f32 -1.442695, %v2451_v52  ;;  %v2557_v35 = vadd.f32 %v2553_v3, %v6168_v2 }
0x10a8   :  { %v2558_v60 = vadd.f32 %v2554_v51, %v6182_v54  ;;  %v4338_v23 = vmul.f32 -1.442695, %v2452_v57 }
0x10a9   :  { %5188 = vpow2.f32 %v4337_v8  ;;  %v4339_v56 = vmul.f32 -1.442695, %v2557_v35 }
0x10aa   :  { %v4340_v46 = vmul.f32 -1.442695, %v2558_v60 }
0x10ab   :  { %5190 = vpow2.f32 %v4339_v56 }
0x10ac   :  { %5192 = vtanh.f32 %v2452_v57 }
0x10b3   :  { %v5189_v4 = vpop.eup %5188 }
0x10b4   :  { %v2456_v14 = vadd.f32 1.0, %v5189_v4 }
0x10b5   :  { %v5191_v10 = vpop.eup %5190 }
0x10b6   :  { %5194 = vrcp.f32 %v2456_v14  ;;  %v2562_v13 = vadd.f32 1.0, %v5191_v10  ;;  %v5193_v15 = vpop.eup %5192 }
0x10b7   :  { %5196 = vtanh.f32 %v2558_v60 }
0x10b8   :  { %5198 = vrcp.f32 %v2562_v13 }
0x10b9   :  { %5200 = vpow2.f32 %v4338_v23 }
0x10ba   :  { %5202 = vpow2.f32 %v4340_v46 }
0x10c0   :  { %v5195_v55 = vpop.eup %5194 }
0x10c1   :  { %v5197_v21 = vpop.eup %5196  ;;  %v2467_v58 = vmul.f32 %v5195_v55, %v5193_v15  ;;  %v2466_v45 = vmul.f32 0.0, %v5195_v55 }
0x10c2   :  { %v5199_v18 = vpop.eup %5198 }
0x10c3   :  { %2469 = vrot.lane.b32.xlu0 %v2467_v58, %s5530_s3  ;;  %v2573_v43 = vmul.f32 %v5199_v18, %v5197_v21  ;;  %v5201_v5 = vpop.eup %5200  ;;  %v2572_v49 = vmul.f32 0.0, %v5199_v18 }
0x10c4   :  { %v5203_v31 = vpop.eup %5202  ;;  %v2463_v41 = vadd.f32 1.0, %v5201_v5 }
0x10c5   :  { %2575 = vrot.lane.b32.xlu1 %v2573_v43, %s5530_s3  ;;  %v2569_v33 = vadd.f32 1.0, %v5203_v31 }
0x10c6   :  { %5204 = vrcp.f32 %v2463_v41 }
0x10d0   :  { %v5205_v59 = vpop.eup %5204 }
0x1135   :  { %v2470_v26 = vpop.permute.xlu0 %2469 }
0x1136   :  { %v6188_v30 = vadd.f32 %v2470_v26, %v2466_v45 }
0x1137   :  { %v2576_v36 = vpop.permute.xlu1 %2575 }
0x1138   :  { %5206 = vtanh.f32 %v6188_v30  ;;  %v6191_v53 = vadd.f32 %v2576_v36, %v2572_v49 }
0x1139   :  { %5208 = vrcp.f32 %v2569_v33  ;;  %v2677_v33 = vrot.slane %v6188_v30, 6 }
0x113a   :  { %5210 = vtanh.f32 %v6191_v53 }
0x1142   :  { %v5207_v63 = vpop.eup %5206 }
0x1143   :  { %v5209_v52 = vpop.eup %5208  ;;  %v2474_v3 = vmul.f32 %v5207_v63, %v5205_v59  ;;  %v2792_v63 = vrot.slane %v6191_v53, 2 }
0x1144   :  { %v5211_v39 = vpop.eup %5210 }
0x1145   :  { %2476 = vrot.lane.b32.xlu0 %v2474_v3, %s5530_s3  ;;  %v2580_v6 = vmul.f32 %v5211_v39, %v5209_v52 }
0x1147   :  { %v2694_v8 = vrot.slane %v2580_v6, 6  ;;  %2581 = vst.msk [vmem:[#allocation2 + $0x8] sm:$0xc0] %vm543_vm1, %v2580_v6 }
0x1149   :  { %2695 = vrot.lane.b32.xlu1 %v2694_v8, %s5530_s3 }
0x11b7   :  { %v2477_v35 = vpop.permute.xlu0 %2476 }
0x11b8   :  { %2479 = vst.msk [vmem:[#allocation2] sm:$0x3] %vm440_vm2, %v2477_v35  ;;  %4341 = vmatmul.mubr.msk.f32.vlgmr.msra.gmra.mrb[26].mxu0 %vm337_vm3, %v2477_v35 }
0x11b9   :  { %4794 = vmatpush1.bf16.msra.mxu0 %v6075_v9  ;;  %2873 = vmatprep.mubr.f32.mxu0 %v5529_v0 }
0x11ba   :  { %4796 = vmatprep.subr.bf16.mxu0 %v6079_v40 }
0x11bb   :  { %v2696_v56 = vpop.permute.xlu1 %2695 }
0x11bc   :  { %4344 = vmatmul.mubr.msk.f32.vlgmr.msra.gmra.mrb[26].mxu1 %vm337_vm3, %v2696_v56 }
0x11bd   :  { %4798 = vmatpush1.bf16.msra.mxu0 %v6085_v1  ;;  %4810 = vmatpush1.bf16.msra.mxu1 %v6077_v34 }
0x11be   :  { %4800 = vmatprep.subr.bf16.mxu0 %v6091_v62  ;;  %4812 = vmatprep.subr.bf16.mxu1 %v6081_v47 }
0x11bf   :  { %2988 = vmatprep.mubr.f32.mxu1 %v5529_v0 }
0x11c1   :  { %4802 = vmatpush1.bf16.msra.mxu0 %v6099_v37  ;;  %4814 = vmatpush1.bf16.msra.mxu1 %v6087_v7 }
0x11c2   :  { %4804 = vmatprep.subr.bf16.mxu0 %v6105_v12  ;;  %4816 = vmatprep.subr.bf16.mxu1 %v6093_v11 }
0x11c5   :  { %4806 = vmatpush1.bf16.msra.mxu0 %v6111_v32  ;;  %4818 = vmatpush1.bf16.msra.mxu1 %v6101_v20 }
0x11c6   :  { %4820 = vmatprep.subr.bf16.mxu1 %v6107_v16  ;;  %4824 = vmatprep.subr.bf16.mxu0 %v6052_v22 }
0x11c9   :  { %4822 = vmatpush1.bf16.msra.mxu1 %v6113_v38 }
0x11ca   :  { %4840 = vmatprep.subr.bf16.mxu1 %v6054_v24 }
0x128b   :  { %v2650_v51 = vpop.f32.mrb[26].mxu0 }
0x128c   :  { %v2657_v57 = vrot.slane %v2650_v51, 6  ;;  %v2652_v4 = vpop.f32.mrb[27].mxu0 }
0x128d   :  { %v2658_v58 = vrot.slane %v2652_v4, 6 }
0x128e   :  { %v2661_v60 = vadd.f32 %v2657_v57, %v6162_v44 }
0x128f   :  { %v2765_v14 = vpop.f32.mrb[26].mxu1  ;;  %v2662_v18 = vadd.f32 %v2658_v58, %v6176_v19 }
0x1290   :  { %v4342_v10 = vmul.f32 -1.442695, %v2661_v60  ;;  %v2772_v13 = vrot.slane %v2765_v14, 4  ;;  %v2767_v15 = vpop.f32.mrb[27].mxu1 }
0x1291   :  { %v2773_v43 = vrot.slane %v2767_v15, 4  ;;  %v4343_v6 = vmul.f32 -1.442695, %v2662_v18 }
0x1292   :  { %5212 = vpow2.f32 %v4342_v10  ;;  %v2776_v55 = vadd.f32 %v2772_v13, %v6168_v2 }
0x1293   :  { %v2777_v5 = vadd.f32 %v2773_v43, %v6182_v54 }
0x1294   :  { %v4345_v21 = vmul.f32 -1.442695, %v2776_v55 }
0x1295   :  { %v4346_v8 = vmul.f32 -1.442695, %v2777_v5 }
0x1296   :  { %5214 = vpow2.f32 %v4345_v21 }
0x1297   :  { %5216 = vtanh.f32 %v2662_v18 }
0x129c   :  { %v5213_v23 = vpop.eup %5212 }
0x129d   :  { %v2666_v46 = vadd.f32 1.0, %v5213_v23 }
0x129f   :  { %5218 = vrcp.f32 %v2666_v46 }
0x12a0   :  { %v5215_v31 = vpop.eup %5214  ;;  %5220 = vtanh.f32 %v2777_v5 }
0x12a1   :  { %v2781_v41 = vadd.f32 1.0, %v5215_v31  ;;  %v5217_v45 = vpop.eup %5216 }
0x12a3   :  { %5222 = vrcp.f32 %v2781_v41 }
0x12a4   :  { %5224 = vpow2.f32 %v4343_v6 }
0x12a5   :  { %5226 = vpow2.f32 %v4346_v8 }
0x12a9   :  { %v5219_v26 = vpop.eup %5218 }
0x12aa   :  { %v2680_v49 = vmul.f32 %v5219_v26, %v5217_v45  ;;  %v2679_v36 = vmul.f32 %v5219_v26, %v2677_v33  ;;  %v5221_v59 = vpop.eup %5220 }
0x12ac   :  { %2682 = vrot.lane.b32.xlu0 %v2680_v49, %s5530_s3 }
0x12ad   :  { %v5223_v52 = vpop.eup %5222 }
0x12ae   :  { %v2795_v3 = vmul.f32 %v5223_v52, %v5221_v59  ;;  %v2794_v39 = vmul.f32 %v5223_v52, %v2792_v63  ;;  %v5225_v35 = vpop.eup %5224 }
0x12af   :  { %v2673_v56 = vadd.f32 1.0, %v5225_v35  ;;  %v5227_v30 = vpop.eup %5226 }
0x12b0   :  { %2797 = vrot.lane.b32.xlu1 %v2795_v3, %s5530_s3  ;;  %v2788_v4 = vadd.f32 1.0, %v5227_v30 }
0x12b1   :  { %5228 = vrcp.f32 %v2673_v56 }
0x12bb   :  { %v5229_v14 = vpop.eup %5228 }
0x131e   :  { %v2683_v51 = vpop.permute.xlu0 %2682 }
0x131f   :  { %v6226_v57 = vadd.f32 %v2683_v51, %v2679_v36 }
0x1321   :  { %5230 = vtanh.f32 %v6226_v57  ;;  %v2902_v51 = vrot.slane %v6226_v57, 6 }
0x1322   :  { %v2798_v53 = vpop.permute.xlu1 %2797  ;;  %5232 = vrcp.f32 %v2788_v4 }
0x1323   :  { %v6229_v60 = vadd.f32 %v2798_v53, %v2794_v39 }
0x1325   :  { %5234 = vtanh.f32 %v6229_v60 }
0x132b   :  { %v5231_v10 = vpop.eup %5230 }
0x132c   :  { %v6232_v13 = vmul.f32 %v5231_v10, %v5229_v14  ;;  %v5233_v15 = vpop.eup %5232 }
0x132e   :  { %v2804_v55 = vrot.slane %v6232_v13, 2 }
0x132f   :  { %v5235_v21 = vpop.eup %5234 }
0x1330   :  { %2805 = vrot.lane.b32.xlu0 %v2804_v55, %s5530_s3  ;;  %v2802_v58 = vmul.f32 %v5235_v21, %v5233_v15  ;;  %v3017_v15 = vrot.slane %v6229_v60, 2 }
0x1332   :  { %v2919_v18 = vrot.slane %v2802_v58, 4  ;;  %2803 = vst.msk [vmem:[#allocation2 + $0x8] sm:$0x30] %vm767_vm4, %v2802_v58 }
0x1334   :  { %2920 = vrot.lane.b32.xlu1 %v2919_v18, %s5530_s3 }
0x13a2   :  { %v2806_v43 = vpop.permute.xlu0 %2805 }
0x13a3   :  { %4347 = vmatmul.mubr.msk.f32.vlgmr.msra.gmra.mrb[28].mxu0 %vm337_vm3, %v2806_v43 }
0x13a4   :  { %4826 = vmatpush1.bf16.msra.mxu0 %v6075_v9  ;;  %3098 = vmatprep.mubr.f32.mxu0 %v5529_v0 }
0x13a5   :  { %4828 = vmatprep.subr.bf16.mxu0 %v6079_v40 }
0x13a6   :  { %v2921_v23 = vpop.permute.xlu1 %2920 }
0x13a7   :  { %4350 = vmatmul.mubr.msk.f32.vlgmr.msra.gmra.mrb[28].mxu1 %vm337_vm3, %v2921_v23 }
0x13a8   :  { %4830 = vmatpush1.bf16.msra.mxu0 %v6085_v1  ;;  %4842 = vmatpush1.bf16.msra.mxu1 %v6077_v34 }
0x13a9   :  { %4832 = vmatprep.subr.bf16.mxu0 %v6091_v62  ;;  %4844 = vmatprep.subr.bf16.mxu1 %v6081_v47 }
0x13aa   :  { %3213 = vmatprep.mubr.f32.mxu1 %v5529_v0 }
0x13ac   :  { %4834 = vmatpush1.bf16.msra.mxu0 %v6099_v37  ;;  %4846 = vmatpush1.bf16.msra.mxu1 %v6087_v7 }
0x13ad   :  { %4836 = vmatprep.subr.bf16.mxu0 %v6105_v12  ;;  %4848 = vmatprep.subr.bf16.mxu1 %v6093_v11 }
0x13b0   :  { %4838 = vmatpush1.bf16.msra.mxu0 %v6111_v32  ;;  %4850 = vmatpush1.bf16.msra.mxu1 %v6101_v20 }
0x13b1   :  { %4852 = vmatprep.subr.bf16.mxu1 %v6107_v16  ;;  %4856 = vmatprep.subr.bf16.mxu0 %v6052_v22 }
0x13b4   :  { %4854 = vmatpush1.bf16.msra.mxu1 %v6113_v38 }
0x13b5   :  { %4872 = vmatprep.subr.bf16.mxu1 %v6054_v24 }
0x1476   :  { %v2875_v46 = vpop.f32.mrb[28].mxu0 }
0x1477   :  { %v2882_v5 = vrot.slane %v2875_v46, 4  ;;  %v2877_v31 = vpop.f32.mrb[29].mxu0 }
0x1478   :  { %v2883_v63 = vrot.slane %v2877_v31, 4 }
0x1479   :  { %v2886_v41 = vadd.f32 %v2882_v5, %v6162_v44 }
0x147a   :  { %v2990_v45 = vpop.f32.mrb[28].mxu1  ;;  %v2887_v52 = vadd.f32 %v2883_v63, %v6176_v19 }
0x147b   :  { %v4348_v33 = vmul.f32 -1.442695, %v2886_v41  ;;  %v2997_v26 = vrot.slane %v2990_v45, 6  ;;  %v2992_v49 = vpop.f32.mrb[29].mxu1 }
0x147c   :  { %v2998_v3 = vrot.slane %v2992_v49, 6  ;;  %v4349_v18 = vmul.f32 -1.442695, %v2887_v52 }
0x147d   :  { %5236 = vpow2.f32 %v4348_v33  ;;  %v3001_v36 = vadd.f32 %v2997_v26, %v6168_v2 }
0x147e   :  { %v3002_v8 = vadd.f32 %v2998_v3, %v6182_v54 }
0x147f   :  { %v4351_v59 = vmul.f32 -1.442695, %v3001_v36 }
0x1480   :  { %v4352_v43 = vmul.f32 -1.442695, %v3002_v8 }
0x1481   :  { %5238 = vpow2.f32 %v4351_v59 }
0x1482   :  { %5240 = vtanh.f32 %v2887_v52 }
0x1487   :  { %v5237_v39 = vpop.eup %5236 }
0x1488   :  { %v2891_v6 = vadd.f32 1.0, %v5237_v39 }
0x148a   :  { %5242 = vrcp.f32 %v2891_v6 }
0x148b   :  { %v5239_v35 = vpop.eup %5238  ;;  %5244 = vtanh.f32 %v3002_v8 }
0x148c   :  { %v3006_v56 = vadd.f32 1.0, %v5239_v35  ;;  %v5241_v30 = vpop.eup %5240 }
0x148e   :  { %5246 = vrcp.f32 %v3006_v56 }
0x148f   :  { %5248 = vpow2.f32 %v4349_v18 }
0x1490   :  { %5250 = vpow2.f32 %v4352_v43 }
0x1494   :  { %v5243_v4 = vpop.eup %5242 }
0x1495   :  { %v2905_v53 = vmul.f32 %v5243_v4, %v5241_v30  ;;  %v2904_v14 = vmul.f32 %v5243_v4, %v2902_v51  ;;  %v5245_v10 = vpop.eup %5244 }
0x1497   :  { %2907 = vrot.lane.b32.xlu0 %v2905_v53, %s5530_s3 }
0x1498   :  { %v5247_v55 = vpop.eup %5246 }
0x1499   :  { %v3020_v21 = vmul.f32 %v5247_v55, %v5245_v10  ;;  %v3019_v58 = vmul.f32 %v5247_v55, %v3017_v15  ;;  %v5249_v23 = vpop.eup %5248 }
0x149a   :  { %v2898_v46 = vadd.f32 1.0, %v5249_v23  ;;  %v5251_v57 = vpop.eup %5250 }
0x149b   :  { %3022 = vrot.lane.b32.xlu1 %v3020_v21, %s5530_s3  ;;  %v3013_v41 = vadd.f32 1.0, %v5251_v57 }
0x149c   :  { %5252 = vrcp.f32 %v2898_v46 }
0x14a6   :  { %v5253_v33 = vpop.eup %5252 }
0x1509   :  { %v2908_v5 = vpop.permute.xlu0 %2907 }
0x150a   :  { %v6266_v31 = vadd.f32 %v2908_v5, %v2904_v14 }
0x150c   :  { %5254 = vtanh.f32 %v6266_v31 }
0x150d   :  { %v3023_v60 = vpop.permute.xlu1 %3022  ;;  %5256 = vrcp.f32 %v3013_v41 }
0x150e   :  { %v6269_v45 = vadd.f32 %v3023_v60, %v3019_v58 }
0x1510   :  { %5258 = vtanh.f32 %v6269_v45  ;;  %v3236_v5 = vrot.slane %v6269_v45, 2 }
0x1516   :  { %v5255_v26 = vpop.eup %5254 }
0x1517   :  { %v6272_v49 = vmul.f32 %v5255_v26, %v5253_v33  ;;  %v5257_v36 = vpop.eup %5256 }
0x1519   :  { %v3029_v59 = vrot.slane %v6272_v49, 4 }
0x151a   :  { %v5259_v63 = vpop.eup %5258 }
0x151b   :  { %3030 = vrot.lane.b32.xlu0 %v3029_v59, %s5530_s3  ;;  %v3027_v52 = vmul.f32 %v5259_v63, %v5257_v36 }
0x151d   :  { %v3144_v3 = vrot.slane %v3027_v52, 2  ;;  %3028 = vst.msk [vmem:[#allocation2 + $0x8] sm:$0xc] %vm994_vm5, %v3027_v52 }
0x151f   :  { %3145 = vrot.lane.b32.xlu1 %v3144_v3, %s5530_s3 }
0x158d   :  { %v3031_v39 = vpop.permute.xlu0 %3030 }
0x158e   :  { %4353 = vmatmul.mubr.msk.f32.vlgmr.msra.gmra.mrb[30].mxu0 %vm337_vm3, %v3031_v39 }
0x158f   :  { %4858 = vmatpush1.bf16.msra.mxu0 %v6075_v9  ;;  %3317 = vmatprep.mubr.f32.mxu0 %v5529_v0 }
0x1590   :  { %4860 = vmatprep.subr.bf16.mxu0 %v6079_v40 }
0x1591   :  { %v3146_v6 = vpop.permute.xlu1 %3145 }
0x1592   :  { %4356 = vmatmul.mubr.msk.f32.vlgmr.msra.gmra.mrb[30].mxu1 %vm337_vm3, %v3146_v6 }
0x1593   :  { %4874 = vmatpush1.bf16.msra.mxu1 %v6077_v34  ;;  %4862 = vmatpush1.bf16.msra.mxu0 %v6085_v1 }
0x1594   :  { %4876 = vmatprep.subr.bf16.mxu1 %v6081_v47  ;;  %4864 = vmatprep.subr.bf16.mxu0 %v6091_v62 }
0x1595   :  { %3425 = vmatprep.mubr.f32.mxu1 %v5529_v0 }
0x1597   :  { %4878 = vmatpush1.bf16.msra.mxu1 %v6087_v7  ;;  %4866 = vmatpush1.bf16.msra.mxu0 %v6099_v37 }
0x1598   :  { %4880 = vmatprep.subr.bf16.mxu1 %v6093_v11  ;;  %4868 = vmatprep.subr.bf16.mxu0 %v6105_v12 }
0x159b   :  { %4882 = vmatpush1.bf16.msra.mxu1 %v6101_v20  ;;  %4870 = vmatpush1.bf16.msra.mxu0 %v6111_v32 }
0x159c   :  { %4884 = vmatprep.subr.bf16.mxu1 %v6107_v16  ;;  %4888 = vmatprep.subr.bf16.mxu0 %v6052_v22 }
0x159f   :  { %4886 = vmatpush1.bf16.msra.mxu1 %v6113_v38 }
0x15a0   :  { %4904 = vmatprep.subr.bf16.mxu1 %v6054_v24 }
0x1661   :  { %v3100_v8 = vpop.f32.mrb[30].mxu0 }
0x1662   :  { %v3107_v35 = vrot.slane %v3100_v8, 2  ;;  %v3102_v56 = vpop.f32.mrb[31].mxu0 }
0x1663   :  { %v3108_v15 = vrot.slane %v3102_v56, 2 }
0x1664   :  { %v3111_v30 = vadd.f32 %v3107_v35, %v6162_v44 }
0x1665   :  { %v3215_v51 = vpop.f32.mrb[30].mxu1  ;;  %v3112_v55 = vadd.f32 %v3108_v15, %v6176_v19  ;;  %v6340_v15 = vadd.f32 %v6157_v28, %v6152_v25  ;;  %v6350_v25 = vadd.f32 %v6159_v42, %v6173_v29 }
0x1666   :  { %v4354_v4 = vmul.f32 -1.442695, %v3111_v30  ;;  %v3220_v53 = vadd.f32 %v3215_v51, %v6168_v2  ;;  %v3217_v14 = vpop.f32.mrb[31].mxu1  ;;  %v3127_v2 = vrot.slane %v6266_v31, 6 }
0x1667   :  { %v3221_v58 = vadd.f32 %v3217_v14, %v6182_v54  ;;  %v4355_v26 = vmul.f32 -1.442695, %v3112_v55 }
0x1668   :  { %5260 = vpow2.f32 %v4354_v4  ;;  %v4357_v10 = vmul.f32 -1.442695, %v3220_v53 }
0x1669   :  { %v4358_v36 = vmul.f32 -1.442695, %v3221_v58 }
0x166a   :  { %5262 = vpow2.f32 %v4357_v10 }
0x166b   :  { %5264 = vtanh.f32 %v3112_v55 }
0x1672   :  { %v5261_v21 = vpop.eup %5260 }
0x1673   :  { %v3116_v18 = vadd.f32 1.0, %v5261_v21 }
0x1674   :  { %v5263_v43 = vpop.eup %5262 }
0x1675   :  { %5266 = vrcp.f32 %v3116_v18  ;;  %v3225_v23 = vadd.f32 1.0, %v5263_v43  ;;  %v5265_v44 = vpop.eup %5264 }
0x1676   :  { %5268 = vtanh.f32 %v3221_v58  ;;  %v6344_v58 = vadd.f32 %v6144_v50, %v6165_v61  ;;  %v6354_v50 = vadd.f32 %v6146_v27, %v6179_v48 }
0x1677   :  { %5270 = vrcp.f32 %v3225_v23 }
0x1678   :  { %5272 = vpow2.f32 %v4355_v26 }
0x1679   :  { %5274 = vpow2.f32 %v4358_v36 }
0x167f   :  { %v5267_v46 = vpop.eup %5266 }
0x1680   :  { %v5269_v57 = vpop.eup %5268  ;;  %v3130_v41 = vmul.f32 %v5267_v46, %v5265_v44  ;;  %v3129_v60 = vmul.f32 %v5267_v46, %v3127_v2 }
0x1681   :  { %v5271_v19 = vpop.eup %5270 }
0x1682   :  { %3132 = vrot.lane.b32.xlu0 %v3130_v41, %s5530_s3  ;;  %v3239_v54 = vmul.f32 %v5271_v19, %v5269_v57  ;;  %v3238_v33 = vmul.f32 %v5271_v19, %v3236_v5  ;;  %v5273_v59 = vpop.eup %5272 }
0x1683   :  { %v5275_v63 = vpop.eup %5274  ;;  %v3123_v31 = vadd.f32 1.0, %v5273_v59 }
0x1684   :  { %3241 = vrot.lane.b32.xlu1 %v3239_v54, %s5530_s3  ;;  %v3232_v52 = vadd.f32 1.0, %v5275_v63 }
0x1685   :  { %5276 = vrcp.f32 %v3123_v31 }
0x168f   :  { %v5277_v8 = vpop.eup %5276 }
0x16f4   :  { %v3133_v3 = vpop.permute.xlu0 %3132 }
0x16f5   :  { %v6306_v39 = vadd.f32 %v3133_v3, %v3129_v60 }
0x16f6   :  { %v3242_v45 = vpop.permute.xlu1 %3241 }
0x16f7   :  { %5278 = vtanh.f32 %v6306_v39  ;;  %v6309_v6 = vadd.f32 %v3242_v45, %v3238_v33  ;;  %v3340_v42 = vrot.slane %v6306_v39, 6 }
0x16f8   :  { %5280 = vrcp.f32 %v3232_v52 }
0x16f9   :  { %5282 = vtanh.f32 %v6309_v6  ;;  %v3454_v27 = vrot.slane %v6309_v6, 2 }
0x1701   :  { %v5279_v35 = vpop.eup %5278 }
0x1702   :  { %v5281_v56 = vpop.eup %5280  ;;  %v6312_v30 = vmul.f32 %v5279_v35, %v5277_v8 }
0x1703   :  { %v5283_v51 = vpop.eup %5282 }
0x1704   :  { %v3246_v4 = vmul.f32 %v5283_v51, %v5281_v56  ;;  %v3248_v53 = vrot.slane %v6312_v30, 6 }
0x1706   :  { %3357 = vrot.lane.b32.xlu1 %v3246_v4, %s5530_s3  ;;  %3247 = vst.msk [vmem:[#allocation2 + $0x8] sm:$0x3] %vm1215_vm6, %v3246_v4  ;;  %3249 = vrot.lane.b32.xlu0 %v3248_v53, %s5530_s3 }
0x1778   :  { %v3358_v14 = vpop.permute.xlu1 %3357  ;;  %v3250_v10 = vpop.permute.xlu0 %3249 }
0x1779   :  { %4359 = vmatmul.mubr.msk.f32.vlgmr.msra.gmra.mrb[32].mxu0 %vm337_vm3, %v3250_v10  ;;  %4362 = vmatmul.mubr.msk.f32.vlgmr.msra.gmra.mrb[32].mxu1 %vm337_vm3, %v3358_v14 }
0x177a   :  { %4890 = vmatpush1.bf16.msra.mxu0 %v6075_v9  ;;  %4906 = vmatpush1.bf16.msra.mxu1 %v6077_v34 }
0x177b   :  { %4892 = vmatprep.subr.bf16.mxu0 %v6079_v40  ;;  %4908 = vmatprep.subr.bf16.mxu1 %v6081_v47 }
0x177c   :  { %3532 = vmatprep.mubr.f32.mxu0 %v5529_v0  ;;  %3647 = vmatprep.mubr.f32.mxu1 %v5529_v0 }
0x177e   :  { %4894 = vmatpush1.bf16.msra.mxu0 %v6085_v1  ;;  %4910 = vmatpush1.bf16.msra.mxu1 %v6087_v7 }
0x177f   :  { %4896 = vmatprep.subr.bf16.mxu0 %v6091_v62  ;;  %4912 = vmatprep.subr.bf16.mxu1 %v6093_v11 }
0x1782   :  { %4898 = vmatpush1.bf16.msra.mxu0 %v6099_v37  ;;  %4914 = vmatpush1.bf16.msra.mxu1 %v6101_v20 }
0x1783   :  { %4900 = vmatprep.subr.bf16.mxu0 %v6105_v12  ;;  %4916 = vmatprep.subr.bf16.mxu1 %v6107_v16 }
0x1786   :  { %4902 = vmatpush1.bf16.msra.mxu0 %v6111_v32  ;;  %4918 = vmatpush1.bf16.msra.mxu1 %v6113_v38 }
0x1787   :  { %4920 = vmatprep.subr.bf16.mxu0 %v6052_v22  ;;  %4936 = vmatprep.subr.bf16.mxu1 %v6054_v24 }
0x184c   :  { %v3319_v55 = vpop.f32.mrb[32].mxu0  ;;  %v3427_v21 = vpop.f32.mrb[32].mxu1 }
0x184d   :  { %v3324_v18 = vadd.f32 %v3319_v55, %v6340_v15  ;;  %v3434_v43 = vrot.slane %v3427_v21, 2  ;;  %v3321_v23 = vpop.f32.mrb[33].mxu0  ;;  %v3429_v44 = vpop.f32.mrb[33].mxu1 }
0x184e   :  { %v3435_v28 = vrot.slane %v3429_v44, 2  ;;  %v3325_v61 = vadd.f32 %v3321_v23, %v6350_v25 }
0x184f   :  { %v4360_v2 = vmul.f32 -1.442695, %v3324_v18  ;;  %v3438_v46 = vadd.f32 %v3434_v43, %v6344_v58 }
0x1850   :  { %v3439_v41 = vadd.f32 %v3435_v28, %v6354_v50  ;;  %v4361_v52 = vmul.f32 -1.442695, %v3325_v61 }
0x1851   :  { %5284 = vpow2.f32 %v4360_v2  ;;  %v4363_v57 = vmul.f32 -1.442695, %v3438_v46 }
0x1852   :  { %v4364_v3 = vmul.f32 -1.442695, %v3439_v41 }
0x1853   :  { %5286 = vpow2.f32 %v4363_v57 }
0x1854   :  { %5288 = vtanh.f32 %v3325_v61 }
0x185b   :  { %v5285_v5 = vpop.eup %5284 }
0x185c   :  { %v3329_v60 = vadd.f32 1.0, %v5285_v5 }
0x185d   :  { %v5287_v19 = vpop.eup %5286 }
0x185e   :  { %5290 = vrcp.f32 %v3329_v60  ;;  %v3443_v54 = vadd.f32 1.0, %v5287_v19  ;;  %v5289_v33 = vpop.eup %5288 }
0x185f   :  { %5292 = vtanh.f32 %v3439_v41 }
0x1860   :  { %5294 = vrcp.f32 %v3443_v54 }
0x1861   :  { %5296 = vpow2.f32 %v4361_v52 }
0x1862   :  { %5298 = vpow2.f32 %v4364_v3 }
0x1868   :  { %v5291_v29 = vpop.eup %5290 }
0x1869   :  { %v5293_v26 = vpop.eup %5292  ;;  %v3343_v48 = vmul.f32 %v5291_v29, %v5289_v33  ;;  %v3342_v36 = vmul.f32 %v5291_v29, %v3340_v42 }
0x186a   :  { %v5295_v59 = vpop.eup %5294 }
0x186b   :  { %3345 = vrot.lane.b32.xlu0 %v3343_v48, %s5530_s3  ;;  %v3457_v63 = vmul.f32 %v5295_v59, %v5293_v26  ;;  %v3456_v31 = vmul.f32 %v5295_v59, %v3454_v27  ;;  %v5297_v45 = vpop.eup %5296 }
0x186c   :  { %v5299_v8 = vpop.eup %5298  ;;  %v3336_v39 = vadd.f32 1.0, %v5297_v45 }
0x186d   :  { %3459 = vrot.lane.b32.xlu1 %v3457_v63, %s5530_s3  ;;  %v3450_v35 = vadd.f32 1.0, %v5299_v8 }
0x186e   :  { %5300 = vrcp.f32 %v3336_v39 }
0x1878   :  { %v5301_v53 = vpop.eup %5300 }
0x18dd   :  { %v3346_v56 = vpop.permute.xlu0 %3345 }
0x18de   :  { %v6362_v51 = vadd.f32 %v3346_v56, %v3342_v36 }
0x18df   :  { %v3460_v6 = vpop.permute.xlu1 %3459 }
0x18e0   :  { %5302 = vtanh.f32 %v6362_v51  ;;  %v6365_v4 = vadd.f32 %v3460_v6, %v3456_v31  ;;  %v3561_v59 = vrot.slane %v6362_v51, 6 }
0x18e1   :  { %5304 = vrcp.f32 %v3450_v35 }
0x18e2   :  { %5306 = vtanh.f32 %v6365_v4  ;;  %v3676_v45 = vrot.slane %v6365_v4, 2 }
0x18ea   :  { %v5303_v14 = vpop.eup %5302 }
0x18eb   :  { %v5305_v10 = vpop.eup %5304  ;;  %v3350_v55 = vmul.f32 %v5303_v14, %v5301_v53 }
0x18ec   :  { %v5307_v21 = vpop.eup %5306 }
0x18ed   :  { %3352 = vrot.lane.b32.xlu0 %v3350_v55, %s5530_s3  ;;  %v6369_v18 = vmul.f32 %v5307_v21, %v5305_v10 }
0x18ef   :  { %v3578_v43 = vrot.slane %v6369_v18, 6 }
0x18f1   :  { %3579 = vrot.lane.b32.xlu1 %v3578_v43, %s5530_s3 }
0x195f   :  { %v3353_v23 = vpop.permute.xlu0 %3352 }
0x1960   :  { %3355 = vst.msk [vmem:[#allocation2 + $0x8] sm:$0x3] %vm440_vm2, %v3353_v23  ;;  %4365 = vmatmul.mubr.msk.f32.vlgmr.msra.gmra.mrb[34].mxu0 %vm337_vm3, %v3353_v23 }
0x1961   :  { %4922 = vmatpush1.bf16.msra.mxu0 %v6075_v9  ;;  %3757 = vmatprep.mubr.f32.mxu0 %v5529_v0 }
0x1962   :  { %4924 = vmatprep.subr.bf16.mxu0 %v6079_v40 }
0x1963   :  { %v3580_v44 = vpop.permute.xlu1 %3579 }
0x1964   :  { %4368 = vmatmul.mubr.msk.f32.vlgmr.msra.gmra.mrb[34].mxu1 %vm337_vm3, %v3580_v44 }
0x1965   :  { %4926 = vmatpush1.bf16.msra.mxu0 %v6085_v1  ;;  %4938 = vmatpush1.bf16.msra.mxu1 %v6077_v34 }
0x1966   :  { %4928 = vmatprep.subr.bf16.mxu0 %v6091_v62  ;;  %4940 = vmatprep.subr.bf16.mxu1 %v6081_v47 }
0x1967   :  { %3872 = vmatprep.mubr.f32.mxu1 %v5529_v0 }
0x1969   :  { %4930 = vmatpush1.bf16.msra.mxu0 %v6099_v37  ;;  %4942 = vmatpush1.bf16.msra.mxu1 %v6087_v7 }
0x196a   :  { %4932 = vmatprep.subr.bf16.mxu0 %v6105_v12  ;;  %4944 = vmatprep.subr.bf16.mxu1 %v6093_v11 }
0x196d   :  { %4934 = vmatpush1.bf16.msra.mxu0 %v6111_v32  ;;  %4946 = vmatpush1.bf16.msra.mxu1 %v6101_v20 }
0x196e   :  { %4948 = vmatprep.subr.bf16.mxu1 %v6107_v16  ;;  %4952 = vmatprep.subr.bf16.mxu0 %v6052_v22 }
0x1971   :  { %4950 = vmatpush1.bf16.msra.mxu1 %v6113_v38 }
0x1972   :  { %4968 = vmatprep.subr.bf16.mxu1 %v6054_v24 }
0x1a33   :  { %v3534_v2 = vpop.f32.mrb[34].mxu0 }
0x1a34   :  { %v3541_v46 = vrot.slane %v3534_v2, 6  ;;  %v3536_v57 = vpop.f32.mrb[35].mxu0 }
0x1a35   :  { %v3542_v33 = vrot.slane %v3536_v57, 6 }
0x1a36   :  { %v3545_v28 = vadd.f32 %v3541_v46, %v6340_v15 }
0x1a37   :  { %v3649_v61 = vpop.f32.mrb[34].mxu1  ;;  %v3546_v22 = vadd.f32 %v3542_v33, %v6350_v25 }
0x1a38   :  { %v4366_v5 = vmul.f32 -1.442695, %v3545_v28  ;;  %v3656_v41 = vrot.slane %v3649_v61, 4  ;;  %v3651_v60 = vpop.f32.mrb[35].mxu1 }
0x1a39   :  { %v3657_v42 = vrot.slane %v3651_v60, 4  ;;  %v4367_v56 = vmul.f32 -1.442695, %v3546_v22 }
0x1a3a   :  { %5308 = vpow2.f32 %v4366_v5  ;;  %v3660_v19 = vadd.f32 %v3656_v41, %v6344_v58 }
0x1a3b   :  { %v3661_v26 = vadd.f32 %v3657_v42, %v6354_v50 }
0x1a3c   :  { %v4369_v54 = vmul.f32 -1.442695, %v3660_v19 }
0x1a3d   :  { %v4370_v6 = vmul.f32 -1.442695, %v3661_v26 }
0x1a3e   :  { %5310 = vpow2.f32 %v4369_v54 }
0x1a3f   :  { %5312 = vtanh.f32 %v3546_v22 }
0x1a44   :  { %v5309_v29 = vpop.eup %5308 }
0x1a45   :  { %v3550_v24 = vadd.f32 1.0, %v5309_v29 }
0x1a47   :  { %5314 = vrcp.f32 %v3550_v24 }
0x1a48   :  { %v5311_v27 = vpop.eup %5310  ;;  %5316 = vtanh.f32 %v3661_v26 }
0x1a49   :  { %v3665_v48 = vadd.f32 1.0, %v5311_v27  ;;  %v5313_v36 = vpop.eup %5312 }
0x1a4b   :  { %5318 = vrcp.f32 %v3665_v48 }
0x1a4c   :  { %5320 = vpow2.f32 %v4367_v56 }
0x1a4d   :  { %5322 = vpow2.f32 %v4370_v6 }
0x1a51   :  { %v5315_v63 = vpop.eup %5314 }
0x1a52   :  { %v3564_v31 = vmul.f32 %v5315_v63, %v5313_v36  ;;  %v3563_v52 = vmul.f32 %v5315_v63, %v3561_v59  ;;  %v5317_v3 = vpop.eup %5316 }
0x1a54   :  { %3566 = vrot.lane.b32.xlu0 %v3564_v31, %s5530_s3 }
0x1a55   :  { %v5319_v8 = vpop.eup %5318 }
0x1a56   :  { %v3679_v39 = vmul.f32 %v5319_v8, %v5317_v3  ;;  %v3678_v35 = vmul.f32 %v5319_v8, %v3676_v45  ;;  %v5321_v53 = vpop.eup %5320 }
0x1a57   :  { %v3557_v14 = vadd.f32 1.0, %v5321_v53  ;;  %v5323_v51 = vpop.eup %5322 }
0x1a58   :  { %3681 = vrot.lane.b32.xlu1 %v3679_v39, %s5530_s3  ;;  %v3672_v21 = vadd.f32 1.0, %v5323_v51 }
0x1a59   :  { %5324 = vrcp.f32 %v3557_v14 }
0x1a63   :  { %v5325_v23 = vpop.eup %5324 }
0x1ac6   :  { %v3567_v10 = vpop.permute.xlu0 %3566 }
0x1ac7   :  { %v6402_v55 = vadd.f32 %v3567_v10, %v3563_v52 }
0x1ac9   :  { %5326 = vtanh.f32 %v6402_v55  ;;  %v3786_v42 = vrot.slane %v6402_v55, 6 }
0x1aca   :  { %v3682_v4 = vpop.permute.xlu1 %3681  ;;  %5328 = vrcp.f32 %v3672_v21 }
0x1acb   :  { %v6405_v43 = vadd.f32 %v3682_v4, %v3678_v35 }
0x1acd   :  { %5330 = vtanh.f32 %v6405_v43  ;;  %v3901_v48 = vrot.slane %v6405_v43, 2 }
0x1ad3   :  { %v5327_v44 = vpop.eup %5326 }
0x1ad4   :  { %v6408_v2 = vmul.f32 %v5327_v44, %v5325_v23  ;;  %v5329_v46 = vpop.eup %5328 }
0x1ad6   :  { %v3688_v57 = vrot.slane %v6408_v2, 2 }
0x1ad7   :  { %v5331_v28 = vpop.eup %5330 }
0x1ad8   :  { %3689 = vrot.lane.b32.xlu0 %v3688_v57, %s5530_s3  ;;  %v6412_v61 = vmul.f32 %v5331_v28, %v5329_v46 }
0x1ada   :  { %v3803_v5 = vrot.slane %v6412_v61, 4 }
0x1adc   :  { %3804 = vrot.lane.b32.xlu1 %v3803_v5, %s5530_s3 }
0x1b4a   :  { %v3690_v41 = vpop.permute.xlu0 %3689 }
0x1b4b   :  { %4371 = vmatmul.mubr.msk.f32.vlgmr.msra.gmra.mrb[36].mxu0 %vm337_vm3, %v3690_v41 }
0x1b4c   :  { %4954 = vmatpush1.bf16.msra.mxu0 %v6075_v9  ;;  %3982 = vmatprep.mubr.f32.mxu0 %v5529_v0 }
0x1b4d   :  { %4956 = vmatprep.subr.bf16.mxu0 %v6079_v40 }
0x1b4e   :  { %v3805_v60 = vpop.permute.xlu1 %3804 }
0x1b4f   :  { %4374 = vmatmul.mubr.msk.f32.vlgmr.msra.gmra.mrb[36].mxu1 %vm337_vm3, %v3805_v60 }
0x1b50   :  { %4958 = vmatpush1.bf16.msra.mxu0 %v6085_v1  ;;  %4970 = vmatpush1.bf16.msra.mxu1 %v6077_v34 }
0x1b51   :  { %4960 = vmatprep.subr.bf16.mxu0 %v6091_v62  ;;  %4972 = vmatprep.subr.bf16.mxu1 %v6081_v47 }
0x1b52   :  { %4097 = vmatprep.mubr.f32.mxu1 %v5529_v0 }
0x1b54   :  { %4962 = vmatpush1.bf16.msra.mxu0 %v6099_v37  ;;  %4974 = vmatpush1.bf16.msra.mxu1 %v6087_v7 }
0x1b55   :  { %4964 = vmatprep.subr.bf16.mxu0 %v6105_v12  ;;  %4976 = vmatprep.subr.bf16.mxu1 %v6093_v11 }
0x1b58   :  { %4966 = vmatpush1.bf16.msra.mxu0 %v6111_v32  ;;  %4978 = vmatpush1.bf16.msra.mxu1 %v6101_v20 }
0x1b59   :  { %4980 = vmatprep.subr.bf16.mxu1 %v6107_v16 }
0x1b5c   :  { %4982 = vmatpush1.bf16.msra.mxu1 %v6113_v38 }
0x1c1e   :  { %v3759_v9 = vpop.f32.mrb[36].mxu0 }
0x1c1f   :  { %v3766_v34 = vrot.slane %v3759_v9, 4  ;;  %v3761_v40 = vpop.f32.mrb[37].mxu0 }
0x1c20   :  { %v3767_v12 = vrot.slane %v3761_v40, 4 }
0x1c21   :  { %v3770_v0 = vadd.f32 %v3766_v34, %v6340_v15 }
0x1c22   :  { %v3874_v47 = vpop.f32.mrb[36].mxu1  ;;  %v3771_v20 = vadd.f32 %v3767_v12, %v6350_v25 }
0x1c23   :  { %v4372_v1 = vmul.f32 -1.442695, %v3770_v0  ;;  %v3881_v7 = vrot.slane %v3874_v47, 6  ;;  %v3876_v62 = vpop.f32.mrb[37].mxu1 }
0x1c24   :  { %v3882_v16 = vrot.slane %v3876_v62, 6  ;;  %v4373_v31 = vmul.f32 -1.442695, %v3771_v20 }
0x1c25   :  { %5332 = vpow2.f32 %v4372_v1  ;;  %v3885_v11 = vadd.f32 %v3881_v7, %v6344_v58 }
0x1c26   :  { %v3886_v19 = vadd.f32 %v3882_v16, %v6354_v50 }
0x1c27   :  { %v4375_v37 = vmul.f32 -1.442695, %v3885_v11 }
0x1c28   :  { %v4376_v52 = vmul.f32 -1.442695, %v3886_v19 }
0x1c29   :  { %5334 = vpow2.f32 %v4375_v37 }
0x1c2a   :  { %5336 = vtanh.f32 %v3771_v20 }
0x1c2f   :  { %v5333_v32 = vpop.eup %5332 }
0x1c30   :  { %v3775_v38 = vadd.f32 1.0, %v5333_v32 }
0x1c32   :  { %5338 = vrcp.f32 %v3775_v38 }
0x1c33   :  { %v5335_v54 = vpop.eup %5334  ;;  %5340 = vtanh.f32 %v3886_v19 }
0x1c34   :  { %v3890_v33 = vadd.f32 1.0, %v5335_v54  ;;  %v5337_v22 = vpop.eup %5336 }
0x1c36   :  { %5342 = vrcp.f32 %v3890_v33 }
0x1c37   :  { %5344 = vpow2.f32 %v4373_v31 }
0x1c38   :  { %5346 = vpow2.f32 %v4376_v52 }
0x1c3c   :  { %v5339_v29 = vpop.eup %5338 }
0x1c3d   :  { %v3789_v24 = vmul.f32 %v5339_v29, %v5337_v22  ;;  %v3788_v26 = vmul.f32 %v5339_v29, %v3786_v42  ;;  %v5341_v27 = vpop.eup %5340 }
0x1c3f   :  { %3791 = vrot.lane.b32.xlu0 %v3789_v24, %s5530_s3 }
0x1c40   :  { %v5343_v36 = vpop.eup %5342 }
0x1c41   :  { %v3904_v59 = vmul.f32 %v5343_v36, %v5341_v27  ;;  %v3903_v63 = vmul.f32 %v5343_v36, %v3901_v48  ;;  %v5345_v3 = vpop.eup %5344 }
0x1c42   :  { %v3782_v45 = vadd.f32 1.0, %v5345_v3  ;;  %v5347_v8 = vpop.eup %5346 }
0x1c43   :  { %3906 = vrot.lane.b32.xlu1 %v3904_v59, %s5530_s3  ;;  %v3897_v56 = vadd.f32 1.0, %v5347_v8 }
0x1c44   :  { %5348 = vrcp.f32 %v3782_v45  ;;  %v5531_v45 = vmov 1966171168  }
0x1c45   :  { %v4136_v8 = vunpack.c.l.s4 %v5531_v45 }
0x1c4e   :  { %v5349_v14 = vpop.eup %5348 }
0x1cb1   :  { %v3792_v39 = vpop.permute.xlu0 %3791 }
0x1cb2   :  { %v3794_v35 = vadd.f32 %v3792_v39, %v3788_v26 }
0x1cb4   :  { %5350 = vtanh.f32 %v3794_v35  ;;  %v4011_v20 = vrot.slane %v3794_v35, 6 }
0x1cb5   :  { %v3907_v6 = vpop.permute.xlu1 %3906  ;;  %5352 = vrcp.f32 %v3897_v56  ;;  %v4137_v56 = vunpack.c.0.s8 %v4136_v8 }
0x1cb6   :  { %v3909_v53 = vadd.f32 %v3907_v6, %v3903_v63 }
0x1cb8   :  { %5354 = vtanh.f32 %v3909_v53  ;;  %v4120_v32 = vrot.slane %v3909_v53, 2 }
0x1cbe   :  { %v5351_v51 = vpop.eup %5350 }
0x1cbf   :  { %v3796_v10 = vmul.f32 %v5351_v51, %v5349_v14  ;;  %v5353_v55 = vpop.eup %5352 }
0x1cc1   :  { %v3913_v21 = vrot.slane %v3796_v10, 4 }
0x1cc2   :  { %v5355_v4 = vpop.eup %5354 }
0x1cc3   :  { %3914 = vrot.lane.b32.xlu0 %v3913_v21, %s5530_s3  ;;  %v6443_v43 = vmul.f32 %v5355_v4, %v5353_v55 }
0x1cc5   :  { %v4028_v23 = vrot.slane %v6443_v43, 2 }
0x1cc7   :  { %4029 = vrot.lane.b32.xlu1 %v4028_v23, %s5530_s3 }
0x1d35   :  { %v3915_v44 = vpop.permute.xlu0 %3914 }
0x1d36   :  { %4377 = vmatmul.mubr.msk.f32.vlgmr.msra.gmra.mrb[38].mxu0 %vm337_vm3, %v3915_v44 }
0x1d39   :  { %v4030_v46 = vpop.permute.xlu1 %4029 }
0x1d3a   :  { %4380 = vmatmul.mubr.msk.f32.vlgmr.msra.gmra.mrb[38].mxu1 %vm337_vm3, %v4030_v46 }
0x1e09   :  { %v3984_v57 = vpop.f32.mrb[38].mxu0 }
0x1e0a   :  { %v3991_v28 = vrot.slane %v3984_v57, 2  ;;  %v3986_v5 = vpop.f32.mrb[39].mxu0 }
0x1e0b   :  { %v3992_v47 = vrot.slane %v3986_v5, 2 }
0x1e0c   :  { %v3995_v41 = vadd.f32 %v3991_v28, %v6340_v15 }
0x1e0d   :  { %v4099_v60 = vpop.f32.mrb[38].mxu1  ;;  %v3996_v1 = vadd.f32 %v3992_v47, %v6350_v25 }
0x1e0e   :  { %v4378_v9 = vmul.f32 -1.442695, %v3995_v41  ;;  %v4104_v34 = vadd.f32 %v4099_v60, %v6344_v58  ;;  %v4101_v40 = vpop.f32.mrb[39].mxu1 }
0x1e0f   :  { %v4105_v62 = vadd.f32 %v4101_v40, %v6354_v50  ;;  %v4379_v50 = vmul.f32 -1.442695, %v3996_v1 }
0x1e10   :  { %5356 = vpow2.f32 %v4378_v9  ;;  %v4381_v0 = vmul.f32 -1.442695, %v4104_v34 }
0x1e11   :  { %v4382_v22 = vmul.f32 -1.442695, %v4105_v62 }
0x1e12   :  { %5358 = vpow2.f32 %v4381_v0 }
0x1e13   :  { %5360 = vtanh.f32 %v3996_v1 }
0x1e1a   :  { %v5357_v7 = vpop.eup %5356 }
0x1e1b   :  { %v4000_v11 = vadd.f32 1.0, %v5357_v7 }
0x1e1c   :  { %v5359_v37 = vpop.eup %5358 }
0x1e1d   :  { %5362 = vrcp.f32 %v4000_v11  ;;  %v4109_v12 = vadd.f32 1.0, %v5359_v37  ;;  %v5361_v15 = vpop.eup %5360 }
0x1e1e   :  { %5364 = vtanh.f32 %v4105_v62 }
0x1e1f   :  { %5366 = vrcp.f32 %v4109_v12 }
0x1e20   :  { %5368 = vpow2.f32 %v4379_v50 }
0x1e21   :  { %5370 = vpow2.f32 %v4382_v22 }
0x1e27   :  { %v5363_v58 = vpop.eup %5362 }
0x1e28   :  { %v5365_v16 = vpop.eup %5364  ;;  %v4014_v38 = vmul.f32 %v5363_v58, %v5361_v15  ;;  %v4013_v19 = vmul.f32 %v5363_v58, %v4011_v20 }
0x1e29   :  { %v5367_v54 = vpop.eup %5366 }
0x1e2a   :  { %4016 = vrot.lane.b32.xlu0 %v4014_v38, %s5530_s3  ;;  %v4123_v25 = vmul.f32 %v5367_v54, %v5365_v16  ;;  %v4122_v33 = vmul.f32 %v5367_v54, %v4120_v32  ;;  %v5369_v42 = vpop.eup %5368 }
0x1e2b   :  { %v5371_v29 = vpop.eup %5370  ;;  %v4007_v24 = vadd.f32 1.0, %v5369_v42 }
0x1e2c   :  { %4125 = vrot.lane.b32.xlu1 %v4123_v25, %s5530_s3  ;;  %v4116_v26 = vadd.f32 1.0, %v5371_v29 }
0x1e2d   :  { %5372 = vrcp.f32 %v4007_v24 }
0x1e2e   :  { %2689 = vrot.lane.b32.xlu0 %v6232_v13, %s5530_s3 }
0x1e30   :  { %2914 = vrot.lane.b32.xlu1 %v6272_v49, %s5530_s3 }
0x1e32   :  { %3139 = vrot.lane.b32.xlu0 %v6312_v30, %s5530_s3 }
0x1e34   :  { %3573 = vrot.lane.b32.xlu1 %v6408_v2, %s5530_s3 }
0x1e36   :  { %3798 = vrot.lane.b32.xlu0 %v3796_v10, %s5530_s3 }
0x1e37   :  { %v5373_v63 = vpop.eup %5372 }
0x1e9c   :  { %v4017_v13 = vpop.permute.xlu0 %4016 }
0x1e9d   :  { %v4019_v27 = vadd.f32 %v4017_v13, %v4013_v19 }
0x1e9e   :  { %v4126_v49 = vpop.permute.xlu1 %4125 }
0x1e9f   :  { %5374 = vtanh.f32 %v4019_v27  ;;  %v4128_v48 = vadd.f32 %v4126_v49, %v4122_v33 }
0x1ea0   :  { %5376 = vrcp.f32 %v4116_v26  ;;  %v2690_v30 = vpop.permute.xlu0 %2689 }
0x1ea1   :  { %5378 = vtanh.f32 %v4128_v48  ;;  %2692 = vst.msk [vmem:[#allocation2] sm:$0xc] %vm655_vm7, %v2690_v30 }
0x1ea2   :  { %3912 = vst.msk [vmem:[#allocation2] sm:$0xc] %vm994_vm5, %v6443_v43  ;;  %v2915_v2 = vpop.permute.xlu1 %2914 }
0x1ea3   :  { %2917 = vst.msk [vmem:[#allocation2] sm:$0x30] %vm882_vm9, %v2915_v2 }
0x1ea4   :  { %3687 = vst.msk [vmem:[#allocation2] sm:$0x30] %vm767_vm4, %v6412_v61  ;;  %v3140_v36 = vpop.permute.xlu0 %3139 }
0x1ea5   :  { %3142 = vst.msk [vmem:[#allocation2] sm:$0xc0] %vm1109_vm8, %v3140_v36 }
0x1ea6   :  { %3465 = vst.msk [vmem:[#allocation2] sm:$0xc0] %vm543_vm1, %v6369_v18  ;;  %v3574_v59 = vpop.permute.xlu1 %3573  ;;  %v4140_v18 = vsub.s32 %v4137_v56, %v5728_v17 }
0x1ea7   :  { %3576 = vst.msk [vmem:[#allocation2 + $0x8] sm:$0xc] %vm655_vm7, %v3574_v59 }
0x1ea8   :  { %v3799_v31 = vpop.permute.xlu0 %3798 }
0x1ea9   :  { %v5375_v52 = vpop.eup %5374  ;;  %3801 = vst.msk [vmem:[#allocation2 + $0x8] sm:$0x30] %vm882_vm9, %v3799_v31 }
0x1eaa   :  { %v5377_v3 = vpop.eup %5376  ;;  %v4021_v39 = vmul.f32 %v5375_v52, %v5373_v63 }
0x1eab   :  { %v5379_v35 = vpop.eup %5378 }
0x1eac   :  { %v4130_v61 = vmul.f32 %v5379_v35, %v5377_v3  ;;  %4023 = vrot.lane.b32.xlu1 %v4021_v39, %s5530_s3 }
0x1eae   :  { %4131 = vst.msk [vmem:[#allocation2] sm:$0x3] %vm1215_vm6, %v4130_v61 }
0x1eb5   :  { %v4132_v6 = vld [vmem:[#allocation2] sm:$0xff] }
0x1eb6   :  { %v4141_v53 = vrot.slane %v4132_v6, %v4140_v18  ;;  %v4167_v14 = vcombine.high %v4132_v6, %v4132_v6 }
0x1eb8   :  { %v4142_v51 = vcombine.high %v4141_v53, %v4141_v53  ;;  %v4149_v10 = vrot.slane %v4141_v53, %v4140_v18  ;;  %4383 = vst.sshfl [vmem:[#allocation12] sm:$0x1 pattern:$0x73625140] %v4141_v53  ;;  %v4174_v55 = vrot.slane %v4167_v14, %v4140_v18 }
0x1eba   :  { %v4156_v21 = vrot.slane %v4142_v51, %v4140_v18  ;;  %4384 = vst.sshfl [vmem:[#allocation12 + $0x8] sm:$0x1 pattern:$0x73625140] %v4142_v51  ;;  %v4161_v4 = vcombine.high %v4149_v10, %v4149_v10  ;;  %v4175_v43 = vcombine.high %v4174_v55, %v4174_v55  ;;  %v4182_v23 = vrot.slane %v4174_v55, %v4140_v18 }
0x1ebb   :  { %4385 = vst.sshfl [vmem:[#allocation12 + $0x2] sm:$0x1 pattern:$0x73625140] %v4174_v55 }
0x1ebc   :  { %v4162_v44 = vcombine.high %v4156_v21, %v4156_v21  ;;  %4165 = vst [vmem:[#allocation12 + $0x1] sm:$0x1] %v4161_v4  ;;  %v4189_v46 = vrot.slane %v4175_v43, %v4140_v18  ;;  %4386 = vst.sshfl [vmem:[#allocation12 + $0xa] sm:$0x1 pattern:$0x73625140] %v4175_v43  ;;  %v4194_v57 = vcombine.high %v4182_v23, %v4182_v23 }
0x1ebe   :  { %4166 = vst [vmem:[#allocation12 + $0x9] sm:$0x1] %v4162_v44  ;;  %v4195_v17 = vcombine.high %v4189_v46, %v4189_v46  ;;  %4198 = vst [vmem:[#allocation12 + $0x3] sm:$0x1] %v4194_v57 }
0x1ec0   :  { %4199 = vst [vmem:[#allocation12 + $0xb] sm:$0x1] %v4195_v17 }
0x1f1e   :  { %v4024_v28 = vpop.permute.xlu1 %4023 }
0x1f1f   :  { %4026 = vst.msk [vmem:[#allocation2 + $0x8] sm:$0xc0] %vm1109_vm8, %v4024_v28 }
0x1f26   :  { %v4133_v5 = vld [vmem:[#allocation2 + $0x8] sm:$0xff] }
0x1f27   :  { %v4207_v41 = vrot.slane %v4133_v5, %v4140_v18  ;;  %v4233_v60 = vcombine.high %v4133_v5, %v4133_v5 }
0x1f29   :  { %v4208_v9 = vcombine.high %v4207_v41, %v4207_v41  ;;  %v4215_v34 = vrot.slane %v4207_v41, %v4140_v18  ;;  %4387 = vst.sshfl [vmem:[#allocation12 + $0x4] sm:$0x1 pattern:$0x73625140] %v4207_v41  ;;  %v4240_v40 = vrot.slane %v4233_v60, %v4140_v18 }
0x1f2b   :  { %v4222_v0 = vrot.slane %v4208_v9, %v4140_v18  ;;  %4388 = vst.sshfl [vmem:[#allocation12 + $0xc] sm:$0x1 pattern:$0x73625140] %v4208_v9  ;;  %v4227_v47 = vcombine.high %v4215_v34, %v4215_v34  ;;  %v4241_v1 = vcombine.high %v4240_v40, %v4240_v40  ;;  %v4248_v7 = vrot.slane %v4240_v40, %v4140_v18 }
0x1f2c   :  { %4389 = vst.sshfl [vmem:[#allocation12 + $0x6] sm:$0x1 pattern:$0x73625140] %v4240_v40 }
0x1f2d   :  { %v4228_v62 = vcombine.high %v4222_v0, %v4222_v0  ;;  %4231 = vst [vmem:[#allocation12 + $0x5] sm:$0x1] %v4227_v47  ;;  %v4255_v11 = vrot.slane %v4241_v1, %v4140_v18  ;;  %4390 = vst.sshfl [vmem:[#allocation12 + $0xe] sm:$0x1 pattern:$0x73625140] %v4241_v1  ;;  %v4260_v37 = vcombine.high %v4248_v7, %v4248_v7 }
0x1f2f   :  { %4232 = vst [vmem:[#allocation12 + $0xd] sm:$0x1] %v4228_v62  ;;  %v4261_v12 = vcombine.high %v4255_v11, %v4255_v11  ;;  %4264 = vst [vmem:[#allocation12 + $0x7] sm:$0x1] %v4260_v37 }
0x1f31   :  { %4265 = vst [vmem:[#allocation12 + $0xf] sm:$0x1] %v4261_v12 }
0x1f32   :  { %5501 = shalt.err (!%p5498_p2)
}
0x1f33   :  { %s5502_s28 = scalar_lea.hbm %s6501_s7, 256 }
0x1f34   :  { %p5503_p3 = scmp.ne.s32.totalorder %s6501_s7, %s5502_s28  ;;  %p5506_p4 = scmp.lt.u32.totalorder %s5502_s28, %s6501_s7 }
0x1f36   :  { %p5508_p5 = pnand %p5506_p4, %p5503_p3 }
0x1f38   :  { %5511 = shalt.err (!%p5508_p5)
}
0x1f39   :  { %4277 = dma.vmem_to_hbm [thread:$0]  %s4272_s26, 256, %s6501_s7, [#allocation5], %s5525_s4, %s5525_s4, %s5526_s15  }
0x1f3a   :  { %5518 = dma.done.wait [#allocation5], 256  }
0x1f3b   :  { %5519 = vsyncadd [#allocation5], 4294967040 }
0x1f3c   :  { %4281 = vsyncpa [#allocation4], 1 }
0x1f3d   :  { %4282 = vsyncpa [#allocation7], 1 }
0x1f3e   :  { %4283 = vsyncpa [#allocation10], 1 }
0x1f3f   :  { %4284 = vsyncpa [#allocation5], 1 }

</bundles_post_ra>
